<compile_context>
chip_gen: v5e
topology: v5e:2x2
jax: 0.10.0
libtpu: 0.0.40
codegen_flags: <defaults>
</compile_context>

<pallas_src>
import math

import numpy as np
import jax
import jax.numpy as jnp
from jax.experimental import pallas as pl
from jax.experimental.pallas import tpu as pltpu

# ------------------------- static configuration -------------------------
B = 2             # batch
L = 16            # configs.input_length  (seq_len == pred_len in this module)
C_IN = 4          # input_feature
D_MODEL = 32      # configs.d_model
N_HEADS = 4       # configs.n_heads (corr is averaged over heads & channels -> head-agnostic math)
D_FF = 32         # configs.d_ff
MOVING_AVG = 5    # configs.moving_avg (odd)
FACTOR = 1        # configs.factor
E_LAYERS = 1
D_LAYERS = 1
PRED_DIM = 1
M = B * L                              # flat row count (row = b*L + t)
TOP_K = int(FACTOR * math.log(L))      # inference-time time-delay top-k (== 2 here)
PACK_W = 128                           # lane width of the packed parameter buffer


# ------------------------- host-side constants -------------------------
def _build_constants():
    eye_b = np.eye(B, dtype=np.float32)
    pad = (MOVING_AVG - 1) // 2

    # series_decomp moving average with replicate padding, as an (L, L) matrix
    ma = np.zeros((L, L), np.float32)
    for t in range(L):
        for d in range(-pad, pad + 1):
            ma[t, min(max(t + d, 0), L - 1)] += 1.0 / MOVING_AVG

    # circular shift matrices for Conv1d(k=3, padding_mode='circular')
    sp1 = np.zeros((L, L), np.float32)   # (sp1 @ a)[t] = a[(t-1) % L]
    sm1 = np.zeros((L, L), np.float32)   # (sm1 @ a)[t] = a[(t+1) % L]
    for t in range(L):
        sp1[t, (t - 1) % L] = 1.0
        sm1[t, (t + 1) % L] = 1.0

    # my_Layernorm per-batch sequence-mean removal:  x_hat - mean_t(x_hat)
    center = np.eye(L, dtype=np.float32) - np.full((L, L), 1.0 / L, np.float32)

    # autocorrelation delay selector (1/D baked in):
    #   mean_value[b, u] = sum_{t,s} Gram[b, t, s] * r2[t*L + s, u]
    #   with r2[t*L + s, u] = 1/D  iff  s == (t - u) % L
    r2 = np.zeros((L * L, L), np.float32)
    for t in range(L):
        for s in range(L):
            r2[t * L + s, (t - s) % L] = 1.0 / D_MODEL

    # block-diagonal (per batch) versions acting on the flat (B*L, .) layout
    return dict(
        ma=np.kron(eye_b, ma),
        sp1=np.kron(eye_b, sp1),
        sm1=np.kron(eye_b, sm1),
        center=np.kron(eye_b, center),
        r2=r2,
    )


# ------------------------- parameter packing -------------------------
def _pack_params(tensors):
    """Pack a dict of small 2-D f32 arrays into one (rows, 128) buffer."""
    layout = {}
    off = 0
    for name, arr in tensors.items():
        a = np.asarray(arr, np.float32)
        if a.ndim == 1:
            a = a[None, :]
        r, c = a.shape
        assert c <= PACK_W, name
        layout[name] = (off, r, c)
        off += ((r + 7) // 8) * 8          # keep every tensor 8-row (sublane) aligned
    total = ((off + 7) // 8) * 8
    buf = np.zeros((total, PACK_W), np.float32)
    for name, arr in tensors.items():
        a = np.asarray(arr, np.float32)
        if a.ndim == 1:
            a = a[None, :]
        o, r, c = layout[name]
        buf[o:o + r, :c] = a
    return jnp.asarray(buf), layout


def init_packed_params(seed=0):
    rng = np.random.RandomState(seed)

    def dense(fi, fo):
        return (rng.randn(fi, fo) / math.sqrt(fi)).astype(np.float32)

    def bias(fo):
        return (0.02 * rng.randn(1, fo)).astype(np.float32)

    def conv3(c_out, c_in):
        # Conv1d(c_in, c_out, k=3) -> fused (3*c_in, c_out): row j*c_in + c = tap j, channel c
        w3 = (rng.randn(c_out, c_in, 3) / math.sqrt(3 * c_in)).astype(np.float32)
        return np.transpose(w3, (2, 1, 0)).reshape(3 * c_in, c_out)

    t = {}
    t.update(_build_constants())

    t['enc_emb'] = conv3(D_MODEL, C_IN)         # value embedding (TokenEmbedding)
    t['dec_emb'] = conv3(D_MODEL, C_IN)

    for i in range(E_LAYERS):
        t[f'enc{i}_wqkv'] = np.concatenate([dense(D_MODEL, D_MODEL) for _ in range(3)], axis=1)
        t[f'enc{i}_bqkv'] = bias(3 * D_MODEL)
        t[f'enc{i}_wo'] = dense(D_MODEL, D_MODEL)
        t[f'enc{i}_bo'] = bias(D_MODEL)
        t[f'enc{i}_c1'] = dense(D_MODEL, D_FF)
        t[f'enc{i}_c2'] = dense(D_FF, D_MODEL)
    t['enc_ng'] = np.ones((1, D_MODEL), np.float32)
    t['enc_nb'] = np.zeros((1, D_MODEL), np.float32)

    for i in range(D_LAYERS):
        t[f'dec{i}_swqkv'] = np.concatenate([dense(D_MODEL, D_MODEL) for _ in range(3)], axis=1)
        t[f'dec{i}_sbqkv'] = bias(3 * D_MODEL)
        t[f'dec{i}_swo'] = dense(D_MODEL, D_MODEL)
        t[f'dec{i}_sbo'] = bias(D_MODEL)
        t[f'dec{i}_cwq'] = dense(D_MODEL, D_MODEL)        # cross-attn: Q from decoder input
        t[f'dec{i}_cbq'] = bias(D_MODEL)
        t[f'dec{i}_cwkv'] = np.concatenate([dense(D_MODEL, D_MODEL) for _ in range(2)], axis=1)
        t[f'dec{i}_cbkv'] = bias(2 * D_MODEL)             # cross-attn: K|V from encoder output
        t[f'dec{i}_cwo'] = dense(D_MODEL, D_MODEL)
        t[f'dec{i}_cbo'] = bias(D_MODEL)
        t[f'dec{i}_c1'] = dense(D_MODEL, D_FF)
        t[f'dec{i}_c2'] = dense(D_FF, D_MODEL)
        t[f'dec{i}_proj3'] = conv3(C_IN, D_MODEL)         # trend Conv1d(d_model, c_in, 3, circular)
    t['dec_ng'] = np.ones((1, D_MODEL), np.float32)
    t['dec_nb'] = np.zeros((1, D_MODEL), np.float32)
    t['outw'] = dense(D_MODEL, C_IN)                      # decoder projection Linear(d_model, c_in)
    t['outb'] = bias(C_IN)

    # predictor: Flatten(start_dim=1) + Linear(L*C_IN -> 1); weight stored pre-tiled
    # to the flat (B*L, C_IN) layout (row b*L + l, col c) = W[l*C_IN + c]
    pw = (rng.randn(1, L * C_IN) / math.sqrt(L * C_IN)).astype(np.float32)
    t['predw'] = np.tile(pw.reshape(L, C_IN), (B, 1))
    t['predb'] = (0.02 * rng.randn(1, 1)).astype(np.float32)

    return _pack_params(t)


# ------------------------- the fused Pallas kernel -------------------------
def make_kernel(layout):
    bf16 = jnp.bfloat16
    f32 = jnp.float32

    def kernel(x_ref, pk_ref, out_ref):
        def ld(name):
            off, r, c = layout[name]
            return pk_ref[pl.ds(off, r), pl.ds(0, c)]

        def mxm(a, w):
            # MXU matmul: bf16 operands, f32 accumulation
            return jnp.dot(a.astype(bf16), w.astype(bf16), preferred_element_type=f32)

        # constants (loaded once, converted to bf16 once)
        ma = ld('ma').astype(bf16)          # (M, M) block-diag moving average
        sp1 = ld('sp1').astype(bf16)        # (M, M) circular shift  x[(t-1)%L]
        sm1 = ld('sm1').astype(bf16)        # (M, M) circular shift  x[(t+1)%L]
        center = ld('center').astype(bf16)  # (M, M) per-batch seq-mean removal
        r2 = ld('r2').astype(bf16)          # (L*L, L) delay selector (1/D baked in)

        def seq(mat_bf, a):                 # sequence-axis mixing: (M, M) @ (M, N)
            return jnp.dot(mat_bf, a.astype(bf16), preferred_element_type=f32)

        def decomp(a):                      # series_decomp
            trend = seq(ma, a)
            return a - trend, trend

        def circ_conv3(a, w3):
            # Conv1d(k=3, padding=1, circular, bias=False); 3 taps fused into one K=3C matmul
            x3 = jnp.concatenate([seq(sp1, a), a, seq(sm1, a)], axis=-1)
            return mxm(x3, w3)

        def my_layernorm(a, g, b):
            mu = jnp.mean(a, axis=-1, keepdims=True)
            var = jnp.mean((a - mu) ** 2, axis=-1, keepdims=True)
            x_hat = (a - mu) * jax.lax.rsqrt(var + 1e-5) * g + b
            return seq(center, x_hat)       # x_hat - mean over the sequence (per batch)

        lane = jax.lax.broadcasted_iota(jnp.int32, (1, L), 1).astype(f32)       # (1, L)
        li = jax.lax.broadcasted_iota(jnp.int32, (L, L), 0).astype(f32)[None]   # output position
        mi = jax.lax.broadcasted_iota(jnp.int32, (L, L), 1).astype(f32)[None]   # source position

        def autocorr(q, k, v):
            # q, k, v: (M, D) flat [row = b*L + t]
            qb = q.reshape(B, L, D_MODEL)
            kb = k.reshape(B, L, D_MODEL)
            vb = v.reshape(B, L, D_MODEL)

            # channel Gram (MXU): G[b,t,s] = <Q[b,t,:], K[b,s,:]>
            g = jnp.einsum('btd,bsd->bts', qb.astype(bf16), kb.astype(bf16),
                           preferred_element_type=f32)
            # mean over heads & channels of the circular correlation, via one MXU
            # contraction with the constant delay selector (exact FFT-equivalent).
            g2 = jnp.concatenate([g[:, t, :] for t in range(L)], axis=-1)        # (B, L*L)
            mv = jnp.dot(g2.astype(bf16), r2, preferred_element_type=f32)        # (B, L)

            # inference-time top-k delays + softmax weights (index math stays f32)
            vals = mv
            ws, ds = [], []
            for _ in range(TOP_K):
                w = jnp.max(vals, axis=-1, keepdims=True)                        # (B, 1)
                d = jnp.min(jnp.where(vals >= w, lane, float(L)),
                            axis=-1, keepdims=True)                              # (B, 1)
                ws.append(w)
                ds.append(d)
                vals = jnp.where(lane == d, -1e30, vals)
            exps = [jnp.exp(w - ws[0]) for w in ws]
            denom = exps[0]
            for e in exps[1:]:
                denom = denom + e
            inv = pl.reciprocal(denom, approx=True)                              # (B, 1)

            # aggregation matrix A[b,l,m] = sum_i softmax_i(b) * [m == (l + delay_i(b)) % L]
            a_mat = jnp.zeros((B, L, L), f32)
            for i in range(TOP_K):
                s = li + ds[i][:, :, None]
                hot = jnp.where(s == mi, 1.0, 0.0) + jnp.where(s == mi + L, 1.0, 0.0)
                a_mat = a_mat + (exps[i] * inv)[:, :, None] * hot
            agg = jnp.einsum('blm,bmd->bld', a_mat.astype(bf16), vb.astype(bf16),
                             preferred_element_type=f32)                         # (B, L, D)
            return agg.reshape(M, D_MODEL)

        def attn_self(xx, wqkv, bqkv, wo, bo):
            qkv = mxm(xx, wqkv) + bqkv                 # fused (D, 3D) projection
            out = autocorr(qkv[:, :D_MODEL],
                           qkv[:, D_MODEL:2 * D_MODEL],
                           qkv[:, 2 * D_MODEL:])
            return mxm(out, wo) + bo

        def attn_cross(xx, cross, wq, bq, wkv, bkv, wo, bo):
            q = mxm(xx, wq) + bq                       # Q only from the decoder stream
            kv = mxm(cross, wkv) + bkv                 # K|V only from the encoder output
            out = autocorr(q, kv[:, :D_MODEL], kv[:, D_MODEL:])
            return mxm(out, wo) + bo

        # ---------------- forward pass ----------------
        x = x_ref[...]                                 # (M, C_IN) flat input
        seasonal_init, trend_init = decomp(x)

        # encoder
        enc = circ_conv3(x, ld('enc_emb'))             # DataEmbedding_wo_pos (value embedding)
        for i in range(E_LAYERS):
            p = lambda n: ld(f'enc{i}_{n}')
            enc = enc + attn_self(enc, p('wqkv'), p('bqkv'), p('wo'), p('bo'))
            enc, _ = decomp(enc)
            y = jnp.maximum(mxm(enc, p('c1')), 0.0)    # Conv1d(d_model, d_ff, 1) + ReLU
            y = mxm(y, p('c2'))                        # Conv1d(d_ff, d_model, 1)
            enc, _ = decomp(enc + y)
        enc = my_layernorm(enc, ld('enc_ng'), ld('enc_nb'))

        # decoder (this module feeds the full-length seasonal/trend init directly)
        dec = circ_conv3(seasonal_init, ld('dec_emb'))
        trend = trend_init
        for i in range(D_LAYERS):
            p = lambda n: ld(f'dec{i}_{n}')
            dec = dec + attn_self(dec, p('swqkv'), p('sbqkv'), p('swo'), p('sbo'))
            dec, t1 = decomp(dec)
            dec = dec + attn_cross(dec, enc, p('cwq'), p('cbq'),
                                   p('cwkv'), p('cbkv'), p('cwo'), p('cbo'))
            dec, t2 = decomp(dec)
            y = jnp.maximum(mxm(dec, p('c1')), 0.0)
            y = mxm(y, p('c2'))
            dec, t3 = decomp(dec + y)
            trend = trend + circ_conv3(t1 + t2 + t3, p('proj3'))
        dec = my_layernorm(dec, ld('dec_ng'), ld('dec_nb'))
        dec = mxm(dec, ld('outw')) + ld('outb')        # Linear(d_model -> c_in)
        dec = dec + trend                              # decoder output = seasonal + trend

        # predictor: Flatten(start_dim=1) + Linear(L*C_IN -> 1)
        prod = dec * ld('predw')                       # (M, C_IN) weight pre-tiled to flat layout
        rowsum = jnp.sum(prod, axis=-1, keepdims=True) # (M, 1)
        pred = jnp.sum(rowsum.reshape(B, L, 1), axis=1)  # (B, 1)
        out_ref[...] = pred + ld('predb')

    return kernel


# ------------------------- wrapper -------------------------
def build_autoformer(seed=0):
    packed, layout = init_packed_params(seed)
    kernel = make_kernel(layout)

    @jax.jit
    def forward(packed_buf, x_enc):
        x_flat = x_enc.reshape(B * L, C_IN)
        pred = pl.pallas_call(
            kernel,
            out_shape=jax.ShapeDtypeStruct((B, PRED_DIM), jnp.float32),
            in_specs=[
                pl.BlockSpec(memory_space=pltpu.MemorySpace.VMEM),   # flat input
                pl.BlockSpec(memory_space=pltpu.MemorySpace.VMEM),   # packed params (one DMA)
            ],
            out_specs=pl.BlockSpec(memory_space=pltpu.MemorySpace.VMEM),
        )(x_flat, packed_buf)
        return None, pred

    return packed, forward


if __name__ == "__main__":
    packed_params, forward = build_autoformer(seed=0)
    x_enc = jax.random.normal(jax.random.PRNGKey(0), (B, L, C_IN), jnp.float32)

    _, pred = forward(packed_params, x_enc)
    pred = jax.block_until_ready(pred)
    assert pred.shape == (B, PRED_DIM)
    assert bool(jnp.all(jnp.isfinite(pred)))
    print("KERNEL_OK")
</pallas_src>

<mosaic_0001>
module attributes {stable_mosaic.version = 11 : i64} {
  func.func @kernel(%arg0: memref<32x4xf32, #tpu.memory_space<vmem>>, %arg1: memref<1032x128xf32, #tpu.memory_space<vmem>>, %arg2: memref<2x1xf32, #tpu.memory_space<vmem>>) attributes {dimension_semantics = [], scalar_prefetch = 0 : i64, scratch_operands = 0 : i64, tpu.core_type = #tpu.core_type<tc>} {
    %c0 = arith.constant 0 : index
    %c0_0 = arith.constant 0 : index
    %0 = vector.load %arg1[%c0, %c0_0] : memref<1032x128xf32, #tpu.memory_space<vmem>>, vector<32x32xf32>
    %1 = arith.truncf %0 : vector<32x32xf32> to vector<32x32xbf16>
    %c32 = arith.constant 32 : index
    %c0_1 = arith.constant 0 : index
    %2 = vector.load %arg1[%c32, %c0_1] : memref<1032x128xf32, #tpu.memory_space<vmem>>, vector<32x32xf32>
    %3 = arith.truncf %2 : vector<32x32xf32> to vector<32x32xbf16>
    %c64 = arith.constant 64 : index
    %c0_2 = arith.constant 0 : index
    %4 = vector.load %arg1[%c64, %c0_2] : memref<1032x128xf32, #tpu.memory_space<vmem>>, vector<32x32xf32>
    %5 = arith.truncf %4 : vector<32x32xf32> to vector<32x32xbf16>
    %c96 = arith.constant 96 : index
    %c0_3 = arith.constant 0 : index
    %6 = vector.load %arg1[%c96, %c0_3] : memref<1032x128xf32, #tpu.memory_space<vmem>>, vector<32x32xf32>
    %7 = arith.truncf %6 : vector<32x32xf32> to vector<32x32xbf16>
    %c128 = arith.constant 128 : index
    %c0_4 = arith.constant 0 : index
    %8 = vector.load %arg1[%c128, %c0_4] : memref<1032x128xf32, #tpu.memory_space<vmem>>, vector<256x16xf32>
    %9 = arith.truncf %8 : vector<256x16xf32> to vector<256x16xbf16>
    %10 = tpu.iota {dimensions = array<i32: 1>} : vector<1x16xi32>
    %11 = arith.sitofp %10 : vector<1x16xi32> to vector<1x16xf32>
    %12 = tpu.iota {dimensions = array<i32: 0>} : vector<16x16xi32>
    %13 = arith.sitofp %12 : vector<16x16xi32> to vector<16x16xf32>
    %14 = vector.shape_cast %13 : vector<16x16xf32> to vector<1x16x16xf32>
    %15 = tpu.iota {dimensions = array<i32: 1>} : vector<16x16xi32>
    %16 = arith.sitofp %15 : vector<16x16xi32> to vector<16x16xf32>
    %17 = vector.shape_cast %16 : vector<16x16xf32> to vector<1x16x16xf32>
    %c0_5 = arith.constant 0 : index
    %c0_6 = arith.constant 0 : index
    %18 = vector.load %arg0[%c0_5, %c0_6] : memref<32x4xf32, #tpu.memory_space<vmem>>, vector<32x4xf32>
    %19 = arith.truncf %18 : vector<32x4xf32> to vector<32x4xbf16>
    %cst = arith.constant dense<0.000000e+00> : vector<32x4xf32>
    %20 = tpu.matmul %1, %19, %cst {dimension_numbers = #tpu.dot_dimension_numbers<[1], [0], [0], [1], [0, 0, 1, 1], [], []>} : vector<32x32xbf16>, vector<32x4xbf16>, vector<32x4xf32> -> vector<32x4xf32>
    %21 = arith.subf %18, %20 : vector<32x4xf32>
    %c384 = arith.constant 384 : index
    %c0_7 = arith.constant 0 : index
    %22 = vector.load %arg1[%c384, %c0_7] : memref<1032x128xf32, #tpu.memory_space<vmem>>, vector<12x32xf32>
    %23 = arith.truncf %18 : vector<32x4xf32> to vector<32x4xbf16>
    %cst_8 = arith.constant dense<0.000000e+00> : vector<32x4xf32>
    %24 = tpu.matmul %3, %23, %cst_8 {dimension_numbers = #tpu.dot_dimension_numbers<[1], [0], [0], [1], [0, 0, 1, 1], [], []>} : vector<32x32xbf16>, vector<32x4xbf16>, vector<32x4xf32> -> vector<32x4xf32>
    %25 = arith.truncf %18 : vector<32x4xf32> to vector<32x4xbf16>
    %cst_9 = arith.constant dense<0.000000e+00> : vector<32x4xf32>
    %26 = tpu.matmul %5, %25, %cst_9 {dimension_numbers = #tpu.dot_dimension_numbers<[1], [0], [0], [1], [0, 0, 1, 1], [], []>} : vector<32x32xbf16>, vector<32x4xbf16>, vector<32x4xf32> -> vector<32x4xf32>
    %27 = tpu.concatenate %24, %18, %26 in 1 : vector<32x4xf32>, vector<32x4xf32>, vector<32x4xf32> -> vector<32x12xf32>
    %28 = arith.truncf %27 : vector<32x12xf32> to vector<32x12xbf16>
    %29 = arith.truncf %22 : vector<12x32xf32> to vector<12x32xbf16>
    %cst_10 = arith.constant dense<0.000000e+00> : vector<32x32xf32>
    %30 = tpu.matmul %28, %29, %cst_10 {dimension_numbers = #tpu.dot_dimension_numbers<[1], [0], [0], [1], [0, 0, 1, 1], [], []>} : vector<32x12xbf16>, vector<12x32xbf16>, vector<32x32xf32> -> vector<32x32xf32>
    %c416 = arith.constant 416 : index
    %c0_11 = arith.constant 0 : index
    %31 = vector.load %arg1[%c416, %c0_11] : memref<1032x128xf32, #tpu.memory_space<vmem>>, vector<32x96xf32>
    %c448 = arith.constant 448 : index
    %c0_12 = arith.constant 0 : index
    %32 = vector.load %arg1[%c448, %c0_12] : memref<1032x128xf32, #tpu.memory_space<vmem>>, vector<1x96xf32>
    %c456 = arith.constant 456 : index
    %c0_13 = arith.constant 0 : index
    %33 = vector.load %arg1[%c456, %c0_13] : memref<1032x128xf32, #tpu.memory_space<vmem>>, vector<32x32xf32>
    %c488 = arith.constant 488 : index
    %c0_14 = arith.constant 0 : index
    %34 = vector.load %arg1[%c488, %c0_14] : memref<1032x128xf32, #tpu.memory_space<vmem>>, vector<1x32xf32>
    %35 = arith.truncf %30 : vector<32x32xf32> to vector<32x32xbf16>
    %36 = arith.truncf %31 : vector<32x96xf32> to vector<32x96xbf16>
    %cst_15 = arith.constant dense<0.000000e+00> : vector<32x96xf32>
    %37 = tpu.matmul %35, %36, %cst_15 {dimension_numbers = #tpu.dot_dimension_numbers<[1], [0], [0], [1], [0, 0, 1, 1], [], []>} : vector<32x32xbf16>, vector<32x96xbf16>, vector<32x96xf32> -> vector<32x96xf32>
    %38 = vector.broadcast %32 : vector<1x96xf32> to vector<32x96xf32>
    %39 = arith.addf %37, %38 : vector<32x96xf32>
    %40 = vector.extract_strided_slice %39 {offsets = [0, 0], sizes = [32, 32], strides = [1, 1]} : vector<32x96xf32> to vector<32x32xf32>
    %41 = vector.extract_strided_slice %39 {offsets = [0, 32], sizes = [32, 32], strides = [1, 1]} : vector<32x96xf32> to vector<32x32xf32>
    %42 = vector.extract_strided_slice %39 {offsets = [0, 64], sizes = [32, 32], strides = [1, 1]} : vector<32x96xf32> to vector<32x32xf32>
    %43 = vector.shape_cast %40 : vector<32x32xf32> to vector<2x16x32xf32>
    %44 = vector.shape_cast %41 : vector<32x32xf32> to vector<2x16x32xf32>
    %45 = vector.shape_cast %42 : vector<32x32xf32> to vector<2x16x32xf32>
    %46 = arith.truncf %43 : vector<2x16x32xf32> to vector<2x16x32xbf16>
    %47 = arith.truncf %44 : vector<2x16x32xf32> to vector<2x16x32xbf16>
    "tpu.trace_start"() <{level = 10 : i32, message = "btd,bsd->bts"}> : () -> ()
    %cst_16 = arith.constant dense<0.000000e+00> : vector<2x16x16xf32>
    %48 = tpu.matmul %46, %47, %cst_16 {dimension_numbers = #tpu.dot_dimension_numbers<[2], [2], [1], [1], [0, 0, 0, 1, 1, 1], [0], [0]>} : vector<2x16x32xbf16>, vector<2x16x32xbf16>, vector<2x16x16xf32> -> vector<2x16x16xf32>
    "tpu.trace_stop"() : () -> ()
    %49 = vector.extract_strided_slice %48 {offsets = [0, 0, 0], sizes = [2, 1, 16], strides = [1, 1, 1]} : vector<2x16x16xf32> to vector<2x1x16xf32>
    %50 = vector.shape_cast %49 : vector<2x1x16xf32> to vector<2x16xf32>
    %51 = vector.extract_strided_slice %48 {offsets = [0, 1, 0], sizes = [2, 1, 16], strides = [1, 1, 1]} : vector<2x16x16xf32> to vector<2x1x16xf32>
    %52 = vector.shape_cast %51 : vector<2x1x16xf32> to vector<2x16xf32>
    %53 = vector.extract_strided_slice %48 {offsets = [0, 2, 0], sizes = [2, 1, 16], strides = [1, 1, 1]} : vector<2x16x16xf32> to vector<2x1x16xf32>
    %54 = vector.shape_cast %53 : vector<2x1x16xf32> to vector<2x16xf32>
    %55 = vector.extract_strided_slice %48 {offsets = [0, 3, 0], sizes = [2, 1, 16], strides = [1, 1, 1]} : vector<2x16x16xf32> to vector<2x1x16xf32>
    %56 = vector.shape_cast %55 : vector<2x1x16xf32> to vector<2x16xf32>
    %57 = vector.extract_strided_slice %48 {offsets = [0, 4, 0], sizes = [2, 1, 16], strides = [1, 1, 1]} : vector<2x16x16xf32> to vector<2x1x16xf32>
    %58 = vector.shape_cast %57 : vector<2x1x16xf32> to vector<2x16xf32>
    %59 = vector.extract_strided_slice %48 {offsets = [0, 5, 0], sizes = [2, 1, 16], strides = [1, 1, 1]} : vector<2x16x16xf32> to vector<2x1x16xf32>
    %60 = vector.shape_cast %59 : vector<2x1x16xf32> to vector<2x16xf32>
    %61 = vector.extract_strided_slice %48 {offsets = [0, 6, 0], sizes = [2, 1, 16], strides = [1, 1, 1]} : vector<2x16x16xf32> to vector<2x1x16xf32>
    %62 = vector.shape_cast %61 : vector<2x1x16xf32> to vector<2x16xf32>
    %63 = vector.extract_strided_slice %48 {offsets = [0, 7, 0], sizes = [2, 1, 16], strides = [1, 1, 1]} : vector<2x16x16xf32> to vector<2x1x16xf32>
    %64 = vector.shape_cast %63 : vector<2x1x16xf32> to vector<2x16xf32>
    %65 = vector.extract_strided_slice %48 {offsets = [0, 8, 0], sizes = [2, 1, 16], strides = [1, 1, 1]} : vector<2x16x16xf32> to vector<2x1x16xf32>
    %66 = vector.shape_cast %65 : vector<2x1x16xf32> to vector<2x16xf32>
    %67 = vector.extract_strided_slice %48 {offsets = [0, 9, 0], sizes = [2, 1, 16], strides = [1, 1, 1]} : vector<2x16x16xf32> to vector<2x1x16xf32>
    %68 = vector.shape_cast %67 : vector<2x1x16xf32> to vector<2x16xf32>
    %69 = vector.extract_strided_slice %48 {offsets = [0, 10, 0], sizes = [2, 1, 16], strides = [1, 1, 1]} : vector<2x16x16xf32> to vector<2x1x16xf32>
    %70 = vector.shape_cast %69 : vector<2x1x16xf32> to vector<2x16xf32>
    %71 = vector.extract_strided_slice %48 {offsets = [0, 11, 0], sizes = [2, 1, 16], strides = [1, 1, 1]} : vector<2x16x16xf32> to vector<2x1x16xf32>
    %72 = vector.shape_cast %71 : vector<2x1x16xf32> to vector<2x16xf32>
    %73 = vector.extract_strided_slice %48 {offsets = [0, 12, 0], sizes = [2, 1, 16], strides = [1, 1, 1]} : vector<2x16x16xf32> to vector<2x1x16xf32>
    %74 = vector.shape_cast %73 : vector<2x1x16xf32> to vector<2x16xf32>
    %75 = vector.extract_strided_slice %48 {offsets = [0, 13, 0], sizes = [2, 1, 16], strides = [1, 1, 1]} : vector<2x16x16xf32> to vector<2x1x16xf32>
    %76 = vector.shape_cast %75 : vector<2x1x16xf32> to vector<2x16xf32>
    %77 = vector.extract_strided_slice %48 {offsets = [0, 14, 0], sizes = [2, 1, 16], strides = [1, 1, 1]} : vector<2x16x16xf32> to vector<2x1x16xf32>
    %78 = vector.shape_cast %77 : vector<2x1x16xf32> to vector<2x16xf32>
    %79 = vector.extract_strided_slice %48 {offsets = [0, 15, 0], sizes = [2, 1, 16], strides = [1, 1, 1]} : vector<2x16x16xf32> to vector<2x1x16xf32>
    %80 = vector.shape_cast %79 : vector<2x1x16xf32> to vector<2x16xf32>
    %81 = tpu.concatenate %50, %52, %54, %56, %58, %60, %62, %64, %66, %68, %70, %72, %74, %76, %78, %80 in 1 : vector<2x16xf32>, vector<2x16xf32>, vector<2x16xf32>, vector<2x16xf32>, vector<2x16xf32>, vector<2x16xf32>, vector<2x16xf32>, vector<2x16xf32>, vector<2x16xf32>, vector<2x16xf32>, vector<2x16xf32>, vector<2x16xf32>, vector<2x16xf32>, vector<2x16xf32>, vector<2x16xf32>, vector<2x16xf32> -> vector<2x256xf32>
    %82 = arith.truncf %81 : vector<2x256xf32> to vector<2x256xbf16>
    %cst_17 = arith.constant dense<0.000000e+00> : vector<2x16xf32>
    %83 = tpu.matmul %82, %9, %cst_17 {dimension_numbers = #tpu.dot_dimension_numbers<[1], [0], [0], [1], [0, 0, 1, 1], [], []>} : vector<2x256xbf16>, vector<256x16xbf16>, vector<2x16xf32> -> vector<2x16xf32>
    %cst_18 = arith.constant dense<0xFF800000> : vector<2xf32>
    %84 = vector.multi_reduction <maximumf>, %83, %cst_18 [1] : vector<2x16xf32> to vector<2xf32>
    %85 = vector.shape_cast %84 : vector<2xf32> to vector<2x1xf32>
    %86 = vector.broadcast %85 : vector<2x1xf32> to vector<2x16xf32>
    %87 = arith.cmpf oge, %83, %86 : vector<2x16xf32>
    %cst_19 = arith.constant 1.600000e+01 : f32
    %88 = vector.shape_cast %11 : vector<1x16xf32> to vector<1x16xf32>
    %89 = vector.broadcast %88 : vector<1x16xf32> to vector<2x16xf32>
    %90 = vector.broadcast %cst_19 : f32 to vector<2x16xf32>
    %91 = arith.select %87, %89, %90 : vector<2x16xi1>, vector<2x16xf32>
    %cst_20 = arith.constant dense<0x7F800000> : vector<2xf32>
    %92 = vector.multi_reduction <minimumf>, %91, %cst_20 [1] : vector<2x16xf32> to vector<2xf32>
    %93 = vector.shape_cast %92 : vector<2xf32> to vector<2x1xf32>
    %94 = vector.broadcast %11 : vector<1x16xf32> to vector<2x16xf32>
    %95 = vector.broadcast %93 : vector<2x1xf32> to vector<2x16xf32>
    %96 = arith.cmpf oeq, %94, %95 : vector<2x16xf32>
    %cst_21 = arith.constant -1.000000e+30 : f32
    %97 = vector.broadcast %cst_21 : f32 to vector<2x16xf32>
    %98 = arith.select %96, %97, %83 : vector<2x16xi1>, vector<2x16xf32>
    %cst_22 = arith.constant dense<0xFF800000> : vector<2xf32>
    %99 = vector.multi_reduction <maximumf>, %98, %cst_22 [1] : vector<2x16xf32> to vector<2xf32>
    %100 = vector.shape_cast %99 : vector<2xf32> to vector<2x1xf32>
    %101 = vector.broadcast %100 : vector<2x1xf32> to vector<2x16xf32>
    %102 = arith.cmpf oge, %98, %101 : vector<2x16xf32>
    %cst_23 = arith.constant 1.600000e+01 : f32
    %103 = vector.shape_cast %11 : vector<1x16xf32> to vector<1x16xf32>
    %104 = vector.broadcast %103 : vector<1x16xf32> to vector<2x16xf32>
    %105 = vector.broadcast %cst_23 : f32 to vector<2x16xf32>
    %106 = arith.select %102, %104, %105 : vector<2x16xi1>, vector<2x16xf32>
    %cst_24 = arith.constant dense<0x7F800000> : vector<2xf32>
    %107 = vector.multi_reduction <minimumf>, %106, %cst_24 [1] : vector<2x16xf32> to vector<2xf32>
    %108 = vector.shape_cast %107 : vector<2xf32> to vector<2x1xf32>
    %109 = arith.subf %85, %85 : vector<2x1xf32>
    %110 = math.exp %109 : vector<2x1xf32>
    %111 = arith.subf %100, %85 : vector<2x1xf32>
    %112 = math.exp %111 : vector<2x1xf32>
    %113 = arith.addf %110, %112 : vector<2x1xf32>
    %114 = tpu.reciprocal %113 {approx = true} : vector<2x1xf32> -> vector<2x1xf32>
    %cst_25 = arith.constant 0.000000e+00 : f32
    %115 = vector.broadcast %cst_25 : f32 to vector<2x16x16xf32>
    %116 = vector.shape_cast %93 : vector<2x1xf32> to vector<2x1x1xf32>
    %117 = vector.broadcast %14 : vector<1x16x16xf32> to vector<2x16x16xf32>
    %118 = vector.broadcast %116 : vector<2x1x1xf32> to vector<2x16x16xf32>
    %119 = arith.addf %117, %118 : vector<2x16x16xf32>
    %120 = vector.broadcast %17 : vector<1x16x16xf32> to vector<2x16x16xf32>
    %121 = arith.cmpf oeq, %119, %120 : vector<2x16x16xf32>
    %cst_26 = arith.constant 1.000000e+00 : f32
    %cst_27 = arith.constant 0.000000e+00 : f32
    %122 = vector.broadcast %cst_26 : f32 to vector<2x16x16xf32>
    %123 = vector.broadcast %cst_27 : f32 to vector<2x16x16xf32>
    %124 = arith.select %121, %122, %123 : vector<2x16x16xi1>, vector<2x16x16xf32>
    %cst_28 = arith.constant 1.600000e+01 : f32
    %125 = vector.broadcast %cst_28 : f32 to vector<1x16x16xf32>
    %126 = arith.addf %17, %125 : vector<1x16x16xf32>
    %127 = vector.broadcast %126 : vector<1x16x16xf32> to vector<2x16x16xf32>
    %128 = arith.cmpf oeq, %119, %127 : vector<2x16x16xf32>
    %cst_29 = arith.constant 1.000000e+00 : f32
    %cst_30 = arith.constant 0.000000e+00 : f32
    %129 = vector.broadcast %cst_29 : f32 to vector<2x16x16xf32>
    %130 = vector.broadcast %cst_30 : f32 to vector<2x16x16xf32>
    %131 = arith.select %128, %129, %130 : vector<2x16x16xi1>, vector<2x16x16xf32>
    %132 = arith.addf %124, %131 : vector<2x16x16xf32>
    %133 = arith.mulf %110, %114 : vector<2x1xf32>
    %134 = vector.shape_cast %133 : vector<2x1xf32> to vector<2x1x1xf32>
    %135 = vector.broadcast %134 : vector<2x1x1xf32> to vector<2x16x16xf32>
    %136 = arith.mulf %135, %132 : vector<2x16x16xf32>
    %137 = arith.addf %115, %136 : vector<2x16x16xf32>
    %138 = vector.shape_cast %108 : vector<2x1xf32> to vector<2x1x1xf32>
    %139 = vector.broadcast %14 : vector<1x16x16xf32> to vector<2x16x16xf32>
    %140 = vector.broadcast %138 : vector<2x1x1xf32> to vector<2x16x16xf32>
    %141 = arith.addf %139, %140 : vector<2x16x16xf32>
    %142 = vector.broadcast %17 : vector<1x16x16xf32> to vector<2x16x16xf32>
    %143 = arith.cmpf oeq, %141, %142 : vector<2x16x16xf32>
    %cst_31 = arith.constant 1.000000e+00 : f32
    %cst_32 = arith.constant 0.000000e+00 : f32
    %144 = vector.broadcast %cst_31 : f32 to vector<2x16x16xf32>
    %145 = vector.broadcast %cst_32 : f32 to vector<2x16x16xf32>
    %146 = arith.select %143, %144, %145 : vector<2x16x16xi1>, vector<2x16x16xf32>
    %cst_33 = arith.constant 1.600000e+01 : f32
    %147 = vector.broadcast %cst_33 : f32 to vector<1x16x16xf32>
    %148 = arith.addf %17, %147 : vector<1x16x16xf32>
    %149 = vector.broadcast %148 : vector<1x16x16xf32> to vector<2x16x16xf32>
    %150 = arith.cmpf oeq, %141, %149 : vector<2x16x16xf32>
    %cst_34 = arith.constant 1.000000e+00 : f32
    %cst_35 = arith.constant 0.000000e+00 : f32
    %151 = vector.broadcast %cst_34 : f32 to vector<2x16x16xf32>
    %152 = vector.broadcast %cst_35 : f32 to vector<2x16x16xf32>
    %153 = arith.select %150, %151, %152 : vector<2x16x16xi1>, vector<2x16x16xf32>
    %154 = arith.addf %146, %153 : vector<2x16x16xf32>
    %155 = arith.mulf %112, %114 : vector<2x1xf32>
    %156 = vector.shape_cast %155 : vector<2x1xf32> to vector<2x1x1xf32>
    %157 = vector.broadcast %156 : vector<2x1x1xf32> to vector<2x16x16xf32>
    %158 = arith.mulf %157, %154 : vector<2x16x16xf32>
    %159 = arith.addf %137, %158 : vector<2x16x16xf32>
    %160 = arith.truncf %159 : vector<2x16x16xf32> to vector<2x16x16xbf16>
    %161 = arith.truncf %45 : vector<2x16x32xf32> to vector<2x16x32xbf16>
    "tpu.trace_start"() <{level = 10 : i32, message = "blm,bmd->bld"}> : () -> ()
    %cst_36 = arith.constant dense<0.000000e+00> : vector<2x16x32xf32>
    %162 = tpu.matmul %160, %161, %cst_36 {dimension_numbers = #tpu.dot_dimension_numbers<[2], [1], [1], [2], [0, 0, 0, 1, 1, 2], [0], [0]>} : vector<2x16x16xbf16>, vector<2x16x32xbf16>, vector<2x16x32xf32> -> vector<2x16x32xf32>
    "tpu.trace_stop"() : () -> ()
    %163 = vector.shape_cast %162 : vector<2x16x32xf32> to vector<32x32xf32>
    %164 = arith.truncf %163 : vector<32x32xf32> to vector<32x32xbf16>
    %165 = arith.truncf %33 : vector<32x32xf32> to vector<32x32xbf16>
    %cst_37 = arith.constant dense<0.000000e+00> : vector<32x32xf32>
    %166 = tpu.matmul %164, %165, %cst_37 {dimension_numbers = #tpu.dot_dimension_numbers<[1], [0], [0], [1], [0, 0, 1, 1], [], []>} : vector<32x32xbf16>, vector<32x32xbf16>, vector<32x32xf32> -> vector<32x32xf32>
    %167 = vector.broadcast %34 : vector<1x32xf32> to vector<32x32xf32>
    %168 = arith.addf %166, %167 : vector<32x32xf32>
    %169 = arith.addf %30, %168 : vector<32x32xf32>
    %170 = arith.truncf %169 : vector<32x32xf32> to vector<32x32xbf16>
    %cst_38 = arith.constant dense<0.000000e+00> : vector<32x32xf32>
    %171 = tpu.matmul %1, %170, %cst_38 {dimension_numbers = #tpu.dot_dimension_numbers<[1], [0], [0], [1], [0, 0, 1, 1], [], []>} : vector<32x32xbf16>, vector<32x32xbf16>, vector<32x32xf32> -> vector<32x32xf32>
    %172 = arith.subf %169, %171 : vector<32x32xf32>
    %c496 = arith.constant 496 : index
    %c0_39 = arith.constant 0 : index
    %173 = vector.load %arg1[%c496, %c0_39] : memref<1032x128xf32, #tpu.memory_space<vmem>>, vector<32x32xf32>
    %174 = arith.truncf %172 : vector<32x32xf32> to vector<32x32xbf16>
    %175 = arith.truncf %173 : vector<32x32xf32> to vector<32x32xbf16>
    %cst_40 = arith.constant dense<0.000000e+00> : vector<32x32xf32>
    %176 = tpu.matmul %174, %175, %cst_40 {dimension_numbers = #tpu.dot_dimension_numbers<[1], [0], [0], [1], [0, 0, 1, 1], [], []>} : vector<32x32xbf16>, vector<32x32xbf16>, vector<32x32xf32> -> vector<32x32xf32>
    %cst_41 = arith.constant 0.000000e+00 : f32
    %177 = vector.broadcast %cst_41 : f32 to vector<32x32xf32>
    %178 = arith.maximumf %176, %177 : vector<32x32xf32>
    %c528 = arith.constant 528 : index
    %c0_42 = arith.constant 0 : index
    %179 = vector.load %arg1[%c528, %c0_42] : memref<1032x128xf32, #tpu.memory_space<vmem>>, vector<32x32xf32>
    %180 = arith.truncf %178 : vector<32x32xf32> to vector<32x32xbf16>
    %181 = arith.truncf %179 : vector<32x32xf32> to vector<32x32xbf16>
    %cst_43 = arith.constant dense<0.000000e+00> : vector<32x32xf32>
    %182 = tpu.matmul %180, %181, %cst_43 {dimension_numbers = #tpu.dot_dimension_numbers<[1], [0], [0], [1], [0, 0, 1, 1], [], []>} : vector<32x32xbf16>, vector<32x32xbf16>, vector<32x32xf32> -> vector<32x32xf32>
    %183 = arith.addf %172, %182 : vector<32x32xf32>
    %184 = arith.truncf %183 : vector<32x32xf32> to vector<32x32xbf16>
    %cst_44 = arith.constant dense<0.000000e+00> : vector<32x32xf32>
    %185 = tpu.matmul %1, %184, %cst_44 {dimension_numbers = #tpu.dot_dimension_numbers<[1], [0], [0], [1], [0, 0, 1, 1], [], []>} : vector<32x32xbf16>, vector<32x32xbf16>, vector<32x32xf32> -> vector<32x32xf32>
    %186 = arith.subf %183, %185 : vector<32x32xf32>
    %c560 = arith.constant 560 : index
    %c0_45 = arith.constant 0 : index
    %187 = vector.load %arg1[%c560, %c0_45] : memref<1032x128xf32, #tpu.memory_space<vmem>>, vector<1x32xf32>
    %c568 = arith.constant 568 : index
    %c0_46 = arith.constant 0 : index
    %188 = vector.load %arg1[%c568, %c0_46] : memref<1032x128xf32, #tpu.memory_space<vmem>>, vector<1x32xf32>
    %cst_47 = arith.constant dense<0.000000e+00> : vector<32xf32>
    %189 = vector.multi_reduction <add>, %186, %cst_47 [1] : vector<32x32xf32> to vector<32xf32>
    %190 = vector.shape_cast %189 : vector<32xf32> to vector<32x1xf32>
    %cst_48 = arith.constant 3.200000e+01 : f32
    %191 = vector.broadcast %cst_48 : f32 to vector<32x1xf32>
    %192 = arith.divf %190, %191 : vector<32x1xf32>
    %193 = vector.broadcast %192 : vector<32x1xf32> to vector<32x32xf32>
    %194 = arith.subf %186, %193 : vector<32x32xf32>
    %195 = arith.mulf %194, %194 : vector<32x32xf32>
    %cst_49 = arith.constant dense<0.000000e+00> : vector<32xf32>
    %196 = vector.multi_reduction <add>, %195, %cst_49 [1] : vector<32x32xf32> to vector<32xf32>
    %197 = vector.shape_cast %196 : vector<32xf32> to vector<32x1xf32>
    %cst_50 = arith.constant 3.200000e+01 : f32
    %198 = vector.broadcast %cst_50 : f32 to vector<32x1xf32>
    %199 = arith.divf %197, %198 : vector<32x1xf32>
    %200 = vector.broadcast %192 : vector<32x1xf32> to vector<32x32xf32>
    %201 = arith.subf %186, %200 : vector<32x32xf32>
    %cst_51 = arith.constant 9.99999974E-6 : f32
    %202 = vector.broadcast %cst_51 : f32 to vector<32x1xf32>
    %203 = arith.addf %199, %202 : vector<32x1xf32>
    %204 = math.rsqrt %203 : vector<32x1xf32>
    %205 = vector.broadcast %204 : vector<32x1xf32> to vector<32x32xf32>
    %206 = arith.mulf %201, %205 : vector<32x32xf32>
    %207 = vector.broadcast %187 : vector<1x32xf32> to vector<32x32xf32>
    %208 = arith.mulf %206, %207 : vector<32x32xf32>
    %209 = vector.broadcast %188 : vector<1x32xf32> to vector<32x32xf32>
    %210 = arith.addf %208, %209 : vector<32x32xf32>
    %211 = arith.truncf %210 : vector<32x32xf32> to vector<32x32xbf16>
    %cst_52 = arith.constant dense<0.000000e+00> : vector<32x32xf32>
    %212 = tpu.matmul %7, %211, %cst_52 {dimension_numbers = #tpu.dot_dimension_numbers<[1], [0], [0], [1], [0, 0, 1, 1], [], []>} : vector<32x32xbf16>, vector<32x32xbf16>, vector<32x32xf32> -> vector<32x32xf32>
    %c400 = arith.constant 400 : index
    %c0_53 = arith.constant 0 : index
    %213 = vector.load %arg1[%c400, %c0_53] : memref<1032x128xf32, #tpu.memory_space<vmem>>, vector<12x32xf32>
    %214 = arith.truncf %21 : vector<32x4xf32> to vector<32x4xbf16>
    %cst_54 = arith.constant dense<0.000000e+00> : vector<32x4xf32>
    %215 = tpu.matmul %3, %214, %cst_54 {dimension_numbers = #tpu.dot_dimension_numbers<[1], [0], [0], [1], [0, 0, 1, 1], [], []>} : vector<32x32xbf16>, vector<32x4xbf16>, vector<32x4xf32> -> vector<32x4xf32>
    %216 = arith.truncf %21 : vector<32x4xf32> to vector<32x4xbf16>
    %cst_55 = arith.constant dense<0.000000e+00> : vector<32x4xf32>
    %217 = tpu.matmul %5, %216, %cst_55 {dimension_numbers = #tpu.dot_dimension_numbers<[1], [0], [0], [1], [0, 0, 1, 1], [], []>} : vector<32x32xbf16>, vector<32x4xbf16>, vector<32x4xf32> -> vector<32x4xf32>
    %218 = tpu.concatenate %215, %21, %217 in 1 : vector<32x4xf32>, vector<32x4xf32>, vector<32x4xf32> -> vector<32x12xf32>
    %219 = arith.truncf %218 : vector<32x12xf32> to vector<32x12xbf16>
    %220 = arith.truncf %213 : vector<12x32xf32> to vector<12x32xbf16>
    %cst_56 = arith.constant dense<0.000000e+00> : vector<32x32xf32>
    %221 = tpu.matmul %219, %220, %cst_56 {dimension_numbers = #tpu.dot_dimension_numbers<[1], [0], [0], [1], [0, 0, 1, 1], [], []>} : vector<32x12xbf16>, vector<12x32xbf16>, vector<32x32xf32> -> vector<32x32xf32>
    %c576 = arith.constant 576 : index
    %c0_57 = arith.constant 0 : index
    %222 = vector.load %arg1[%c576, %c0_57] : memref<1032x128xf32, #tpu.memory_space<vmem>>, vector<32x96xf32>
    %c608 = arith.constant 608 : index
    %c0_58 = arith.constant 0 : index
    %223 = vector.load %arg1[%c608, %c0_58] : memref<1032x128xf32, #tpu.memory_space<vmem>>, vector<1x96xf32>
    %c616 = arith.constant 616 : index
    %c0_59 = arith.constant 0 : index
    %224 = vector.load %arg1[%c616, %c0_59] : memref<1032x128xf32, #tpu.memory_space<vmem>>, vector<32x32xf32>
    %c648 = arith.constant 648 : index
    %c0_60 = arith.constant 0 : index
    %225 = vector.load %arg1[%c648, %c0_60] : memref<1032x128xf32, #tpu.memory_space<vmem>>, vector<1x32xf32>
    %226 = arith.truncf %221 : vector<32x32xf32> to vector<32x32xbf16>
    %227 = arith.truncf %222 : vector<32x96xf32> to vector<32x96xbf16>
    %cst_61 = arith.constant dense<0.000000e+00> : vector<32x96xf32>
    %228 = tpu.matmul %226, %227, %cst_61 {dimension_numbers = #tpu.dot_dimension_numbers<[1], [0], [0], [1], [0, 0, 1, 1], [], []>} : vector<32x32xbf16>, vector<32x96xbf16>, vector<32x96xf32> -> vector<32x96xf32>
    %229 = vector.broadcast %223 : vector<1x96xf32> to vector<32x96xf32>
    %230 = arith.addf %228, %229 : vector<32x96xf32>
    %231 = vector.extract_strided_slice %230 {offsets = [0, 0], sizes = [32, 32], strides = [1, 1]} : vector<32x96xf32> to vector<32x32xf32>
    %232 = vector.extract_strided_slice %230 {offsets = [0, 32], sizes = [32, 32], strides = [1, 1]} : vector<32x96xf32> to vector<32x32xf32>
    %233 = vector.extract_strided_slice %230 {offsets = [0, 64], sizes = [32, 32], strides = [1, 1]} : vector<32x96xf32> to vector<32x32xf32>
    %234 = vector.shape_cast %231 : vector<32x32xf32> to vector<2x16x32xf32>
    %235 = vector.shape_cast %232 : vector<32x32xf32> to vector<2x16x32xf32>
    %236 = vector.shape_cast %233 : vector<32x32xf32> to vector<2x16x32xf32>
    %237 = arith.truncf %234 : vector<2x16x32xf32> to vector<2x16x32xbf16>
    %238 = arith.truncf %235 : vector<2x16x32xf32> to vector<2x16x32xbf16>
    "tpu.trace_start"() <{level = 10 : i32, message = "btd,bsd->bts"}> : () -> ()
    %cst_62 = arith.constant dense<0.000000e+00> : vector<2x16x16xf32>
    %239 = tpu.matmul %237, %238, %cst_62 {dimension_numbers = #tpu.dot_dimension_numbers<[2], [2], [1], [1], [0, 0, 0, 1, 1, 1], [0], [0]>} : vector<2x16x32xbf16>, vector<2x16x32xbf16>, vector<2x16x16xf32> -> vector<2x16x16xf32>
    "tpu.trace_stop"() : () -> ()
    %240 = vector.extract_strided_slice %239 {offsets = [0, 0, 0], sizes = [2, 1, 16], strides = [1, 1, 1]} : vector<2x16x16xf32> to vector<2x1x16xf32>
    %241 = vector.shape_cast %240 : vector<2x1x16xf32> to vector<2x16xf32>
    %242 = vector.extract_strided_slice %239 {offsets = [0, 1, 0], sizes = [2, 1, 16], strides = [1, 1, 1]} : vector<2x16x16xf32> to vector<2x1x16xf32>
    %243 = vector.shape_cast %242 : vector<2x1x16xf32> to vector<2x16xf32>
    %244 = vector.extract_strided_slice %239 {offsets = [0, 2, 0], sizes = [2, 1, 16], strides = [1, 1, 1]} : vector<2x16x16xf32> to vector<2x1x16xf32>
    %245 = vector.shape_cast %244 : vector<2x1x16xf32> to vector<2x16xf32>
    %246 = vector.extract_strided_slice %239 {offsets = [0, 3, 0], sizes = [2, 1, 16], strides = [1, 1, 1]} : vector<2x16x16xf32> to vector<2x1x16xf32>
    %247 = vector.shape_cast %246 : vector<2x1x16xf32> to vector<2x16xf32>
    %248 = vector.extract_strided_slice %239 {offsets = [0, 4, 0], sizes = [2, 1, 16], strides = [1, 1, 1]} : vector<2x16x16xf32> to vector<2x1x16xf32>
    %249 = vector.shape_cast %248 : vector<2x1x16xf32> to vector<2x16xf32>
    %250 = vector.extract_strided_slice %239 {offsets = [0, 5, 0], sizes = [2, 1, 16], strides = [1, 1, 1]} : vector<2x16x16xf32> to vector<2x1x16xf32>
    %251 = vector.shape_cast %250 : vector<2x1x16xf32> to vector<2x16xf32>
    %252 = vector.extract_strided_slice %239 {offsets = [0, 6, 0], sizes = [2, 1, 16], strides = [1, 1, 1]} : vector<2x16x16xf32> to vector<2x1x16xf32>
    %253 = vector.shape_cast %252 : vector<2x1x16xf32> to vector<2x16xf32>
    %254 = vector.extract_strided_slice %239 {offsets = [0, 7, 0], sizes = [2, 1, 16], strides = [1, 1, 1]} : vector<2x16x16xf32> to vector<2x1x16xf32>
    %255 = vector.shape_cast %254 : vector<2x1x16xf32> to vector<2x16xf32>
    %256 = vector.extract_strided_slice %239 {offsets = [0, 8, 0], sizes = [2, 1, 16], strides = [1, 1, 1]} : vector<2x16x16xf32> to vector<2x1x16xf32>
    %257 = vector.shape_cast %256 : vector<2x1x16xf32> to vector<2x16xf32>
    %258 = vector.extract_strided_slice %239 {offsets = [0, 9, 0], sizes = [2, 1, 16], strides = [1, 1, 1]} : vector<2x16x16xf32> to vector<2x1x16xf32>
    %259 = vector.shape_cast %258 : vector<2x1x16xf32> to vector<2x16xf32>
    %260 = vector.extract_strided_slice %239 {offsets = [0, 10, 0], sizes = [2, 1, 16], strides = [1, 1, 1]} : vector<2x16x16xf32> to vector<2x1x16xf32>
    %261 = vector.shape_cast %260 : vector<2x1x16xf32> to vector<2x16xf32>
    %262 = vector.extract_strided_slice %239 {offsets = [0, 11, 0], sizes = [2, 1, 16], strides = [1, 1, 1]} : vector<2x16x16xf32> to vector<2x1x16xf32>
    %263 = vector.shape_cast %262 : vector<2x1x16xf32> to vector<2x16xf32>
    %264 = vector.extract_strided_slice %239 {offsets = [0, 12, 0], sizes = [2, 1, 16], strides = [1, 1, 1]} : vector<2x16x16xf32> to vector<2x1x16xf32>
    %265 = vector.shape_cast %264 : vector<2x1x16xf32> to vector<2x16xf32>
    %266 = vector.extract_strided_slice %239 {offsets = [0, 13, 0], sizes = [2, 1, 16], strides = [1, 1, 1]} : vector<2x16x16xf32> to vector<2x1x16xf32>
    %267 = vector.shape_cast %266 : vector<2x1x16xf32> to vector<2x16xf32>
    %268 = vector.extract_strided_slice %239 {offsets = [0, 14, 0], sizes = [2, 1, 16], strides = [1, 1, 1]} : vector<2x16x16xf32> to vector<2x1x16xf32>
    %269 = vector.shape_cast %268 : vector<2x1x16xf32> to vector<2x16xf32>
    %270 = vector.extract_strided_slice %239 {offsets = [0, 15, 0], sizes = [2, 1, 16], strides = [1, 1, 1]} : vector<2x16x16xf32> to vector<2x1x16xf32>
    %271 = vector.shape_cast %270 : vector<2x1x16xf32> to vector<2x16xf32>
    %272 = tpu.concatenate %241, %243, %245, %247, %249, %251, %253, %255, %257, %259, %261, %263, %265, %267, %269, %271 in 1 : vector<2x16xf32>, vector<2x16xf32>, vector<2x16xf32>, vector<2x16xf32>, vector<2x16xf32>, vector<2x16xf32>, vector<2x16xf32>, vector<2x16xf32>, vector<2x16xf32>, vector<2x16xf32>, vector<2x16xf32>, vector<2x16xf32>, vector<2x16xf32>, vector<2x16xf32>, vector<2x16xf32>, vector<2x16xf32> -> vector<2x256xf32>
    %273 = arith.truncf %272 : vector<2x256xf32> to vector<2x256xbf16>
    %cst_63 = arith.constant dense<0.000000e+00> : vector<2x16xf32>
    %274 = tpu.matmul %273, %9, %cst_63 {dimension_numbers = #tpu.dot_dimension_numbers<[1], [0], [0], [1], [0, 0, 1, 1], [], []>} : vector<2x256xbf16>, vector<256x16xbf16>, vector<2x16xf32> -> vector<2x16xf32>
    %cst_64 = arith.constant dense<0xFF800000> : vector<2xf32>
    %275 = vector.multi_reduction <maximumf>, %274, %cst_64 [1] : vector<2x16xf32> to vector<2xf32>
    %276 = vector.shape_cast %275 : vector<2xf32> to vector<2x1xf32>
    %277 = vector.broadcast %276 : vector<2x1xf32> to vector<2x16xf32>
    %278 = arith.cmpf oge, %274, %277 : vector<2x16xf32>
    %cst_65 = arith.constant 1.600000e+01 : f32
    %279 = vector.shape_cast %11 : vector<1x16xf32> to vector<1x16xf32>
    %280 = vector.broadcast %279 : vector<1x16xf32> to vector<2x16xf32>
    %281 = vector.broadcast %cst_65 : f32 to vector<2x16xf32>
    %282 = arith.select %278, %280, %281 : vector<2x16xi1>, vector<2x16xf32>
    %cst_66 = arith.constant dense<0x7F800000> : vector<2xf32>
    %283 = vector.multi_reduction <minimumf>, %282, %cst_66 [1] : vector<2x16xf32> to vector<2xf32>
    %284 = vector.shape_cast %283 : vector<2xf32> to vector<2x1xf32>
    %285 = vector.broadcast %11 : vector<1x16xf32> to vector<2x16xf32>
    %286 = vector.broadcast %284 : vector<2x1xf32> to vector<2x16xf32>
    %287 = arith.cmpf oeq, %285, %286 : vector<2x16xf32>
    %cst_67 = arith.constant -1.000000e+30 : f32
    %288 = vector.broadcast %cst_67 : f32 to vector<2x16xf32>
    %289 = arith.select %287, %288, %274 : vector<2x16xi1>, vector<2x16xf32>
    %cst_68 = arith.constant dense<0xFF800000> : vector<2xf32>
    %290 = vector.multi_reduction <maximumf>, %289, %cst_68 [1] : vector<2x16xf32> to vector<2xf32>
    %291 = vector.shape_cast %290 : vector<2xf32> to vector<2x1xf32>
    %292 = vector.broadcast %291 : vector<2x1xf32> to vector<2x16xf32>
    %293 = arith.cmpf oge, %289, %292 : vector<2x16xf32>
    %cst_69 = arith.constant 1.600000e+01 : f32
    %294 = vector.shape_cast %11 : vector<1x16xf32> to vector<1x16xf32>
    %295 = vector.broadcast %294 : vector<1x16xf32> to vector<2x16xf32>
    %296 = vector.broadcast %cst_69 : f32 to vector<2x16xf32>
    %297 = arith.select %293, %295, %296 : vector<2x16xi1>, vector<2x16xf32>
    %cst_70 = arith.constant dense<0x7F800000> : vector<2xf32>
    %298 = vector.multi_reduction <minimumf>, %297, %cst_70 [1] : vector<2x16xf32> to vector<2xf32>
    %299 = vector.shape_cast %298 : vector<2xf32> to vector<2x1xf32>
    %300 = arith.subf %276, %276 : vector<2x1xf32>
    %301 = math.exp %300 : vector<2x1xf32>
    %302 = arith.subf %291, %276 : vector<2x1xf32>
    %303 = math.exp %302 : vector<2x1xf32>
    %304 = arith.addf %301, %303 : vector<2x1xf32>
    %305 = tpu.reciprocal %304 {approx = true} : vector<2x1xf32> -> vector<2x1xf32>
    %cst_71 = arith.constant 0.000000e+00 : f32
    %306 = vector.broadcast %cst_71 : f32 to vector<2x16x16xf32>
    %307 = vector.shape_cast %284 : vector<2x1xf32> to vector<2x1x1xf32>
    %308 = vector.broadcast %14 : vector<1x16x16xf32> to vector<2x16x16xf32>
    %309 = vector.broadcast %307 : vector<2x1x1xf32> to vector<2x16x16xf32>
    %310 = arith.addf %308, %309 : vector<2x16x16xf32>
    %311 = vector.broadcast %17 : vector<1x16x16xf32> to vector<2x16x16xf32>
    %312 = arith.cmpf oeq, %310, %311 : vector<2x16x16xf32>
    %cst_72 = arith.constant 1.000000e+00 : f32
    %cst_73 = arith.constant 0.000000e+00 : f32
    %313 = vector.broadcast %cst_72 : f32 to vector<2x16x16xf32>
    %314 = vector.broadcast %cst_73 : f32 to vector<2x16x16xf32>
    %315 = arith.select %312, %313, %314 : vector<2x16x16xi1>, vector<2x16x16xf32>
    %cst_74 = arith.constant 1.600000e+01 : f32
    %316 = vector.broadcast %cst_74 : f32 to vector<1x16x16xf32>
    %317 = arith.addf %17, %316 : vector<1x16x16xf32>
    %318 = vector.broadcast %317 : vector<1x16x16xf32> to vector<2x16x16xf32>
    %319 = arith.cmpf oeq, %310, %318 : vector<2x16x16xf32>
    %cst_75 = arith.constant 1.000000e+00 : f32
    %cst_76 = arith.constant 0.000000e+00 : f32
    %320 = vector.broadcast %cst_75 : f32 to vector<2x16x16xf32>
    %321 = vector.broadcast %cst_76 : f32 to vector<2x16x16xf32>
    %322 = arith.select %319, %320, %321 : vector<2x16x16xi1>, vector<2x16x16xf32>
    %323 = arith.addf %315, %322 : vector<2x16x16xf32>
    %324 = arith.mulf %301, %305 : vector<2x1xf32>
    %325 = vector.shape_cast %324 : vector<2x1xf32> to vector<2x1x1xf32>
    %326 = vector.broadcast %325 : vector<2x1x1xf32> to vector<2x16x16xf32>
    %327 = arith.mulf %326, %323 : vector<2x16x16xf32>
    %328 = arith.addf %306, %327 : vector<2x16x16xf32>
    %329 = vector.shape_cast %299 : vector<2x1xf32> to vector<2x1x1xf32>
    %330 = vector.broadcast %14 : vector<1x16x16xf32> to vector<2x16x16xf32>
    %331 = vector.broadcast %329 : vector<2x1x1xf32> to vector<2x16x16xf32>
    %332 = arith.addf %330, %331 : vector<2x16x16xf32>
    %333 = vector.broadcast %17 : vector<1x16x16xf32> to vector<2x16x16xf32>
    %334 = arith.cmpf oeq, %332, %333 : vector<2x16x16xf32>
    %cst_77 = arith.constant 1.000000e+00 : f32
    %cst_78 = arith.constant 0.000000e+00 : f32
    %335 = vector.broadcast %cst_77 : f32 to vector<2x16x16xf32>
    %336 = vector.broadcast %cst_78 : f32 to vector<2x16x16xf32>
    %337 = arith.select %334, %335, %336 : vector<2x16x16xi1>, vector<2x16x16xf32>
    %cst_79 = arith.constant 1.600000e+01 : f32
    %338 = vector.broadcast %cst_79 : f32 to vector<1x16x16xf32>
    %339 = arith.addf %17, %338 : vector<1x16x16xf32>
    %340 = vector.broadcast %339 : vector<1x16x16xf32> to vector<2x16x16xf32>
    %341 = arith.cmpf oeq, %332, %340 : vector<2x16x16xf32>
    %cst_80 = arith.constant 1.000000e+00 : f32
    %cst_81 = arith.constant 0.000000e+00 : f32
    %342 = vector.broadcast %cst_80 : f32 to vector<2x16x16xf32>
    %343 = vector.broadcast %cst_81 : f32 to vector<2x16x16xf32>
    %344 = arith.select %341, %342, %343 : vector<2x16x16xi1>, vector<2x16x16xf32>
    %345 = arith.addf %337, %344 : vector<2x16x16xf32>
    %346 = arith.mulf %303, %305 : vector<2x1xf32>
    %347 = vector.shape_cast %346 : vector<2x1xf32> to vector<2x1x1xf32>
    %348 = vector.broadcast %347 : vector<2x1x1xf32> to vector<2x16x16xf32>
    %349 = arith.mulf %348, %345 : vector<2x16x16xf32>
    %350 = arith.addf %328, %349 : vector<2x16x16xf32>
    %351 = arith.truncf %350 : vector<2x16x16xf32> to vector<2x16x16xbf16>
    %352 = arith.truncf %236 : vector<2x16x32xf32> to vector<2x16x32xbf16>
    "tpu.trace_start"() <{level = 10 : i32, message = "blm,bmd->bld"}> : () -> ()
    %cst_82 = arith.constant dense<0.000000e+00> : vector<2x16x32xf32>
    %353 = tpu.matmul %351, %352, %cst_82 {dimension_numbers = #tpu.dot_dimension_numbers<[2], [1], [1], [2], [0, 0, 0, 1, 1, 2], [0], [0]>} : vector<2x16x16xbf16>, vector<2x16x32xbf16>, vector<2x16x32xf32> -> vector<2x16x32xf32>
    "tpu.trace_stop"() : () -> ()
    %354 = vector.shape_cast %353 : vector<2x16x32xf32> to vector<32x32xf32>
    %355 = arith.truncf %354 : vector<32x32xf32> to vector<32x32xbf16>
    %356 = arith.truncf %224 : vector<32x32xf32> to vector<32x32xbf16>
    %cst_83 = arith.constant dense<0.000000e+00> : vector<32x32xf32>
    %357 = tpu.matmul %355, %356, %cst_83 {dimension_numbers = #tpu.dot_dimension_numbers<[1], [0], [0], [1], [0, 0, 1, 1], [], []>} : vector<32x32xbf16>, vector<32x32xbf16>, vector<32x32xf32> -> vector<32x32xf32>
    %358 = vector.broadcast %225 : vector<1x32xf32> to vector<32x32xf32>
    %359 = arith.addf %357, %358 : vector<32x32xf32>
    %360 = arith.addf %221, %359 : vector<32x32xf32>
    %361 = arith.truncf %360 : vector<32x32xf32> to vector<32x32xbf16>
    %cst_84 = arith.constant dense<0.000000e+00> : vector<32x32xf32>
    %362 = tpu.matmul %1, %361, %cst_84 {dimension_numbers = #tpu.dot_dimension_numbers<[1], [0], [0], [1], [0, 0, 1, 1], [], []>} : vector<32x32xbf16>, vector<32x32xbf16>, vector<32x32xf32> -> vector<32x32xf32>
    %363 = arith.subf %360, %362 : vector<32x32xf32>
    %c656 = arith.constant 656 : index
    %c0_85 = arith.constant 0 : index
    %364 = vector.load %arg1[%c656, %c0_85] : memref<1032x128xf32, #tpu.memory_space<vmem>>, vector<32x32xf32>
    %c688 = arith.constant 688 : index
    %c0_86 = arith.constant 0 : index
    %365 = vector.load %arg1[%c688, %c0_86] : memref<1032x128xf32, #tpu.memory_space<vmem>>, vector<1x32xf32>
    %c696 = arith.constant 696 : index
    %c0_87 = arith.constant 0 : index
    %366 = vector.load %arg1[%c696, %c0_87] : memref<1032x128xf32, #tpu.memory_space<vmem>>, vector<32x64xf32>
    %c728 = arith.constant 728 : index
    %c0_88 = arith.constant 0 : index
    %367 = vector.load %arg1[%c728, %c0_88] : memref<1032x128xf32, #tpu.memory_space<vmem>>, vector<1x64xf32>
    %c736 = arith.constant 736 : index
    %c0_89 = arith.constant 0 : index
    %368 = vector.load %arg1[%c736, %c0_89] : memref<1032x128xf32, #tpu.memory_space<vmem>>, vector<32x32xf32>
    %c768 = arith.constant 768 : index
    %c0_90 = arith.constant 0 : index
    %369 = vector.load %arg1[%c768, %c0_90] : memref<1032x128xf32, #tpu.memory_space<vmem>>, vector<1x32xf32>
    %370 = arith.truncf %363 : vector<32x32xf32> to vector<32x32xbf16>
    %371 = arith.truncf %364 : vector<32x32xf32> to vector<32x32xbf16>
    %cst_91 = arith.constant dense<0.000000e+00> : vector<32x32xf32>
    %372 = tpu.matmul %370, %371, %cst_91 {dimension_numbers = #tpu.dot_dimension_numbers<[1], [0], [0], [1], [0, 0, 1, 1], [], []>} : vector<32x32xbf16>, vector<32x32xbf16>, vector<32x32xf32> -> vector<32x32xf32>
    %373 = vector.broadcast %365 : vector<1x32xf32> to vector<32x32xf32>
    %374 = arith.addf %372, %373 : vector<32x32xf32>
    %375 = arith.truncf %212 : vector<32x32xf32> to vector<32x32xbf16>
    %376 = arith.truncf %366 : vector<32x64xf32> to vector<32x64xbf16>
    %cst_92 = arith.constant dense<0.000000e+00> : vector<32x64xf32>
    %377 = tpu.matmul %375, %376, %cst_92 {dimension_numbers = #tpu.dot_dimension_numbers<[1], [0], [0], [1], [0, 0, 1, 1], [], []>} : vector<32x32xbf16>, vector<32x64xbf16>, vector<32x64xf32> -> vector<32x64xf32>
    %378 = vector.broadcast %367 : vector<1x64xf32> to vector<32x64xf32>
    %379 = arith.addf %377, %378 : vector<32x64xf32>
    %380 = vector.extract_strided_slice %379 {offsets = [0, 0], sizes = [32, 32], strides = [1, 1]} : vector<32x64xf32> to vector<32x32xf32>
    %381 = vector.extract_strided_slice %379 {offsets = [0, 32], sizes = [32, 32], strides = [1, 1]} : vector<32x64xf32> to vector<32x32xf32>
    %382 = vector.shape_cast %374 : vector<32x32xf32> to vector<2x16x32xf32>
    %383 = vector.shape_cast %380 : vector<32x32xf32> to vector<2x16x32xf32>
    %384 = vector.shape_cast %381 : vector<32x32xf32> to vector<2x16x32xf32>
    %385 = arith.truncf %382 : vector<2x16x32xf32> to vector<2x16x32xbf16>
    %386 = arith.truncf %383 : vector<2x16x32xf32> to vector<2x16x32xbf16>
    "tpu.trace_start"() <{level = 10 : i32, message = "btd,bsd->bts"}> : () -> ()
    %cst_93 = arith.constant dense<0.000000e+00> : vector<2x16x16xf32>
    %387 = tpu.matmul %385, %386, %cst_93 {dimension_numbers = #tpu.dot_dimension_numbers<[2], [2], [1], [1], [0, 0, 0, 1, 1, 1], [0], [0]>} : vector<2x16x32xbf16>, vector<2x16x32xbf16>, vector<2x16x16xf32> -> vector<2x16x16xf32>
    "tpu.trace_stop"() : () -> ()
    %388 = vector.extract_strided_slice %387 {offsets = [0, 0, 0], sizes = [2, 1, 16], strides = [1, 1, 1]} : vector<2x16x16xf32> to vector<2x1x16xf32>
    %389 = vector.shape_cast %388 : vector<2x1x16xf32> to vector<2x16xf32>
    %390 = vector.extract_strided_slice %387 {offsets = [0, 1, 0], sizes = [2, 1, 16], strides = [1, 1, 1]} : vector<2x16x16xf32> to vector<2x1x16xf32>
    %391 = vector.shape_cast %390 : vector<2x1x16xf32> to vector<2x16xf32>
    %392 = vector.extract_strided_slice %387 {offsets = [0, 2, 0], sizes = [2, 1, 16], strides = [1, 1, 1]} : vector<2x16x16xf32> to vector<2x1x16xf32>
    %393 = vector.shape_cast %392 : vector<2x1x16xf32> to vector<2x16xf32>
    %394 = vector.extract_strided_slice %387 {offsets = [0, 3, 0], sizes = [2, 1, 16], strides = [1, 1, 1]} : vector<2x16x16xf32> to vector<2x1x16xf32>
    %395 = vector.shape_cast %394 : vector<2x1x16xf32> to vector<2x16xf32>
    %396 = vector.extract_strided_slice %387 {offsets = [0, 4, 0], sizes = [2, 1, 16], strides = [1, 1, 1]} : vector<2x16x16xf32> to vector<2x1x16xf32>
    %397 = vector.shape_cast %396 : vector<2x1x16xf32> to vector<2x16xf32>
    %398 = vector.extract_strided_slice %387 {offsets = [0, 5, 0], sizes = [2, 1, 16], strides = [1, 1, 1]} : vector<2x16x16xf32> to vector<2x1x16xf32>
    %399 = vector.shape_cast %398 : vector<2x1x16xf32> to vector<2x16xf32>
    %400 = vector.extract_strided_slice %387 {offsets = [0, 6, 0], sizes = [2, 1, 16], strides = [1, 1, 1]} : vector<2x16x16xf32> to vector<2x1x16xf32>
    %401 = vector.shape_cast %400 : vector<2x1x16xf32> to vector<2x16xf32>
    %402 = vector.extract_strided_slice %387 {offsets = [0, 7, 0], sizes = [2, 1, 16], strides = [1, 1, 1]} : vector<2x16x16xf32> to vector<2x1x16xf32>
    %403 = vector.shape_cast %402 : vector<2x1x16xf32> to vector<2x16xf32>
    %404 = vector.extract_strided_slice %387 {offsets = [0, 8, 0], sizes = [2, 1, 16], strides = [1, 1, 1]} : vector<2x16x16xf32> to vector<2x1x16xf32>
    %405 = vector.shape_cast %404 : vector<2x1x16xf32> to vector<2x16xf32>
    %406 = vector.extract_strided_slice %387 {offsets = [0, 9, 0], sizes = [2, 1, 16], strides = [1, 1, 1]} : vector<2x16x16xf32> to vector<2x1x16xf32>
    %407 = vector.shape_cast %406 : vector<2x1x16xf32> to vector<2x16xf32>
    %408 = vector.extract_strided_slice %387 {offsets = [0, 10, 0], sizes = [2, 1, 16], strides = [1, 1, 1]} : vector<2x16x16xf32> to vector<2x1x16xf32>
    %409 = vector.shape_cast %408 : vector<2x1x16xf32> to vector<2x16xf32>
    %410 = vector.extract_strided_slice %387 {offsets = [0, 11, 0], sizes = [2, 1, 16], strides = [1, 1, 1]} : vector<2x16x16xf32> to vector<2x1x16xf32>
    %411 = vector.shape_cast %410 : vector<2x1x16xf32> to vector<2x16xf32>
    %412 = vector.extract_strided_slice %387 {offsets = [0, 12, 0], sizes = [2, 1, 16], strides = [1, 1, 1]} : vector<2x16x16xf32> to vector<2x1x16xf32>
    %413 = vector.shape_cast %412 : vector<2x1x16xf32> to vector<2x16xf32>
    %414 = vector.extract_strided_slice %387 {offsets = [0, 13, 0], sizes = [2, 1, 16], strides = [1, 1, 1]} : vector<2x16x16xf32> to vector<2x1x16xf32>
    %415 = vector.shape_cast %414 : vector<2x1x16xf32> to vector<2x16xf32>
    %416 = vector.extract_strided_slice %387 {offsets = [0, 14, 0], sizes = [2, 1, 16], strides = [1, 1, 1]} : vector<2x16x16xf32> to vector<2x1x16xf32>
    %417 = vector.shape_cast %416 : vector<2x1x16xf32> to vector<2x16xf32>
    %418 = vector.extract_strided_slice %387 {offsets = [0, 15, 0], sizes = [2, 1, 16], strides = [1, 1, 1]} : vector<2x16x16xf32> to vector<2x1x16xf32>
    %419 = vector.shape_cast %418 : vector<2x1x16xf32> to vector<2x16xf32>
    %420 = tpu.concatenate %389, %391, %393, %395, %397, %399, %401, %403, %405, %407, %409, %411, %413, %415, %417, %419 in 1 : vector<2x16xf32>, vector<2x16xf32>, vector<2x16xf32>, vector<2x16xf32>, vector<2x16xf32>, vector<2x16xf32>, vector<2x16xf32>, vector<2x16xf32>, vector<2x16xf32>, vector<2x16xf32>, vector<2x16xf32>, vector<2x16xf32>, vector<2x16xf32>, vector<2x16xf32>, vector<2x16xf32>, vector<2x16xf32> -> vector<2x256xf32>
    %421 = arith.truncf %420 : vector<2x256xf32> to vector<2x256xbf16>
    %cst_94 = arith.constant dense<0.000000e+00> : vector<2x16xf32>
    %422 = tpu.matmul %421, %9, %cst_94 {dimension_numbers = #tpu.dot_dimension_numbers<[1], [0], [0], [1], [0, 0, 1, 1], [], []>} : vector<2x256xbf16>, vector<256x16xbf16>, vector<2x16xf32> -> vector<2x16xf32>
    %cst_95 = arith.constant dense<0xFF800000> : vector<2xf32>
    %423 = vector.multi_reduction <maximumf>, %422, %cst_95 [1] : vector<2x16xf32> to vector<2xf32>
    %424 = vector.shape_cast %423 : vector<2xf32> to vector<2x1xf32>
    %425 = vector.broadcast %424 : vector<2x1xf32> to vector<2x16xf32>
    %426 = arith.cmpf oge, %422, %425 : vector<2x16xf32>
    %cst_96 = arith.constant 1.600000e+01 : f32
    %427 = vector.shape_cast %11 : vector<1x16xf32> to vector<1x16xf32>
    %428 = vector.broadcast %427 : vector<1x16xf32> to vector<2x16xf32>
    %429 = vector.broadcast %cst_96 : f32 to vector<2x16xf32>
    %430 = arith.select %426, %428, %429 : vector<2x16xi1>, vector<2x16xf32>
    %cst_97 = arith.constant dense<0x7F800000> : vector<2xf32>
    %431 = vector.multi_reduction <minimumf>, %430, %cst_97 [1] : vector<2x16xf32> to vector<2xf32>
    %432 = vector.shape_cast %431 : vector<2xf32> to vector<2x1xf32>
    %433 = vector.broadcast %11 : vector<1x16xf32> to vector<2x16xf32>
    %434 = vector.broadcast %432 : vector<2x1xf32> to vector<2x16xf32>
    %435 = arith.cmpf oeq, %433, %434 : vector<2x16xf32>
    %cst_98 = arith.constant -1.000000e+30 : f32
    %436 = vector.broadcast %cst_98 : f32 to vector<2x16xf32>
    %437 = arith.select %435, %436, %422 : vector<2x16xi1>, vector<2x16xf32>
    %cst_99 = arith.constant dense<0xFF800000> : vector<2xf32>
    %438 = vector.multi_reduction <maximumf>, %437, %cst_99 [1] : vector<2x16xf32> to vector<2xf32>
    %439 = vector.shape_cast %438 : vector<2xf32> to vector<2x1xf32>
    %440 = vector.broadcast %439 : vector<2x1xf32> to vector<2x16xf32>
    %441 = arith.cmpf oge, %437, %440 : vector<2x16xf32>
    %cst_100 = arith.constant 1.600000e+01 : f32
    %442 = vector.shape_cast %11 : vector<1x16xf32> to vector<1x16xf32>
    %443 = vector.broadcast %442 : vector<1x16xf32> to vector<2x16xf32>
    %444 = vector.broadcast %cst_100 : f32 to vector<2x16xf32>
    %445 = arith.select %441, %443, %444 : vector<2x16xi1>, vector<2x16xf32>
    %cst_101 = arith.constant dense<0x7F800000> : vector<2xf32>
    %446 = vector.multi_reduction <minimumf>, %445, %cst_101 [1] : vector<2x16xf32> to vector<2xf32>
    %447 = vector.shape_cast %446 : vector<2xf32> to vector<2x1xf32>
    %448 = arith.subf %424, %424 : vector<2x1xf32>
    %449 = math.exp %448 : vector<2x1xf32>
    %450 = arith.subf %439, %424 : vector<2x1xf32>
    %451 = math.exp %450 : vector<2x1xf32>
    %452 = arith.addf %449, %451 : vector<2x1xf32>
    %453 = tpu.reciprocal %452 {approx = true} : vector<2x1xf32> -> vector<2x1xf32>
    %cst_102 = arith.constant 0.000000e+00 : f32
    %454 = vector.broadcast %cst_102 : f32 to vector<2x16x16xf32>
    %455 = vector.shape_cast %432 : vector<2x1xf32> to vector<2x1x1xf32>
    %456 = vector.broadcast %14 : vector<1x16x16xf32> to vector<2x16x16xf32>
    %457 = vector.broadcast %455 : vector<2x1x1xf32> to vector<2x16x16xf32>
    %458 = arith.addf %456, %457 : vector<2x16x16xf32>
    %459 = vector.broadcast %17 : vector<1x16x16xf32> to vector<2x16x16xf32>
    %460 = arith.cmpf oeq, %458, %459 : vector<2x16x16xf32>
    %cst_103 = arith.constant 1.000000e+00 : f32
    %cst_104 = arith.constant 0.000000e+00 : f32
    %461 = vector.broadcast %cst_103 : f32 to vector<2x16x16xf32>
    %462 = vector.broadcast %cst_104 : f32 to vector<2x16x16xf32>
    %463 = arith.select %460, %461, %462 : vector<2x16x16xi1>, vector<2x16x16xf32>
    %cst_105 = arith.constant 1.600000e+01 : f32
    %464 = vector.broadcast %cst_105 : f32 to vector<1x16x16xf32>
    %465 = arith.addf %17, %464 : vector<1x16x16xf32>
    %466 = vector.broadcast %465 : vector<1x16x16xf32> to vector<2x16x16xf32>
    %467 = arith.cmpf oeq, %458, %466 : vector<2x16x16xf32>
    %cst_106 = arith.constant 1.000000e+00 : f32
    %cst_107 = arith.constant 0.000000e+00 : f32
    %468 = vector.broadcast %cst_106 : f32 to vector<2x16x16xf32>
    %469 = vector.broadcast %cst_107 : f32 to vector<2x16x16xf32>
    %470 = arith.select %467, %468, %469 : vector<2x16x16xi1>, vector<2x16x16xf32>
    %471 = arith.addf %463, %470 : vector<2x16x16xf32>
    %472 = arith.mulf %449, %453 : vector<2x1xf32>
    %473 = vector.shape_cast %472 : vector<2x1xf32> to vector<2x1x1xf32>
    %474 = vector.broadcast %473 : vector<2x1x1xf32> to vector<2x16x16xf32>
    %475 = arith.mulf %474, %471 : vector<2x16x16xf32>
    %476 = arith.addf %454, %475 : vector<2x16x16xf32>
    %477 = vector.shape_cast %447 : vector<2x1xf32> to vector<2x1x1xf32>
    %478 = vector.broadcast %14 : vector<1x16x16xf32> to vector<2x16x16xf32>
    %479 = vector.broadcast %477 : vector<2x1x1xf32> to vector<2x16x16xf32>
    %480 = arith.addf %478, %479 : vector<2x16x16xf32>
    %481 = vector.broadcast %17 : vector<1x16x16xf32> to vector<2x16x16xf32>
    %482 = arith.cmpf oeq, %480, %481 : vector<2x16x16xf32>
    %cst_108 = arith.constant 1.000000e+00 : f32
    %cst_109 = arith.constant 0.000000e+00 : f32
    %483 = vector.broadcast %cst_108 : f32 to vector<2x16x16xf32>
    %484 = vector.broadcast %cst_109 : f32 to vector<2x16x16xf32>
    %485 = arith.select %482, %483, %484 : vector<2x16x16xi1>, vector<2x16x16xf32>
    %cst_110 = arith.constant 1.600000e+01 : f32
    %486 = vector.broadcast %cst_110 : f32 to vector<1x16x16xf32>
    %487 = arith.addf %17, %486 : vector<1x16x16xf32>
    %488 = vector.broadcast %487 : vector<1x16x16xf32> to vector<2x16x16xf32>
    %489 = arith.cmpf oeq, %480, %488 : vector<2x16x16xf32>
    %cst_111 = arith.constant 1.000000e+00 : f32
    %cst_112 = arith.constant 0.000000e+00 : f32
    %490 = vector.broadcast %cst_111 : f32 to vector<2x16x16xf32>
    %491 = vector.broadcast %cst_112 : f32 to vector<2x16x16xf32>
    %492 = arith.select %489, %490, %491 : vector<2x16x16xi1>, vector<2x16x16xf32>
    %493 = arith.addf %485, %492 : vector<2x16x16xf32>
    %494 = arith.mulf %451, %453 : vector<2x1xf32>
    %495 = vector.shape_cast %494 : vector<2x1xf32> to vector<2x1x1xf32>
    %496 = vector.broadcast %495 : vector<2x1x1xf32> to vector<2x16x16xf32>
    %497 = arith.mulf %496, %493 : vector<2x16x16xf32>
    %498 = arith.addf %476, %497 : vector<2x16x16xf32>
    %499 = arith.truncf %498 : vector<2x16x16xf32> to vector<2x16x16xbf16>
    %500 = arith.truncf %384 : vector<2x16x32xf32> to vector<2x16x32xbf16>
    "tpu.trace_start"() <{level = 10 : i32, message = "blm,bmd->bld"}> : () -> ()
    %cst_113 = arith.constant dense<0.000000e+00> : vector<2x16x32xf32>
    %501 = tpu.matmul %499, %500, %cst_113 {dimension_numbers = #tpu.dot_dimension_numbers<[2], [1], [1], [2], [0, 0, 0, 1, 1, 2], [0], [0]>} : vector<2x16x16xbf16>, vector<2x16x32xbf16>, vector<2x16x32xf32> -> vector<2x16x32xf32>
    "tpu.trace_stop"() : () -> ()
    %502 = vector.shape_cast %501 : vector<2x16x32xf32> to vector<32x32xf32>
    %503 = arith.truncf %502 : vector<32x32xf32> to vector<32x32xbf16>
    %504 = arith.truncf %368 : vector<32x32xf32> to vector<32x32xbf16>
    %cst_114 = arith.constant dense<0.000000e+00> : vector<32x32xf32>
    %505 = tpu.matmul %503, %504, %cst_114 {dimension_numbers = #tpu.dot_dimension_numbers<[1], [0], [0], [1], [0, 0, 1, 1], [], []>} : vector<32x32xbf16>, vector<32x32xbf16>, vector<32x32xf32> -> vector<32x32xf32>
    %506 = vector.broadcast %369 : vector<1x32xf32> to vector<32x32xf32>
    %507 = arith.addf %505, %506 : vector<32x32xf32>
    %508 = arith.addf %363, %507 : vector<32x32xf32>
    %509 = arith.truncf %508 : vector<32x32xf32> to vector<32x32xbf16>
    %cst_115 = arith.constant dense<0.000000e+00> : vector<32x32xf32>
    %510 = tpu.matmul %1, %509, %cst_115 {dimension_numbers = #tpu.dot_dimension_numbers<[1], [0], [0], [1], [0, 0, 1, 1], [], []>} : vector<32x32xbf16>, vector<32x32xbf16>, vector<32x32xf32> -> vector<32x32xf32>
    %511 = arith.subf %508, %510 : vector<32x32xf32>
    %c776 = arith.constant 776 : index
    %c0_116 = arith.constant 0 : index
    %512 = vector.load %arg1[%c776, %c0_116] : memref<1032x128xf32, #tpu.memory_space<vmem>>, vector<32x32xf32>
    %513 = arith.truncf %511 : vector<32x32xf32> to vector<32x32xbf16>
    %514 = arith.truncf %512 : vector<32x32xf32> to vector<32x32xbf16>
    %cst_117 = arith.constant dense<0.000000e+00> : vector<32x32xf32>
    %515 = tpu.matmul %513, %514, %cst_117 {dimension_numbers = #tpu.dot_dimension_numbers<[1], [0], [0], [1], [0, 0, 1, 1], [], []>} : vector<32x32xbf16>, vector<32x32xbf16>, vector<32x32xf32> -> vector<32x32xf32>
    %cst_118 = arith.constant 0.000000e+00 : f32
    %516 = vector.broadcast %cst_118 : f32 to vector<32x32xf32>
    %517 = arith.maximumf %515, %516 : vector<32x32xf32>
    %c808 = arith.constant 808 : index
    %c0_119 = arith.constant 0 : index
    %518 = vector.load %arg1[%c808, %c0_119] : memref<1032x128xf32, #tpu.memory_space<vmem>>, vector<32x32xf32>
    %519 = arith.truncf %517 : vector<32x32xf32> to vector<32x32xbf16>
    %520 = arith.truncf %518 : vector<32x32xf32> to vector<32x32xbf16>
    %cst_120 = arith.constant dense<0.000000e+00> : vector<32x32xf32>
    %521 = tpu.matmul %519, %520, %cst_120 {dimension_numbers = #tpu.dot_dimension_numbers<[1], [0], [0], [1], [0, 0, 1, 1], [], []>} : vector<32x32xbf16>, vector<32x32xbf16>, vector<32x32xf32> -> vector<32x32xf32>
    %522 = arith.addf %511, %521 : vector<32x32xf32>
    %523 = arith.truncf %522 : vector<32x32xf32> to vector<32x32xbf16>
    %cst_121 = arith.constant dense<0.000000e+00> : vector<32x32xf32>
    %524 = tpu.matmul %1, %523, %cst_121 {dimension_numbers = #tpu.dot_dimension_numbers<[1], [0], [0], [1], [0, 0, 1, 1], [], []>} : vector<32x32xbf16>, vector<32x32xbf16>, vector<32x32xf32> -> vector<32x32xf32>
    %525 = arith.subf %522, %524 : vector<32x32xf32>
    %526 = arith.addf %362, %510 : vector<32x32xf32>
    %527 = arith.addf %526, %524 : vector<32x32xf32>
    %c840 = arith.constant 840 : index
    %c0_122 = arith.constant 0 : index
    %528 = vector.load %arg1[%c840, %c0_122] : memref<1032x128xf32, #tpu.memory_space<vmem>>, vector<96x4xf32>
    %529 = arith.truncf %527 : vector<32x32xf32> to vector<32x32xbf16>
    %cst_123 = arith.constant dense<0.000000e+00> : vector<32x32xf32>
    %530 = tpu.matmul %3, %529, %cst_123 {dimension_numbers = #tpu.dot_dimension_numbers<[1], [0], [0], [1], [0, 0, 1, 1], [], []>} : vector<32x32xbf16>, vector<32x32xbf16>, vector<32x32xf32> -> vector<32x32xf32>
    %531 = arith.truncf %527 : vector<32x32xf32> to vector<32x32xbf16>
    %cst_124 = arith.constant dense<0.000000e+00> : vector<32x32xf32>
    %532 = tpu.matmul %5, %531, %cst_124 {dimension_numbers = #tpu.dot_dimension_numbers<[1], [0], [0], [1], [0, 0, 1, 1], [], []>} : vector<32x32xbf16>, vector<32x32xbf16>, vector<32x32xf32> -> vector<32x32xf32>
    %533 = tpu.concatenate %530, %527, %532 in 1 : vector<32x32xf32>, vector<32x32xf32>, vector<32x32xf32> -> vector<32x96xf32>
    %534 = arith.truncf %533 : vector<32x96xf32> to vector<32x96xbf16>
    %535 = arith.truncf %528 : vector<96x4xf32> to vector<96x4xbf16>
    %cst_125 = arith.constant dense<0.000000e+00> : vector<32x4xf32>
    %536 = tpu.matmul %534, %535, %cst_125 {dimension_numbers = #tpu.dot_dimension_numbers<[1], [0], [0], [1], [0, 0, 1, 1], [], []>} : vector<32x96xbf16>, vector<96x4xbf16>, vector<32x4xf32> -> vector<32x4xf32>
    %537 = arith.addf %20, %536 : vector<32x4xf32>
    %c936 = arith.constant 936 : index
    %c0_126 = arith.constant 0 : index
    %538 = vector.load %arg1[%c936, %c0_126] : memref<1032x128xf32, #tpu.memory_space<vmem>>, vector<1x32xf32>
    %c944 = arith.constant 944 : index
    %c0_127 = arith.constant 0 : index
    %539 = vector.load %arg1[%c944, %c0_127] : memref<1032x128xf32, #tpu.memory_space<vmem>>, vector<1x32xf32>
    %cst_128 = arith.constant dense<0.000000e+00> : vector<32xf32>
    %540 = vector.multi_reduction <add>, %525, %cst_128 [1] : vector<32x32xf32> to vector<32xf32>
    %541 = vector.shape_cast %540 : vector<32xf32> to vector<32x1xf32>
    %cst_129 = arith.constant 3.200000e+01 : f32
    %542 = vector.broadcast %cst_129 : f32 to vector<32x1xf32>
    %543 = arith.divf %541, %542 : vector<32x1xf32>
    %544 = vector.broadcast %543 : vector<32x1xf32> to vector<32x32xf32>
    %545 = arith.subf %525, %544 : vector<32x32xf32>
    %546 = arith.mulf %545, %545 : vector<32x32xf32>
    %cst_130 = arith.constant dense<0.000000e+00> : vector<32xf32>
    %547 = vector.multi_reduction <add>, %546, %cst_130 [1] : vector<32x32xf32> to vector<32xf32>
    %548 = vector.shape_cast %547 : vector<32xf32> to vector<32x1xf32>
    %cst_131 = arith.constant 3.200000e+01 : f32
    %549 = vector.broadcast %cst_131 : f32 to vector<32x1xf32>
    %550 = arith.divf %548, %549 : vector<32x1xf32>
    %551 = vector.broadcast %543 : vector<32x1xf32> to vector<32x32xf32>
    %552 = arith.subf %525, %551 : vector<32x32xf32>
    %cst_132 = arith.constant 9.99999974E-6 : f32
    %553 = vector.broadcast %cst_132 : f32 to vector<32x1xf32>
    %554 = arith.addf %550, %553 : vector<32x1xf32>
    %555 = math.rsqrt %554 : vector<32x1xf32>
    %556 = vector.broadcast %555 : vector<32x1xf32> to vector<32x32xf32>
    %557 = arith.mulf %552, %556 : vector<32x32xf32>
    %558 = vector.broadcast %538 : vector<1x32xf32> to vector<32x32xf32>
    %559 = arith.mulf %557, %558 : vector<32x32xf32>
    %560 = vector.broadcast %539 : vector<1x32xf32> to vector<32x32xf32>
    %561 = arith.addf %559, %560 : vector<32x32xf32>
    %562 = arith.truncf %561 : vector<32x32xf32> to vector<32x32xbf16>
    %cst_133 = arith.constant dense<0.000000e+00> : vector<32x32xf32>
    %563 = tpu.matmul %7, %562, %cst_133 {dimension_numbers = #tpu.dot_dimension_numbers<[1], [0], [0], [1], [0, 0, 1, 1], [], []>} : vector<32x32xbf16>, vector<32x32xbf16>, vector<32x32xf32> -> vector<32x32xf32>
    %c952 = arith.constant 952 : index
    %c0_134 = arith.constant 0 : index
    %564 = vector.load %arg1[%c952, %c0_134] : memref<1032x128xf32, #tpu.memory_space<vmem>>, vector<32x4xf32>
    %565 = arith.truncf %563 : vector<32x32xf32> to vector<32x32xbf16>
    %566 = arith.truncf %564 : vector<32x4xf32> to vector<32x4xbf16>
    %cst_135 = arith.constant dense<0.000000e+00> : vector<32x4xf32>
    %567 = tpu.matmul %565, %566, %cst_135 {dimension_numbers = #tpu.dot_dimension_numbers<[1], [0], [0], [1], [0, 0, 1, 1], [], []>} : vector<32x32xbf16>, vector<32x4xbf16>, vector<32x4xf32> -> vector<32x4xf32>
    %c984 = arith.constant 984 : index
    %c0_136 = arith.constant 0 : index
    %568 = vector.load %arg1[%c984, %c0_136] : memref<1032x128xf32, #tpu.memory_space<vmem>>, vector<1x4xf32>
    %569 = vector.broadcast %568 : vector<1x4xf32> to vector<32x4xf32>
    %570 = arith.addf %567, %569 : vector<32x4xf32>
    %571 = arith.addf %570, %537 : vector<32x4xf32>
    %c992 = arith.constant 992 : index
    %c0_137 = arith.constant 0 : index
    %572 = vector.load %arg1[%c992, %c0_137] : memref<1032x128xf32, #tpu.memory_space<vmem>>, vector<32x4xf32>
    %573 = arith.mulf %571, %572 : vector<32x4xf32>
    %cst_138 = arith.constant dense<0.000000e+00> : vector<32xf32>
    %574 = vector.multi_reduction <add>, %573, %cst_138 [1] : vector<32x4xf32> to vector<32xf32>
    %575 = vector.shape_cast %574 : vector<32xf32> to vector<32x1xf32>
    %576 = vector.shape_cast %575 : vector<32x1xf32> to vector<2x16x1xf32>
    %cst_139 = arith.constant dense<0.000000e+00> : vector<2x1xf32>
    %577 = vector.multi_reduction <add>, %576, %cst_139 [1] : vector<2x16x1xf32> to vector<2x1xf32>
    %c1024 = arith.constant 1024 : index
    %c0_140 = arith.constant 0 : index
    %578 = vector.load %arg1[%c1024, %c0_140] : memref<1032x128xf32, #tpu.memory_space<vmem>>, vector<1x1xf32>
    %579 = vector.broadcast %578 : vector<1x1xf32> to vector<2x1xf32>
    %580 = arith.addf %577, %579 : vector<2x1xf32>
    %c0_141 = arith.constant 0 : index
    %c0_142 = arith.constant 0 : index
    %581 = vector.load %arg2[%c0_141, %c0_142] : memref<2x1xf32, #tpu.memory_space<vmem>>, vector<2x1xf32>
    tpu.vector_store %arg2[%c0_141, %c0_142], %580 {strides = array<i32>} : memref<2x1xf32, #tpu.memory_space<vmem>>, vector<2x1xf32>,
    return
  }
}

</mosaic_0001>

<bundles_post_ra>
// kernel: forward.1
= control target key start
LH: loop header
LB: loop body
LE: loop exit
PB: predicated region body
PF: predicated region fallthrough
CT: control target
= control target key end

     0   :  { %7 = vsyncpa [#allocation3], 0  ;;  %s2795_s12 = smov [#allocation2]   ;;  %s2796_s14 = smov 128   ;;  %s3698_s0 = inlined_call_operand.vmem [shape: f32[32,4], index: 0, kind: input, shape index: {}]   ;;  %s3699_s1 = inlined_call_operand.hbm [shape: f32[1032,128], index: 1, kind: input, shape index: {}]   ;;  %s3700_s2 = inlined_call_operand.vmem [shape: f32[2,1], index: 2, kind: output, shape index: {}]  }
   0x1   :  { %s14_s11 = sshll.u32 %s3699_s1, 4  ;;  %s16_s13 = sshll.u32 %s2795_s12, 4  ;;  %s15_s11 = int_to_ptr.hbm [resolvable:$true] %s14_s11  ;;  %s17_s13 = int_to_ptr.vmem [resolvable:$true] %s16_s13 }
   0x2   :  { %s2797_s15 = smov 8  }
   0x3   :  { %22 = dma.hbm_to_vmem [thread:$0]  %s15_s11, 16512, %s17_s13, [#allocation3], %s2796_s14, %s2796_s14, %s2797_s15  }
   0x4   :  { %2793 = dma.done.wait [#allocation3], 16512  }
   0x5   :  { %2794 = vsyncadd [#allocation3], 4294950784  ;;  %v2830_v0 = vld [vmem:[%s3698_s0 + $0x10] sm:$0xff]  ;;  %v2835_v1 = vld [vmem:[%s3698_s0 + $0x18] sm:$0xff]  ;;  %vm114_vm0 = vcmask 261120   ;;  %vm248_vm1 = vcmask 1045504  }
   0x6   :  { %v2840_v2 = vld [vmem:[%s3698_s0] sm:$0xff]  ;;  %v113_v3 = vpack.c.bf16 %v2835_v1, %v2830_v0  ;;  %v2847_v4 = vld [vmem:[%s3698_s0 + $0x8] sm:$0xff]  ;;  %v30_v8 = vld [vmem:[#allocation2 + $0x10] sm:$0xff]  ;;  %s2798_s0 = smov 4   ;;  %v2585_v22 = vpack.i.bf16 %v2835_v1, %v2830_v0  ;;  %vm228_vm2 = vcmask 31744   ;;  %vm233_vm3 = vcmask 64512  }
   0x7   :  { %v40_v5 = vld [vmem:[#allocation2 + $0x40] sm:$0xff]  ;;  %v112_v6 = vpack.c.bf16 %v2847_v4, %v2840_v2  ;;  %v41_v7 = vld [vmem:[#allocation2 + $0x48] sm:$0xff]  ;;  %v31_v9 = vld [vmem:[#allocation2 + $0x18] sm:$0xff]  ;;  %v2575_v21 = vpack.i.bf16 %v2847_v4, %v2840_v2  ;;  %vm241_vm4 = vcmask 97280   ;;  %s2799_s23 = smov 96   ;;  %vm372_vm5 = vcmask 1041409  }
   0x8   :  { %183 = vmatpush.bf16.msra.mxu2 %v113_v3  ;;  %2558 = vmatpush.bf16.msra.mxu1 %v113_v3  ;;  %v2851_v10 = vpack.c.bf16 %v41_v7, %v40_v5  ;;  %v2853_v11 = vpack.c.bf16 %v31_v9, %v30_v8  ;;  %v42_v12 = vld [vmem:[#allocation2 + $0x50] sm:$0xff]  ;;  %v43_v13 = vld [vmem:[#allocation2 + $0x58] sm:$0xff]  ;;  %v34_v14 = vld [vmem:[#allocation2 + $0x20] sm:$0xff]  ;;  %s2800_s24 = smov 16   ;;  %s2801_s25 = smov 48   ;;  %vm462_vm6 = vcmask 130048  }
   0x9   :  { %127 = vmatpush.bf16.msra.mxu0 %v113_v3  ;;  %v35_v15 = vld [vmem:[#allocation2 + $0x28] sm:$0xff]  ;;  %v2859_v16 = vpack.c.bf16 %v43_v13, %v42_v12  ;;  %v36_v18 = vld [vmem:[#allocation2 + $0x30] sm:$0xff]  ;;  %v37_v19 = vld [vmem:[#allocation2 + $0x38] sm:$0xff]  ;;  %2576 = vrot.lane.b32.xlu0 %v2575_v21, %s2798_s0  ;;  %s2802_s26 = smov 32   ;;  %s2803_s27 = smov 64   ;;  %vm465_vm7 = vcmask 392192  }
   0xa   :  { %v2861_v17 = vpack.c.bf16 %v35_v15, %v34_v14  ;;  %v2867_v20 = vpack.c.bf16 %v37_v19, %v36_v18  ;;  %2586 = vrot.lane.b32.xlu1 %v2585_v22, %s2798_s0  ;;  %v144_v30 = vld [vmem:[#allocation2 + $0x180] sm:$0xff]  ;;  %v145_v31 = vld [vmem:[#allocation2 + $0x188] sm:$0xf]  ;;  %v273_v61 = vld [vmem:[#allocation2 + $0x1b0] sm:$0xff]  ;;  %s2804_s28 = smov 80   ;;  %s2805_s29 = smov 112  }
   0xb   :  { %v240_v32 = vpack.c.bf16 %v145_v31, %v144_v30  ;;  %v274_v62 = vld [vmem:[#allocation2 + $0x1b8] sm:$0xff]  ;;  %v272_v5 = vld [vmem:[#allocation2 + $0x1a8] sm:$0xff]  ;;  %v2720_v18 = vld [vmem:[#allocation2 + $0x1c0] ss:$0 sm:$0xff]  ;;  %vm3705_vm8 = vcmask 523264   ;;  %vm3704_vm9 = vcmask 654336  }
   0xc   :  { %184 = vmatpush.bf16.msra.mxu2 %v112_v6  ;;  %2559 = vmatpush.bf16.msra.mxu1 %v112_v6  ;;  %v284_v63 = vpack.c.bf16 %v274_v62, %v273_v61  ;;  %v28_v19 = vld [vmem:[#allocation2] sm:$0xff]  ;;  %v29_v21 = vld [vmem:[#allocation2 + $0x8] sm:$0xff]  ;;  %vm3703_vm10 = vcmask 785408   ;;  %vm3702_vm11 = vcmask 916480   ;;  %vm3701_vm12 = vcmask 123904  }
   0xd   :  { %128 = vmatpush.bf16.msra.mxu0 %v112_v6  ;;  %v250_v33 = vsel %vm248_vm1, %v240_v32, 0  ;;  %v2908_v22 = vpack.c.bf16 %v29_v21, %v28_v19 }
   0xe   :  { %259 = vmatpush.bf16.msra.mxu3 %v250_v33 }
   0xf   :  { %2492 = vmatmul.msk.bf16.vlgmr.msra.gmra.mxu2 %vm114_vm0, %v2851_v10  ;;  %2489 = vmatmul.msk.bf16.vlgmr.msra.gmra.mxu1 %vm114_vm0, %v2853_v11 }
  0x10   :  { %158 = vmatpush.bf16.msrb.mxu1 %v113_v3  ;;  %v271_v3 = vld [vmem:[#allocation2 + $0x1a0] sm:$0xff]  ;;  %2488 = vmatmul.msk.bf16.vlgmr.msra.gmra.mxu0 %vm114_vm0, %v2908_v22 }
  0x12   :  { %298 = vmatpush.bf16.msrb.mxu3 %v284_v63 }
  0x14   :  { %159 = vmatpush.bf16.msrb.mxu1 %v112_v6  ;;  %v283_v6 = vpack.c.bf16 %v272_v5, %v271_v3 }
  0x16   :  { %299 = vmatpush.bf16.msrb.mxu3 %v283_v6 }
  0x1f   :  { %2493 = vmatmul.msk.bf16.gmra.mxu2 %vm114_vm0, %v2859_v16  ;;  %2490 = vmatmul.msk.bf16.vlgmr.msrb.gmra.mxu1 %vm114_vm0, %v2861_v17 }
  0x2f   :  { %2491 = vmatmul.msk.bf16.gmra.mxu1 %vm114_vm0, %v2867_v20 }
  0x7b   :  { %v2577_v36 = vpop.permute.xlu0 %2576 }
  0x7c   :  { %v2579_v38 = vunpack.i.h.bf16 %v2577_v36  ;;  %v2578_v39 = vunpack.i.l.bf16 %v2577_v36  ;;  %v2587_v49 = vpop.permute.xlu1 %2586 }
  0x7d   :  { %v2589_v50 = vunpack.i.h.bf16 %v2587_v49  ;;  %v2588_v51 = vunpack.i.l.bf16 %v2587_v49 }
  0x8c   :  { %v2879_v29 = vpop.f32.mrf.mxu1 }
  0x8d   :  { %3727 = vst [vmem:[#allocation5_spill] sm:$0xff] %v2879_v29 }
  0x92   :  { %v186_v23 = vpop.f32.mrf.mxu2 }
  0x94   :  { %v2882_v34 = vpop.f32.mrf.mxu1 }
  0x95   :  { %3728 = vst [vmem:[#allocation6_spill] sm:$0xff] %v2882_v34 }
  0x9a   :  { %v188_v24 = vpop.f32.mrf.mxu2 }
  0x9b   :  { %v2580_v25 = vpack.i.bf16 %v188_v24, %v186_v23 }
  0x9c   :  { %v161_v35 = vpop.f32.mrf.mxu1 }
  0x9d   :  { %2581 = vrot.lane.b32.xlu0 %v2580_v25, %s2797_s15  ;;  %v229_v43 = vsel %vm228_vm2, %v161_v35, %v2578_v39 }
  0xa2   :  { %v191_v26 = vpop.f32.mrf.mxu2 }
  0xa4   :  { %v163_v37 = vpop.f32.mrf.mxu1 }
  0xa5   :  { %v230_v44 = vsel %vm228_vm2, %v163_v37, %v2579_v38 }
  0xaa   :  { %v193_v27 = vpop.f32.mrf.mxu2 }
  0xab   :  { %v2590_v28 = vpack.i.bf16 %v193_v27, %v191_v26 }
  0xac   :  { %v166_v48 = vpop.f32.mrf.mxu1 }
  0xad   :  { %2591 = vrot.lane.b32.xlu1 %v2590_v28, %s2797_s15  ;;  %v231_v56 = vsel %vm228_vm2, %v166_v48, %v2588_v51 }
  0xb4   :  { %v168_v52 = vpop.f32.mrf.mxu1 }
  0xb5   :  { %v232_v57 = vsel %vm228_vm2, %v168_v52, %v2589_v50 }
 0x10f   :  { %v2582_v40 = vpop.permute.xlu0 %2581 }
 0x110   :  { %v2584_v41 = vunpack.i.h.bf16 %v2582_v40  ;;  %v2583_v42 = vunpack.i.l.bf16 %v2582_v40 }
 0x112   :  { %v234_v45 = vsel %vm233_vm3, %v229_v43, %v2583_v42  ;;  %v235_v46 = vsel %vm233_vm3, %v230_v44, %v2584_v41 }
 0x113   :  { %v238_v47 = vpack.c.bf16 %v235_v46, %v234_v45  ;;  %v2926_v46 = vpop.f32.mrf.mxu0 }
 0x114   :  { %3729 = vst [vmem:[#allocation7_spill] sm:$0xff] %v2926_v46  ;;  %v2932_v48 = vsub.f32 %v2840_v2, %v2926_v46 }
 0x115   :  { %2494 = vmatmul.msk.bf16.vlgmr.msra.gmra.mxu3 %vm241_vm4, %v238_v47 }
 0x11b   :  { %v2928_v47 = vpop.f32.mrf.mxu0 }
 0x11c   :  { %3730 = vst [vmem:[#allocation8_spill] sm:$0xff] %v2928_v47  ;;  %v2936_v49 = vsub.f32 %v2847_v4, %v2928_v47 }
 0x11e   :  { %v2630_v50 = vpack.i.bf16 %v2936_v49, %v2932_v48 }
 0x11f   :  { %v2592_v53 = vpop.permute.xlu1 %2591 }
 0x120   :  { %v2594_v54 = vunpack.i.h.bf16 %v2592_v53  ;;  %v2593_v55 = vunpack.i.l.bf16 %v2592_v53 }
 0x122   :  { %v236_v58 = vsel %vm233_vm3, %v231_v56, %v2593_v55  ;;  %v237_v59 = vsel %vm233_vm3, %v232_v57, %v2594_v54 }
 0x123   :  { %v239_v60 = vpack.c.bf16 %v237_v59, %v236_v58 }
 0x125   :  { %2495 = vmatmul.msk.bf16.gmra.mxu3 %vm241_vm4, %v239_v60 }
 0x198   :  { %v2894_v7 = vpop.f32.mrf.mxu3 }
 0x1a0   :  { %v2896_v8 = vpop.f32.mrf.mxu3 }
 0x1a1   :  { %v281_v9 = vpack.c.bf16 %v2896_v8, %v2894_v7 }
 0x1a3   :  { %2496 = vmatmul.msk.bf16.vlgmr.msrb.gmra.mxu3 %vm114_vm0, %v281_v9 }
 0x1a8   :  { %v2901_v12 = vpop.f32.mrf.mxu3 }
 0x1b0   :  { %v2903_v13 = vpop.f32.mrf.mxu3 }
 0x1b1   :  { %v282_v14 = vpack.c.bf16 %v2903_v13, %v2901_v12 }
 0x1b3   :  { %2497 = vmatmul.msk.bf16.gmra.mxu3 %vm114_vm0, %v282_v14 }
 0x226   :  { %v301_v15 = vpop.f32.mrf.mxu3 }
 0x227   :  { %v302_v23 = vadd.f32 %v2720_v18, %v301_v15 }
 0x229   :  { %v311_v25 = vpack.c.bf16 %v302_v23, %v302_v23 }
 0x22b   :  { %v317_v28 = vunpack.c.l.b16 %v311_v25 }
 0x22e   :  { %v303_v24 = vpop.f32.mrf.mxu3 }
 0x22f   :  { %v304_v26 = vadd.f32 %v2720_v18, %v303_v24 }
 0x231   :  { %v312_v27 = vpack.c.bf16 %v304_v26, %v304_v26 }
 0x233   :  { %v318_v30 = vunpack.c.l.b16 %v312_v27 }
 0x235   :  { %v2912_v31 = vpack.c.b16 %v318_v30, %v317_v28 }
 0x236   :  { %v306_v32 = vpop.f32.mrf.mxu3 }
 0x237   :  { %320 = vrot.lane.b32.xlu2 %v2912_v31, %s2799_s23  ;;  %v307_v33 = vadd.f32 %v2720_v18, %v306_v32 }
 0x239   :  { %v313_v36 = vpack.c.bf16 %v307_v33, %v307_v33 }
 0x23b   :  { %v344_v39 = vunpack.c.l.b16 %v313_v36 }
 0x23e   :  { %v308_v35 = vpop.f32.mrf.mxu3 }
 0x23f   :  { %v309_v37 = vadd.f32 %v2720_v18, %v308_v35 }
 0x241   :  { %v314_v38 = vpack.c.bf16 %v309_v37, %v309_v37 }
 0x243   :  { %v345_v40 = vunpack.c.l.b16 %v314_v38 }
 0x245   :  { %v2916_v41 = vpack.c.b16 %v345_v40, %v344_v39 }
 0x247   :  { %347 = vrot.lane.b32.xlu2 %v2916_v41, %s2799_s23 }
 0x291   :  { %v321_v42 = vpop.permute.xlu2 %320 }
 0x292   :  { %v326_v43 = vsel %vm114_vm0, %v321_v42, 0 }
 0x293   :  { %335 = vmatpush.bf16.xpose.msrb.mxu0 %v326_v43 }
 0x29a   :  { %2498 = vmatmul.msk.bf16.vlgmr.msrb.gmra.mxu0 %vm114_vm0, %v2912_v31 }
 0x2a1   :  { %v348_v44 = vpop.permute.xlu2 %347 }
 0x2a2   :  { %v353_v45 = vsel %vm114_vm0, %v348_v44, 0 }
 0x2a3   :  { %362 = vmatpush.bf16.xpose.msra.mxu1 %v353_v45 }
 0x2aa   :  { %2499 = vmatmul.msk.bf16.vlgmr.msra.gmra.mxu1 %vm114_vm0, %v2916_v41 }
 0x317   :  { %v2940_v51 = vpop.f32.mrf.mxu0 }
 0x318   :  { %v375_v4 = vrot.slane %v2940_v51, 1  ;;  %v386_v59 = vrot.slane %v2940_v51, 3  ;;  %v380_v61 = vrot.slane %v2940_v51, 2  ;;  %v392_v30 = vrot.slane %v2940_v51, 4 }
 0x319   :  { %v404_v38 = vrot.slane %v2940_v51, 6  ;;  %v398_v42 = vrot.slane %v2940_v51, 5 }
 0x31f   :  { %v2945_v54 = vpop.f32.mrf.mxu0 }
 0x320   :  { %v421_v56 = vrot.slane %v2945_v54, 1  ;;  %v432_v60 = vrot.slane %v2945_v54, 3  ;;  %v426_v62 = vrot.slane %v2945_v54, 2  ;;  %v438_v26 = vrot.slane %v2945_v54, 4 }
 0x321   :  { %v450_v32 = vrot.slane %v2945_v54, 6  ;;  %v444_v37 = vrot.slane %v2945_v54, 5 }
 0x327   :  { %v2942_v52 = vpop.f32.mrf.mxu1 }
 0x328   :  { %v371_v53 = vrot.slane %v2942_v52, 7  ;;  %v387_v55 = vrot.slane %v2942_v52, 2  ;;  %v381_v57 = vrot.slane %v2942_v52, 1  ;;  %v376_v63 = vsel %vm372_vm5, %v2942_v52, %v375_v4 }
 0x329   :  { %v393_v25 = vrot.slane %v2942_v52, 3  ;;  %v405_v35 = vrot.slane %v2942_v52, 5  ;;  %v399_v36 = vrot.slane %v2942_v52, 4 }
 0x32a   :  { %v2949_v2 = vsel %vm372_vm5, %v371_v53, %v2940_v51  ;;  %v388_v14 = vsel %vm372_vm5, %v387_v55, %v386_v59  ;;  %v382_v18 = vsel %vm372_vm5, %v381_v57, %v380_v61  ;;  %v411_v57 = vrot.slane %v2942_v52, 6  ;;  %v66_v52 = vld [vmem:[#allocation2 + $0xf0] sm:$0xff] }
 0x32b   :  { %v394_v39 = vsel %vm372_vm5, %v393_v25, %v392_v30  ;;  %v406_v45 = vsel %vm372_vm5, %v405_v35, %v404_v38  ;;  %v400_v53 = vsel %vm372_vm5, %v399_v36, %v398_v42  ;;  %v456_v59 = vrot.slane %v2945_v54, 7  ;;  %v79_v25 = vld [vmem:[#allocation2 + $0x158] sm:$0xff]  ;;  %v60_v36 = vld [vmem:[#allocation2 + $0xc0] sm:$0xff] }
 0x32f   :  { %v2955_v58 = vpop.f32.mrf.mxu1 }
 0x330   :  { %v422_v3 = vsel %vm372_vm5, %v2955_v58, %v421_v56  ;;  %v433_v5 = vrot.slane %v2955_v58, 2  ;;  %v427_v6 = vrot.slane %v2955_v58, 1  ;;  %v439_v21 = vrot.slane %v2955_v58, 3 }
 0x331   :  { %v2595_v9 = vpack.i.bf16 %v422_v3, %v376_v63  ;;  %v451_v27 = vrot.slane %v2955_v58, 5  ;;  %v445_v28 = vrot.slane %v2955_v58, 4  ;;  %v457_v55 = vrot.slane %v2955_v58, 6  ;;  %v82_v3 = vld [vmem:[#allocation2 + $0x170] sm:$0xff] }
 0x332   :  { %v434_v15 = vsel %vm372_vm5, %v433_v5, %v432_v60  ;;  %v428_v19 = vsel %vm372_vm5, %v427_v6, %v426_v62  ;;  %v440_v33 = vsel %vm372_vm5, %v439_v21, %v438_v26  ;;  %v410_v60 = vrot.slane %v2940_v51, 7  ;;  %v83_v5 = vld [vmem:[#allocation2 + $0x178] sm:$0xff]  ;;  %v65_v51 = vld [vmem:[#allocation2 + $0xe8] sm:$0xff]  ;;  %v62_v26 = vld [vmem:[#allocation2 + $0xd0] sm:$0xff] }
 0x333   :  { %2596 = vrot.lane.b32.xlu0 %v2595_v9, %s2800_s24  ;;  %v2605_v23 = vpack.i.bf16 %v434_v15, %v388_v14  ;;  %v2600_v24 = vpack.i.bf16 %v428_v19, %v382_v18  ;;  %v452_v40 = vsel %vm372_vm5, %v451_v27, %v450_v32  ;;  %v446_v43 = vsel %vm372_vm5, %v445_v28, %v444_v37  ;;  %v67_v9 = vld [vmem:[#allocation2 + $0xf8] sm:$0xff]  ;;  %v80_v14 = vld [vmem:[#allocation2 + $0x160] sm:$0xff]  ;;  %v81_v15 = vld [vmem:[#allocation2 + $0x168] sm:$0xff] }
 0x334   :  { %v2610_v44 = vpack.i.bf16 %v440_v33, %v394_v39  ;;  %v2620_v4 = vpack.i.bf16 %v452_v40, %v406_v45  ;;  %v2615_v56 = vpack.i.bf16 %v446_v43, %v400_v53  ;;  %v458_v61 = vsel %vm372_vm5, %v457_v55, %v456_v59  ;;  %v64_v19 = vld [vmem:[#allocation2 + $0xe0] sm:$0xff]  ;;  %v63_v27 = vld [vmem:[#allocation2 + $0xd8] sm:$0xff]  ;;  %v77_v33 = vld [vmem:[#allocation2 + $0x148] sm:$0xff] }
 0x335   :  { %2606 = vrot.lane.b32.xlu2 %v2605_v23, %s2801_s25  ;;  %2601 = vrot.lane.b32.xlu1 %v2600_v24, %s2802_s26  ;;  %v412_v62 = vsel %vm372_vm5, %v411_v57, %v410_v60  ;;  %v3002_v6 = vpack.c.bf16 %v83_v5, %v82_v3  ;;  %v3004_v18 = vpack.c.bf16 %v67_v9, %v66_v52  ;;  %v78_v24 = vld [vmem:[#allocation2 + $0x150] sm:$0xff]  ;;  %v76_v32 = vld [vmem:[#allocation2 + $0x140] sm:$0xff]  ;;  %v61_v37 = vld [vmem:[#allocation2 + $0xc8] sm:$0xff] }
 0x336   :  { %v2625_v63 = vpack.i.bf16 %v458_v61, %v412_v62  ;;  %v3007_v21 = vpack.c.bf16 %v81_v15, %v80_v14  ;;  %v3010_v23 = vpack.c.bf16 %v65_v51, %v64_v19  ;;  %v3013_v28 = vpack.c.bf16 %v79_v25, %v78_v24  ;;  %v74_v39 = vld [vmem:[#allocation2 + $0x130] sm:$0xff]  ;;  %v75_v40 = vld [vmem:[#allocation2 + $0x138] sm:$0xff]  ;;  %v72_v45 = vld [vmem:[#allocation2 + $0x120] sm:$0xff] }
 0x337   :  { %497 = vmatpush.bf16.msra.mxu3 %v3002_v6  ;;  %484 = vmatpush.bf16.msrb.mxu2 %v3004_v18  ;;  %v3016_v30 = vpack.c.bf16 %v63_v27, %v62_v26  ;;  %v3019_v35 = vpack.c.bf16 %v77_v33, %v76_v32  ;;  %v3023_v38 = vpack.c.bf16 %v61_v37, %v60_v36  ;;  %v58_v43 = vld [vmem:[#allocation2 + $0xb0] sm:$0xff]  ;;  %v73_v55 = vld [vmem:[#allocation2 + $0x128] sm:$0xff]  ;;  %v71_v61 = vld [vmem:[#allocation2 + $0x118] sm:$0xff]  ;;  %v418_v36 = vrot.slane %v2955_v58, 7 }
 0x338   :  { %v3025_v42 = vpack.c.bf16 %v75_v40, %v74_v39  ;;  %v57_v57 = vld [vmem:[#allocation2 + $0xa8] sm:$0xff]  ;;  %v70_v60 = vld [vmem:[#allocation2 + $0x110] sm:$0xff]  ;;  %v55_v3 = vld [vmem:[#allocation2 + $0x98] sm:$0xff] }
 0x339   :  { %v3037_v62 = vpack.c.bf16 %v71_v61, %v70_v60  ;;  %v68_v5 = vld [vmem:[#allocation2 + $0x100] sm:$0xff]  ;;  %v69_v9 = vld [vmem:[#allocation2 + $0x108] sm:$0xff]  ;;  %v774_v27 = vld [vmem:[#allocation2 + $0x210] sm:$0xff] }
 0x33a   :  { %v3043_v14 = vpack.c.bf16 %v69_v9, %v68_v5  ;;  %v776_v15 = vld [vmem:[#allocation2 + $0x220] sm:$0xff]  ;;  %v777_v19 = vld [vmem:[#allocation2 + $0x228] sm:$0xff]  ;;  %v775_v32 = vld [vmem:[#allocation2 + $0x218] sm:$0xff] }
 0x33b   :  { %2611 = vrot.lane.b32.xlu0 %v2610_v44, %s2803_s27  ;;  %498 = vmatpush.bf16.msra.mxu3 %v3007_v21  ;;  %v59_v44 = vld [vmem:[#allocation2 + $0xb8] sm:$0xff]  ;;  %3732 = vst [vmem:[#allocation10_spill] sm:$0xff] %v3037_v62  ;;  %v3046_v51 = vpack.c.bf16 %v777_v19, %v776_v15  ;;  %v52_v24 = vld [vmem:[#allocation2 + $0x80] sm:$0xff]  ;;  %v53_v25 = vld [vmem:[#allocation2 + $0x88] sm:$0xff]  ;;  %v3053_v33 = vpack.c.bf16 %v775_v32, %v774_v27 }
 0x33c   :  { %485 = vmatpush.bf16.msrb.mxu2 %v3010_v23  ;;  %v3029_v53 = vpack.c.bf16 %v59_v44, %v58_v43  ;;  %3733 = vst [vmem:[#allocation11_spill] sm:$0xff] %v3043_v14  ;;  %v3050_v26 = vpack.c.bf16 %v53_v25, %v52_v24 }
 0x33d   :  { %2621 = vrot.lane.b32.xlu2 %v2620_v4, %s2799_s23  ;;  %2616 = vrot.lane.b32.xlu1 %v2615_v56, %s2804_s28  ;;  %v3031_v4 = vpack.c.bf16 %v73_v55, %v72_v45  ;;  %v56_v56 = vld [vmem:[#allocation2 + $0xa0] sm:$0xff]  ;;  %v419_v45 = vsel %vm372_vm5, %v418_v36, %v2945_v54 }
 0x33e   :  { %v3035_v59 = vpack.c.bf16 %v57_v57, %v56_v56 }
 0x33f   :  { %499 = vmatpush.bf16.msra.mxu3 %v3013_v28  ;;  %3731 = vst [vmem:[#allocation9_spill] sm:$0xff] %v3031_v4 }
 0x340   :  { %486 = vmatpush.bf16.msrb.mxu2 %v3016_v30 }
 0x343   :  { %2626 = vrot.lane.b32.xlu0 %v2625_v63, %s2805_s29  ;;  %500 = vmatpush.bf16.msra.mxu3 %v3019_v35  ;;  %v54_v63 = vld [vmem:[#allocation2 + $0x90] sm:$0xff] }
 0x344   :  { %487 = vmatpush.bf16.msrb.mxu2 %v3023_v38  ;;  %v3041_v52 = vpack.c.bf16 %v55_v3, %v54_v63 }
 0x347   :  { %501 = vmatpush.bf16.msra.mxu3 %v3025_v42 }
 0x348   :  { %488 = vmatpush.bf16.msrb.mxu2 %v3029_v53 }
 0x34b   :  { %502 = vmatpush.bf16.msra.mxu3 %v3031_v4 }
 0x34c   :  { %489 = vmatpush.bf16.msrb.mxu2 %v3035_v59 }
 0x34f   :  { %503 = vmatpush.bf16.msra.mxu3 %v3037_v62 }
 0x350   :  { %490 = vmatpush.bf16.msrb.mxu2 %v3041_v52 }
 0x353   :  { %504 = vmatpush.bf16.msra.mxu3 %v3043_v14 }
 0x354   :  { %491 = vmatpush.bf16.msrb.mxu2 %v3050_v26 }
 0x357   :  { %2560 = vmatpush.bf16.msrb.mxu3 %v3046_v51 }
 0x35b   :  { %2561 = vmatpush.bf16.msrb.mxu3 %v3053_v33 }
 0x38f   :  { %v2607_v44 = vpop.permute.xlu2 %2606 }
 0x390   :  { %v2609_v3 = vunpack.i.h.bf16 %v2607_v44  ;;  %v2608_v5 = vunpack.i.l.bf16 %v2607_v44 }
 0x397   :  { %v2622_v36 = vpop.permute.xlu2 %2621 }
 0x3a5   :  { %v2597_v37 = vpop.permute.xlu0 %2596 }
 0x3a6   :  { %v2599_v39 = vunpack.i.h.bf16 %v2597_v37  ;;  %v2598_v40 = vunpack.i.l.bf16 %v2597_v37 }
 0x3a7   :  { %v2602_v43 = vpop.permute.xlu1 %2601 }
 0x3a8   :  { %v2604_v55 = vunpack.i.h.bf16 %v2602_v43  ;;  %v2603_v56 = vunpack.i.l.bf16 %v2602_v43  ;;  %v463_v57 = vsel %vm462_vm6, %v2949_v2, %v2598_v40  ;;  %v475_v60 = vsel %vm462_vm6, %v419_v45, %v2599_v39 }
 0x3a9   :  { %v2624_v40 = vunpack.i.h.bf16 %v2622_v36  ;;  %v2623_v43 = vunpack.i.l.bf16 %v2622_v36  ;;  %v142_v45 = vsub.f32 %v2830_v0, %v2879_v29  ;;  %v3083_v0 = vpack.c.bf16 %v2936_v49, %v2932_v48 }
 0x3aa   :  { %v464_v61 = vsel %vm114_vm0, %v463_v57, %v2603_v56  ;;  %v476_v58 = vsel %vm114_vm0, %v475_v60, %v2604_v55  ;;  %v143_v55 = vsub.f32 %v2835_v1, %v2882_v34 }
 0x3ab   :  { %v466_v54 = vsel %vm465_vm7, %v464_v61, %v2608_v5  ;;  %v477_v24 = vsel %vm465_vm7, %v476_v58, %v2609_v3 }
 0x3ad   :  { %v2612_v63 = vpop.permute.xlu0 %2611 }
 0x3ae   :  { %v2614_v9 = vunpack.i.h.bf16 %v2612_v63  ;;  %v2613_v15 = vunpack.i.l.bf16 %v2612_v63 }
 0x3af   :  { %v2617_v19 = vpop.permute.xlu1 %2616 }
 0x3b0   :  { %v2619_v25 = vunpack.i.h.bf16 %v2617_v19  ;;  %v2618_v2 = vunpack.i.l.bf16 %v2617_v19  ;;  %v468_v27 = vsel %vm3705_vm8, %v466_v54, %v2613_v15  ;;  %v478_v32 = vsel %vm3705_vm8, %v477_v24, %v2614_v9 }
 0x3b1   :  { %v3078_v9 = vpack.c.bf16 %v143_v55, %v142_v45 }
 0x3b2   :  { %v470_v37 = vsel %vm3704_vm9, %v468_v27, %v2618_v2  ;;  %v479_v39 = vsel %vm3704_vm9, %v478_v32, %v2619_v25  ;;  %v100_v2 = vlaneseq }
 0x3b3   :  { %v480_v60 = vsel %vm3703_vm10, %v479_v39, %v2624_v40  ;;  %v472_v61 = vsel %vm3703_vm10, %v470_v37, %v2623_v43 }
 0x3b4   :  { %v101_v27 = vand.u32 127, %v100_v2  ;;  %v104_v48 = vshrl.u32 %v100_v2, 7 }
 0x3b5   :  { %v2627_v44 = vpop.permute.xlu0 %2626 }
 0x3b6   :  { %v2629_v56 = vunpack.i.h.bf16 %v2627_v44  ;;  %v2628_v57 = vunpack.i.l.bf16 %v2627_v44  ;;  %v3089_v32 = vcvt.s32.f32 %v101_v27 }
 0x3b8   :  { %v481_v58 = vsel %vm3702_vm11, %v480_v60, %v2629_v56  ;;  %v474_v63 = vsel %vm3702_vm11, %v472_v61, %v2628_v57  ;;  %3734 = vst [vmem:[#allocation12_spill] sm:$0xff] %v3089_v32 }
 0x3b9   :  { %v483_v3 = vpack.c.bf16 %v481_v58, %v481_v58  ;;  %v482_v5 = vpack.c.bf16 %v474_v63, %v474_v63 }
 0x3bb   :  { %492 = vmatmul.bf16.vlgmr.msrb.gmra.mxu2 %v482_v5  ;;  %505 = vmatmul.bf16.vlgmr.msra.gmra.mxu3 %v483_v3 }
 0x3bc   :  { %999 = vmatpush.bf16.msra.mxu3 %v3078_v9 }
 0x3c0   :  { %1000 = vmatpush.bf16.msra.mxu3 %v3083_v0 }
 0x43e   :  { %v493_v1 = vpop.f32.mrf.mxu2  ;;  %v506_v15 = vpop.f32.mrf.mxu3 }
 0x43f   :  { %v507_v19 = vadd.f32 %v506_v15, %v493_v1  ;;  %v3104_v1 = vcvt.s32.f32 %v104_v48 }
 0x441   :  { %v511_v54 = vsel %vm3701_vm12, %v507_v19, -inf  ;;  %3735 = vst [vmem:[#allocation13_spill] sm:$0xff] %v3104_v1 }
 0x442   :  { %512 = vmax.xlane.f32.xlu1 %v511_v54 }
 0x446   :  { %v495_v24 = vpop.f32.mrf.mxu2  ;;  %v508_v25 = vpop.f32.mrf.mxu3 }
 0x447   :  { %v3110_v24 = vadd.f32 16.0, %v3089_v32 }
 0x449   :  { %3737 = vst [vmem:[#allocation15_spill] sm:$0xff] %v3110_v24 }
 0x45b   :  { %633 = vrot.lane.b32.xlu1 %v2912_v31, %s2803_s27  ;;  %v2635_v31 = vpack.i.bf16 %v143_v55, %v142_v45  ;;  %v105_v45 = vadd.s32 8, %v104_v48 }
 0x4b5   :  { %v513_v36 = vpop.xlane.xlu1 %512 }
 0x4b6   :  { %vm514_vm13 = vcmp.ge.f32.partialorder %v507_v19, %v513_v36  ;;  %v529_v63 = vsub.f32 %v513_v36, %v513_v36 }
 0x4b7   :  { %v515_v37 = vsel %vm514_vm13, %v3089_v32, 16.0 }
 0x4b8   :  { %v516_v39 = vsel %vm3701_vm12, %v515_v37, inf  ;;  %v530_v5 = vmul.f32 1.442695, %v529_v63 }
 0x4b9   :  { %517 = vmin.xlane.f32.xlu2 %v516_v39  ;;  %v3707_v39 = vmov 0.0  }
 0x4cd   :  { %v634_v40 = vpop.permute.xlu1 %633 }
 0x4ce   :  { %646 = vmatpush.bf16.msra.mxu0 %v634_v40 }
 0x52c   :  { %v518_v43 = vpop.xlane.xlu2 %517 }
 0x52d   :  { %vm519_vm14 = vcmp.eq.f32.partialorder %v3089_v32, %v518_v43  ;;  %v538_v15 = vperm.slane %v518_v43, 0  ;;  %v539_v54 = vperm.slane %v518_v43, 1 }
 0x52e   :  { %v520_v44 = vsel %vm519_vm14, -1e+30, %v507_v19  ;;  %v3106_v19 = vcvt.s32.f32 %v105_v45  ;;  %v739_v45 = vld [vmem:[#allocation2 + $0x200] sm:$0xff] }
 0x52f   :  { %v521_v56 = vsel %vm3701_vm12, %v520_v44, -inf  ;;  %v544_v2 = vadd.f32 %v539_v54, %v3104_v1 }
 0x530   :  { %522 = vmax.xlane.f32.xlu0 %v521_v56  ;;  %3736 = vst [vmem:[#allocation14_spill] sm:$0xff] %v3106_v19  ;;  %v543_v25 = vadd.f32 %v538_v15, %v3106_v19  ;;  %v545_v27 = vadd.f32 %v539_v54, %v3106_v19 }
 0x531   :  { %vm557_vm9 = vcmp.eq.f32.partialorder %v544_v2, %v3110_v24 }
 0x532   :  { %vm547_vm14 = vcmp.eq.f32.partialorder %v543_v25, %v3089_v32  ;;  %vm556_vm10 = vcmp.eq.f32.partialorder %v543_v25, %v3110_v24  ;;  %vm558_vm8 = vcmp.eq.f32.partialorder %v545_v27, %v3110_v24 }
 0x533   :  { %v551_v43 = vsel %vm547_vm14, 1.0, %v3707_v39 }
 0x544   :  { %2631 = vrot.lane.b32.xlu0 %v2630_v50, %s2798_s0 }
 0x54c   :  { %2636 = vrot.lane.b32.xlu0 %v2635_v31, %s2798_s0 }
 0x5a3   :  { %v523_v57 = vpop.xlane.xlu0 %522 }
 0x5a4   :  { %vm524_vm15 = vcmp.ge.f32.partialorder %v520_v44, %v523_v57  ;;  %v532_v58 = vsub.f32 %v523_v57, %v513_v36  ;;  %v560_v57 = vsel %vm556_vm10, 1.0, %v3707_v39 }
 0x5a5   :  { %v525_v60 = vsel %vm524_vm15, %v3089_v32, 16.0  ;;  %vm548_vm15 = vcmp.eq.f32.partialorder %v544_v2, %v3089_v32 }
 0x5a6   :  { %v526_v61 = vsel %vm3701_vm12, %v525_v60, inf  ;;  %v533_v3 = vmul.f32 1.442695, %v532_v58  ;;  %vm549_vm12 = vcmp.eq.f32.partialorder %v545_v27, %v3089_v32  ;;  %v552_v44 = vsel %vm548_vm15, 1.0, %v3707_v39 }
 0x5a7   :  { %527 = vmin.xlane.f32.xlu2 %v526_v61  ;;  %v553_v31 = vsel %vm549_vm12, 1.0, %v3707_v39  ;;  %v561_v60 = vsel %vm557_vm9, 1.0, %v3707_v39  ;;  %v562_v61 = vsel %vm558_vm8, 1.0, %v3707_v39 }
 0x5a8   :  { %2733 = vpow2.f32 %v533_v3  ;;  %v565_v54 = vadd.f32 %v561_v60, %v552_v44  ;;  %v738_v60 = vld [vmem:[#allocation2 + $0x1f8] sm:$0xff] }
 0x5a9   :  { %2735 = vpow2.f32 %v530_v5 }
 0x5ae   :  { %v2734_v49 = vpop.eup %2733 }
 0x5af   :  { %v2736_v50 = vpop.eup %2735 }
 0x5b0   :  { %v535_v55 = vadd.f32 %v2736_v50, %v2734_v49 }
 0x5b2   :  { %2737 = vrcp.f32 %v535_v55  ;;  %v740_v55 = vld [vmem:[#allocation2 + $0x208] sm:$0xff] }
 0x5b8   :  { %v2738_v36 = vpop.eup %2737 }
 0x5b9   :  { %v567_v37 = vmul.f32 %v2738_v36, %v2736_v50  ;;  %v610_v58 = vmul.f32 %v2738_v36, %v2734_v49 }
 0x5bb   :  { %v569_v63 = vperm.slane %v567_v37, 0  ;;  %v570_v25 = vperm.slane %v567_v37, 1  ;;  %v612_v36 = vperm.slane %v610_v58, 0  ;;  %v613_v47 = vperm.slane %v610_v58, 1 }
 0x5bc   :  { %v3738_v37 = vmov 0.0  }
 0x5bf   :  { %658 = vrot.lane.b32.xlu2 %v2916_v41, %s2803_s27  ;;  %v542_v41 = vadd.f32 %v538_v15, %v3104_v1  ;;  %v564_v15 = vadd.f32 %v560_v57, %v551_v43  ;;  %v737_v57 = vld [vmem:[#allocation2 + $0x1f0] sm:$0xff] }
 0x5c1   :  { %vm546_vm13 = vcmp.eq.f32.partialorder %v542_v41, %v3089_v32  ;;  %vm555_vm11 = vcmp.eq.f32.partialorder %v542_v41, %v3110_v24  ;;  %v566_v41 = vadd.f32 %v562_v61, %v553_v31 }
 0x5c2   :  { %v550_v40 = vsel %vm546_vm13, 1.0, %v3707_v39  ;;  %v559_v56 = vsel %vm555_vm11, 1.0, %v3707_v39 }
 0x5c3   :  { %v563_v5 = vadd.f32 %v559_v56, %v550_v40  ;;  %v744_v40 = vpack.c.bf16 %v740_v55, %v739_v45  ;;  %v576_v29 = vmul.f32 %v570_v25, %v566_v41 }
 0x5c5   :  { %v573_v49 = vmul.f32 %v569_v63, %v563_v5 }
 0x61a   :  { %v528_v3 = vpop.xlane.xlu2 %527 }
 0x61b   :  { %v582_v48 = vperm.slane %v528_v3, 0  ;;  %v583_v50 = vperm.slane %v528_v3, 1 }
 0x61d   :  { %v586_v2 = vadd.f32 %v582_v48, %v3104_v1  ;;  %v587_v27 = vadd.f32 %v582_v48, %v3106_v19  ;;  %v588_v34 = vadd.f32 %v583_v50, %v3104_v1  ;;  %v589_v39 = vadd.f32 %v583_v50, %v3106_v19 }
 0x61f   :  { %vm590_vm8 = vcmp.eq.f32.partialorder %v586_v2, %v3089_v32  ;;  %vm591_vm9 = vcmp.eq.f32.partialorder %v587_v27, %v3089_v32  ;;  %vm592_vm10 = vcmp.eq.f32.partialorder %v588_v34, %v3089_v32  ;;  %vm593_vm11 = vcmp.eq.f32.partialorder %v589_v39, %v3089_v32 }
 0x620   :  { %v594_v43 = vsel %vm590_vm8, 1.0, %v3738_v37  ;;  %v595_v44 = vsel %vm591_vm9, 1.0, %v3738_v37  ;;  %v596_v56 = vsel %vm592_vm10, 1.0, %v3738_v37  ;;  %v597_v31 = vsel %vm593_vm11, 1.0, %v3738_v37 }
 0x621   :  { %vm598_vm12 = vcmp.eq.f32.partialorder %v586_v2, %v3110_v24  ;;  %vm599_vm13 = vcmp.eq.f32.partialorder %v587_v27, %v3110_v24  ;;  %vm600_vm14 = vcmp.eq.f32.partialorder %v588_v34, %v3110_v24  ;;  %vm601_vm15 = vcmp.eq.f32.partialorder %v589_v39, %v3110_v24 }
 0x622   :  { %v602_v61 = vsel %vm598_vm12, 1.0, %v3738_v37  ;;  %v603_v58 = vsel %vm599_vm13, 1.0, %v3738_v37  ;;  %v604_v3 = vsel %vm600_vm14, 1.0, %v3738_v37  ;;  %v605_v5 = vsel %vm601_vm15, 1.0, %v3738_v37  ;;  %v659_v48 = vpop.permute.xlu2 %658 }
 0x623   :  { %v606_v50 = vadd.f32 %v602_v61, %v594_v43  ;;  %v607_v45 = vadd.f32 %v603_v58, %v595_v44  ;;  %v608_v55 = vadd.f32 %v604_v3, %v596_v56  ;;  %v609_v2 = vadd.f32 %v605_v5, %v597_v31  ;;  %671 = vmatpush.bf16.msrb.mxu1 %v659_v48 }
 0x624   :  { %v574_v27 = vmul.f32 %v569_v63, %v564_v15  ;;  %v575_v34 = vmul.f32 %v570_v25, %v565_v54  ;;  %v743_v39 = vpack.c.bf16 %v738_v60, %v737_v57 }
 0x625   :  { %v616_v46 = vmul.f32 %v612_v36, %v606_v50  ;;  %v617_v24 = vmul.f32 %v612_v36, %v607_v45  ;;  %v618_v19 = vmul.f32 %v613_v47, %v608_v55  ;;  %v619_v1 = vmul.f32 %v613_v47, %v609_v2 }
 0x627   :  { %757 = vmatpush.bf16.msra.mxu1 %v744_v40  ;;  %v620_v32 = vadd.f32 %v616_v46, %v573_v49  ;;  %v621_v14 = vadd.f32 %v617_v24, %v574_v27  ;;  %v622_v62 = vadd.f32 %v618_v19, %v575_v34  ;;  %v623_v4 = vadd.f32 %v619_v1, %v576_v29  ;;  %v278_v29 = vld [vmem:[#allocation2 + $0x1d8] sm:$0xff]  ;;  %v279_v46 = vld [vmem:[#allocation2 + $0x1e0] sm:$0xff]  ;;  %v2721_v40 = vld [vmem:[#allocation2 + $0x1e8] ss:$0 sm:$0xff] }
 0x628   :  { %v681_v47 = vpack.c.bf16 %v279_v46, %v278_v29 }
 0x629   :  { %v624_v37 = vpack.c.bf16 %v620_v32, %v620_v32  ;;  %v625_v43 = vpack.c.bf16 %v621_v14, %v621_v14  ;;  %v626_v44 = vpack.c.bf16 %v622_v62, %v622_v62  ;;  %v627_v56 = vpack.c.bf16 %v623_v4, %v623_v4  ;;  %v276_v62 = vld [vmem:[#allocation2 + $0x1c8] sm:$0xff]  ;;  %v277_v4 = vld [vmem:[#allocation2 + $0x1d0] sm:$0xff] }
 0x62a   :  { %695 = vmatpush.bf16.msra.mxu2 %v681_v47  ;;  %v680_v14 = vpack.c.bf16 %v277_v4, %v276_v62  ;;  %v970_v4 = vld [vmem:[#allocation2 + $0x190] sm:$0xff] }
 0x62b   :  { %758 = vmatpush.bf16.msra.mxu1 %v743_v39  ;;  %v630_v31 = vunpack.c.l.b16 %v624_v37  ;;  %v631_v61 = vunpack.c.l.b16 %v625_v43  ;;  %v655_v63 = vunpack.c.l.b16 %v626_v44  ;;  %v656_v15 = vunpack.c.l.b16 %v627_v56 }
 0x62d   :  { %v632_v54 = vpack.c.b16 %v631_v61, %v630_v31  ;;  %v657_v41 = vpack.c.b16 %v656_v15, %v655_v63 }
 0x62e   :  { %696 = vmatpush.bf16.msra.mxu2 %v680_v14  ;;  %v971_v14 = vld [vmem:[#allocation2 + $0x198] sm:$0xf] }
 0x62f   :  { %2500 = vmatmul.msk.bf16.vlgmr.msra.gmra.mxu0 %vm462_vm6, %v632_v54  ;;  %2501 = vmatmul.msk.bf16.vlgmr.msrb.gmra.mxu1 %vm462_vm6, %v657_v41 }
 0x630   :  { %980 = vmatpush.bf16.msrb.mxu1 %v3078_v9 }
 0x632   :  { %794 = vmatpush.bf16.msrb.mxu2 %v3046_v51 }
 0x634   :  { %981 = vmatpush.bf16.msrb.mxu1 %v3083_v0 }
 0x636   :  { %795 = vmatpush.bf16.msrb.mxu2 %v3053_v33 }
 0x6ac   :  { %v648_v32 = vpop.f32.mrf.mxu0  ;;  %v673_v9 = vpop.f32.mrf.mxu1 }
 0x6b4   :  { %v650_v1 = vpop.f32.mrf.mxu0  ;;  %v675_v24 = vpop.f32.mrf.mxu1 }
 0x6b5   :  { %v678_v19 = vpack.c.bf16 %v650_v1, %v648_v32  ;;  %v679_v0 = vpack.c.bf16 %v675_v24, %v673_v9  ;;  %v1054_v24 = vpack.c.bf16 %v971_v14, %v970_v4 }
 0x6b7   :  { %2502 = vmatmul.msk.bf16.vlgmr.msra.gmra.mxu2 %vm114_vm0, %v678_v19 }
 0x6c7   :  { %2503 = vmatmul.msk.bf16.gmra.mxu2 %vm114_vm0, %v679_v0 }
 0x73a   :  { %v698_v25 = vpop.f32.mrf.mxu2 }
 0x73b   :  { %v699_v58 = vadd.f32 %v2721_v40, %v698_v25 }
 0x73d   :  { %v708_v50 = vadd.f32 %v699_v58, %v2894_v7 }
 0x742   :  { %v700_v49 = vpop.f32.mrf.mxu2 }
 0x743   :  { %v701_v60 = vadd.f32 %v2721_v40, %v700_v49 }
 0x745   :  { %v709_v5 = vadd.f32 %v701_v60, %v2896_v8 }
 0x747   :  { %v712_v45 = vpack.c.bf16 %v709_v5, %v708_v50 }
 0x74a   :  { %v703_v36 = vpop.f32.mrf.mxu2 }
 0x74b   :  { %v704_v37 = vadd.f32 %v2721_v40, %v703_v36  ;;  %v1062_v36 = vsel %vm248_vm1, %v1054_v24, 0 }
 0x74d   :  { %v710_v33 = vadd.f32 %v704_v37, %v2901_v12 }
 0x752   :  { %v705_v57 = vpop.f32.mrf.mxu2 }
 0x753   :  { %v706_v51 = vadd.f32 %v2721_v40, %v705_v57 }
 0x755   :  { %v711_v3 = vadd.f32 %v706_v51, %v2903_v13 }
 0x757   :  { %v713_v48 = vpack.c.bf16 %v711_v3, %v710_v33 }
 0x759   :  { %720 = vmatpush.bf16.msrb.mxu0 %v713_v48  ;;  %v2632_v48 = vpop.permute.xlu0 %2631 }
 0x75d   :  { %721 = vmatpush.bf16.msrb.mxu0 %v712_v45  ;;  %v2633_v45 = vunpack.i.l.bf16 %v2632_v48 }
 0x760   :  { %2504 = vmatmul.msk.bf16.vlgmr.msrb.gmra.mxu0 %vm114_vm0, %v2908_v22 }
 0x770   :  { %2505 = vmatmul.msk.bf16.gmra.mxu0 %vm114_vm0, %v2853_v11 }
 0x7dd   :  { %v723_v55 = vpop.f32.mrf.mxu0 }
 0x7de   :  { %v733_v27 = vsub.f32 %v708_v50, %v723_v55  ;;  %v2634_v50 = vunpack.i.h.bf16 %v2632_v48 }
 0x7e5   :  { %v725_v2 = vpop.f32.mrf.mxu0 }
 0x7e6   :  { %v734_v12 = vsub.f32 %v709_v5, %v725_v2 }
 0x7e8   :  { %v741_v34 = vpack.c.bf16 %v734_v12, %v733_v27 }
 0x7ea   :  { %2506 = vmatmul.msk.bf16.vlgmr.msra.gmra.mxu1 %vm114_vm0, %v741_v34 }
 0x7ed   :  { %v728_v8 = vpop.f32.mrf.mxu0 }
 0x7ee   :  { %v735_v39 = vsub.f32 %v710_v33, %v728_v8 }
 0x7f5   :  { %v730_v13 = vpop.f32.mrf.mxu0 }
 0x7f6   :  { %v736_v7 = vsub.f32 %v711_v3, %v730_v13 }
 0x7f8   :  { %v742_v43 = vpack.c.bf16 %v736_v7, %v735_v39 }
 0x7fa   :  { %2507 = vmatmul.msk.bf16.gmra.mxu1 %vm114_vm0, %v742_v43 }
 0x80a   :  { %2514 = vmatmul.msk.bf16.vlgmr.msrb.gmra.mxu1 %vm114_vm0, %v2861_v17 }
 0x81a   :  { %2515 = vmatmul.msk.bf16.gmra.mxu1 %vm114_vm0, %v2867_v20 }
 0x867   :  { %v760_v44 = vpop.f32.mrf.mxu1 }
 0x868   :  { %v770_v31 = vmax.f32 %v760_v44, 0.0 }
 0x86f   :  { %v762_v56 = vpop.f32.mrf.mxu1 }
 0x870   :  { %v771_v61 = vmax.f32 %v762_v56, 0.0  ;;  %v2637_v56 = vpop.permute.xlu0 %2636 }
 0x872   :  { %v778_v63 = vpack.c.bf16 %v771_v61, %v770_v31 }
 0x874   :  { %2508 = vmatmul.msk.bf16.vlgmr.msrb.gmra.mxu2 %vm114_vm0, %v778_v63 }
 0x877   :  { %v765_v15 = vpop.f32.mrf.mxu1 }
 0x878   :  { %v772_v41 = vmax.f32 %v765_v15, 0.0 }
 0x87f   :  { %v767_v54 = vpop.f32.mrf.mxu1 }
 0x880   :  { %v773_v29 = vmax.f32 %v767_v54, 0.0 }
 0x882   :  { %v779_v46 = vpack.c.bf16 %v773_v29, %v772_v41  ;;  %v2639_v41 = vunpack.i.h.bf16 %v2637_v56  ;;  %v2638_v29 = vunpack.i.l.bf16 %v2637_v56 }
 0x884   :  { %2509 = vmatmul.msk.bf16.vlgmr.msrb.gmra.mxu3 %vm114_vm0, %v779_v46 }
 0x887   :  { %v983_v3 = vpop.f32.mrf.mxu1 }
 0x88f   :  { %v985_v5 = vpop.f32.mrf.mxu1 }
 0x890   :  { %v1045_v34 = vsel %vm228_vm2, %v985_v5, %v2634_v50 }
 0x894   :  { %2516 = vmatmul.msk.bf16.vlgmr.msra.gmra.mxu3 %vm114_vm0, %v2851_v10 }
 0x897   :  { %v988_v8 = vpop.f32.mrf.mxu1 }
 0x898   :  { %v1046_v46 = vsel %vm228_vm2, %v988_v8, %v2638_v29 }
 0x89f   :  { %v990_v61 = vpop.f32.mrf.mxu1 }
 0x8a4   :  { %2517 = vmatmul.msk.bf16.gmra.mxu3 %vm114_vm0, %v2859_v16 }
 0x8f7   :  { %v797_v47 = vpop.f32.mrf.mxu2 }
 0x8f8   :  { %v807_v49 = vadd.f32 %v797_v47, %v733_v27  ;;  %v1047_v47 = vsel %vm228_vm2, %v990_v61, %v2639_v41 }
 0x8ff   :  { %v799_v32 = vpop.f32.mrf.mxu2 }
 0x900   :  { %v3183_v0 = vadd.f32 %v799_v32, %v734_v12  ;;  %v1044_v12 = vsel %vm228_vm2, %v983_v3, %v2633_v45 }
 0x902   :  { %v811_v40 = vpack.c.bf16 %v3183_v0, %v807_v49 }
 0x907   :  { %v802_v62 = vpop.f32.mrf.mxu3 }
 0x908   :  { %v3179_v19 = vadd.f32 %v802_v62, %v735_v39 }
 0x90f   :  { %v804_v1 = vpop.f32.mrf.mxu3 }
 0x910   :  { %v3181_v9 = vadd.f32 %v804_v1, %v736_v7 }
 0x912   :  { %v812_v25 = vpack.c.bf16 %v3181_v9, %v3179_v19 }
 0x914   :  { %819 = vmatpush.bf16.msra.mxu2 %v812_v25 }
 0x917   :  { %v1002_v37 = vpop.f32.mrf.mxu3 }
 0x918   :  { %820 = vmatpush.bf16.msra.mxu2 %v811_v40 }
 0x91b   :  { %2510 = vmatmul.msk.bf16.vlgmr.msra.gmra.mxu2 %vm114_vm0, %v2908_v22 }
 0x91c   :  { %1071 = vmatpush.bf16.msrb.mxu2 %v1062_v36 }
 0x91f   :  { %v1004_v57 = vpop.f32.mrf.mxu3 }
 0x920   :  { %1289 = vmatpush.bf16.msra.mxu2 %v3004_v18  ;;  %v2640_v60 = vpack.i.bf16 %v1004_v57, %v1002_v37 }
 0x922   :  { %2641 = vrot.lane.b32.xlu1 %v2640_v60, %s2797_s15  ;;  %v2807_v60 = vmov 32.0  }
 0x923   :  { %2739 = vrcp.f32 %v2807_v60 }
 0x924   :  { %1290 = vmatpush.bf16.msra.mxu2 %v3010_v23 }
 0x927   :  { %v1007_v51 = vpop.f32.mrf.mxu3 }
 0x928   :  { %1291 = vmatpush.bf16.msra.mxu2 %v3016_v30 }
 0x92b   :  { %2511 = vmatmul.msk.bf16.gmra.mxu2 %vm114_vm0, %v2853_v11 }
 0x92c   :  { %1292 = vmatpush.bf16.msra.mxu2 %v3023_v38 }
 0x92f   :  { %v1009_v58 = vpop.f32.mrf.mxu3 }
 0x930   :  { %1293 = vmatpush.bf16.msra.mxu2 %v3029_v53  ;;  %v2645_v33 = vpack.i.bf16 %v1009_v58, %v1007_v51  ;;  %v2740_v51 = vpop.eup %2739 }
 0x931   :  { %v851_v58 = vmul.f32 32.0, %v2740_v51  ;;  %vm855_vm1 = vweird.f32 %v2740_v51 }
 0x932   :  { %2646 = vrot.lane.b32.xlu2 %v2645_v33, %s2797_s15 }
 0x933   :  { %v852_v33 = vsub.f32 1.0, %v851_v58 }
 0x934   :  { %1294 = vmatpush.bf16.msra.mxu2 %v3035_v59 }
 0x938   :  { %1295 = vmatpush.bf16.msra.mxu2 %v3041_v52 }
 0x93c   :  { %1296 = vmatpush.bf16.msra.mxu2 %v3050_v26 }
 0x98c   :  { %v2647_v43 = vpop.permute.xlu2 %2646 }
 0x98d   :  { %v2649_v63 = vunpack.i.h.bf16 %v2647_v43  ;;  %v2648_v15 = vunpack.i.l.bf16 %v2647_v43 }
 0x98f   :  { %v1050_v62 = vsel %vm233_vm3, %v1046_v46, %v2648_v15  ;;  %v1051_v4 = vsel %vm233_vm3, %v1047_v47, %v2649_v63 }
 0x990   :  { %v1053_v32 = vpack.c.bf16 %v1051_v4, %v1050_v62 }
 0x994   :  { %v2642_v55 = vpop.permute.xlu1 %2641 }
 0x995   :  { %v2644_v2 = vunpack.i.h.bf16 %v2642_v55  ;;  %v2643_v27 = vunpack.i.l.bf16 %v2642_v55 }
 0x997   :  { %v1048_v13 = vsel %vm233_vm3, %v1044_v12, %v2643_v27  ;;  %v1049_v39 = vsel %vm233_vm3, %v1045_v34, %v2644_v2 }
 0x998   :  { %v1052_v7 = vpack.c.bf16 %v1049_v39, %v1048_v13 }
 0x99a   :  { %2518 = vmatmul.msk.bf16.vlgmr.msrb.gmra.mxu2 %vm241_vm4, %v1052_v7 }
 0x99e   :  { %v822_v44 = vpop.f32.mrf.mxu2 }
 0x99f   :  { %v832_v31 = vsub.f32 %v807_v49, %v822_v44 }
 0x9a1   :  { %v838_v54 = vsel %vm114_vm0, %v832_v31, 0.0 }
 0x9a2   :  { %839 = vadd.xlane.f32.xlu2 %v838_v54 }
 0x9a6   :  { %v824_v14 = vpop.f32.mrf.mxu2 }
 0x9a7   :  { %v833_v49 = vsub.f32 %v3183_v0, %v824_v14 }
 0x9a9   :  { %v841_v57 = vsel %vm114_vm0, %v833_v49, 0.0 }
 0x9aa   :  { %2519 = vmatmul.msk.bf16.gmra.mxu2 %vm241_vm4, %v1053_v32 }
 0x9ae   :  { %v827_v1 = vpop.f32.mrf.mxu2 }
 0x9af   :  { %v834_v24 = vsub.f32 %v3179_v19, %v827_v1  ;;  %v853_v19 = vmul.f32 %v2740_v51, %v852_v33 }
 0x9b1   :  { %v844_v25 = vsel %vm114_vm0, %v834_v24, 0.0  ;;  %v854_v3 = vadd.f32 %v2740_v51, %v853_v19 }
 0x9b2   :  { %845 = vadd.xlane.f32.xlu1 %v844_v25 }
 0x9b3   :  { %v3220_v5 = vsel %vm855_vm1, %v2740_v51, %v854_v3 }
 0x9b6   :  { %v829_v36 = vpop.f32.mrf.mxu2 }
 0x9b7   :  { %v835_v40 = vsub.f32 %v3181_v9, %v829_v36 }
 0x9b9   :  { %v847_v37 = vsel %vm114_vm0, %v835_v40, 0.0 }
 0x9ba   :  { %848 = vadd.xlane.f32.xlu0 %v847_v37  ;;  %842 = vadd.xlane.f32.xlu1 %v841_v57 }
 0xa15   :  { %v840_v0 = vpop.xlane.xlu2 %839 }
 0xa16   :  { %v857_v48 = vmul.f32 %v3220_v5, %v840_v0 }
 0xa18   :  { %v3223_v9 = vsub.f32 %v832_v31, %v857_v48 }
 0xa1a   :  { %v865_v50 = vmul.f32 %v3223_v9, %v3223_v9 }
 0xa1c   :  { %v869_v45 = vsel %vm114_vm0, %v865_v50, 0.0 }
 0xa1d   :  { %870 = vadd.xlane.f32.xlu1 %v869_v45 }
 0xa25   :  { %v846_v55 = vpop.xlane.xlu1 %845 }
 0xa26   :  { %v859_v2 = vmul.f32 %v3220_v5, %v846_v55 }
 0xa28   :  { %v3229_v27 = vsub.f32 %v834_v24, %v859_v2 }
 0xa2a   :  { %v867_v12 = vmul.f32 %v3229_v27, %v3229_v27 }
 0xa2c   :  { %v875_v34 = vsel %vm114_vm0, %v867_v12, 0.0 }
 0xa2d   :  { %v849_v8 = vpop.xlane.xlu0 %848  ;;  %876 = vadd.xlane.f32.xlu0 %v875_v34  ;;  %v843_v13 = vpop.xlane.xlu1 %842 }
 0xa2e   :  { %v860_v39 = vmul.f32 %v3220_v5, %v849_v8  ;;  %v858_v7 = vmul.f32 %v3220_v5, %v843_v13 }
 0xa30   :  { %v3236_v43 = vsub.f32 %v835_v40, %v860_v39  ;;  %v3238_v44 = vsub.f32 %v833_v49, %v858_v7 }
 0xa32   :  { %v866_v56 = vmul.f32 %v3238_v44, %v3238_v44  ;;  %v868_v31 = vmul.f32 %v3236_v43, %v3236_v43 }
 0xa34   :  { %v872_v61 = vsel %vm114_vm0, %v866_v56, 0.0  ;;  %v878_v63 = vsel %vm114_vm0, %v868_v31, 0.0 }
 0xa35   :  { %873 = vadd.xlane.f32.xlu0 %v872_v61  ;;  %879 = vadd.xlane.f32.xlu2 %v878_v63 }
 0xa90   :  { %v871_v15 = vpop.xlane.xlu1 %870 }
 0xa91   :  { %v881_v54 = vmul.f32 %v871_v15, %v3220_v5  ;;  %v2722_v15 = vld [vmem:[#allocation2 + $0x230] ss:$0 sm:$0xff] }
 0xa93   :  { %v885_v41 = vadd.f32 1e-05, %v881_v54 }
 0xa95   :  { %2741 = vrsqrt.f32 %v885_v41  ;;  %vm895_vm11 = vweird.f32 %v885_v41 }
 0xa9b   :  { %v2742_v62 = vpop.eup %2741 }
 0xa9c   :  { %v890_v32 = vmul.f32 %v2742_v62, %v885_v41  ;;  %vm896_vm9 = vweird.f32 %v2742_v62 }
 0xa9d   :  { %vm897_vm13 = vmor %vm895_vm11, %vm896_vm9  ;;  %vm3744_vm9 = vcmask 785408  }
 0xa9e   :  { %v891_v37 = vmul.f32 %v2742_v62, %v890_v32 }
 0xaa0   :  { %v877_v29 = vpop.xlane.xlu0 %876  ;;  %v892_v51 = vmul.f32 0.5, %v891_v37  ;;  %v46_v37 = vld [vmem:[#allocation2 + $0x60] sm:$0xff] }
 0xaa1   :  { %v883_v46 = vmul.f32 %v877_v29, %v3220_v5 }
 0xaa2   :  { %v893_v0 = vsub.f32 1.5, %v892_v51  ;;  %v1084_v51 = vld [vmem:[#allocation2 + $0x248] sm:$0xff] }
 0xaa3   :  { %v887_v47 = vadd.f32 1e-05, %v883_v46 }
 0xaa4   :  { %v894_v12 = vmul.f32 %v2742_v62, %v893_v0  ;;  %v3263_v0 = vpop.f32.mrf.mxu2 }
 0xaa5   :  { %2743 = vrsqrt.f32 %v887_v47  ;;  %vm915_vm4 = vweird.f32 %v887_v47 }
 0xaa6   :  { %v898_v31 = vsel %vm897_vm13, %v2742_v62, %v894_v12  ;;  %vm3748_vm13 = vmmov %vm3744_vm9 }
 0xaa7   :  { %v929_v46 = vmul.f32 %v898_v31, %v3223_v9  ;;  %v1083_v9 = vld [vmem:[#allocation2 + $0x240] sm:$0xff] }
 0xaa8   :  { %v874_v4 = vpop.xlane.xlu0 %873  ;;  %v880_v14 = vpop.xlane.xlu2 %879 }
 0xaa9   :  { %v882_v1 = vmul.f32 %v874_v4, %v3220_v5  ;;  %v884_v24 = vmul.f32 %v880_v14, %v3220_v5  ;;  %v2723_v14 = vld [vmem:[#allocation2 + $0x238] ss:$0 sm:$0xff]  ;;  %v934_v62 = vmul.f32 %v2722_v15, %v929_v46 }
 0xaab   :  { %v2744_v25 = vpop.eup %2743  ;;  %v886_v49 = vadd.f32 1e-05, %v882_v1  ;;  %v888_v36 = vadd.f32 1e-05, %v884_v24 }
 0xaac   :  { %v910_v40 = vmul.f32 %v2744_v25, %v887_v47  ;;  %vm916_vm3 = vweird.f32 %v2744_v25 }
 0xaad   :  { %2745 = vrsqrt.f32 %v886_v49  ;;  %vm917_vm8 = vmor %vm915_vm4, %vm916_vm3  ;;  %vm905_vm14 = vweird.f32 %v886_v49  ;;  %vm925_vm1 = vweird.f32 %v888_v36  ;;  %vm3742_vm4 = vcmask 523264  }
 0xaae   :  { %v911_v57 = vmul.f32 %v2744_v25, %v910_v40  ;;  %2747 = vrsqrt.f32 %v888_v36  ;;  %v939_v40 = vadd.f32 %v2723_v14, %v934_v62  ;;  %vm3746_vm11 = vmmov %vm3742_vm4 }
 0xab0   :  { %v912_v60 = vmul.f32 0.5, %v911_v57 }
 0xab2   :  { %v913_v58 = vsub.f32 1.5, %v912_v60 }
 0xab3   :  { %v2746_v33 = vpop.eup %2745 }
 0xab4   :  { %v2748_v19 = vpop.eup %2747  ;;  %v900_v3 = vmul.f32 %v2746_v33, %v886_v49  ;;  %v914_v48 = vmul.f32 %v2744_v25, %v913_v58  ;;  %vm906_vm10 = vweird.f32 %v2746_v33  ;;  %v1085_v49 = vld [vmem:[#allocation2 + $0x250] sm:$0xff]  ;;  %v1095_v58 = vpack.c.bf16 %v1084_v51, %v1083_v9 }
 0xab5   :  { %v920_v50 = vmul.f32 %v2748_v19, %v888_v36  ;;  %vm926_vm12 = vweird.f32 %v2748_v19  ;;  %vm907_vm15 = vmor %vm905_vm14, %vm906_vm10  ;;  %v1086_v36 = vld [vmem:[#allocation2 + $0x258] sm:$0xff]  ;;  %vm3745_vm10 = vcmask 916480  }
 0xab6   :  { %v901_v45 = vmul.f32 %v2746_v33, %v900_v3  ;;  %v918_v34 = vsel %vm917_vm8, %v2744_v25, %v914_v48  ;;  %vm927_vm3 = vmor %vm925_vm1, %vm926_vm12  ;;  %v1096_v57 = vpack.c.bf16 %v1086_v36, %v1085_v49  ;;  %v3269_v48 = vpop.f32.mrf.mxu2  ;;  %vm3743_vm8 = vcmask 654336  }
 0xab7   :  { %v921_v55 = vmul.f32 %v2748_v19, %v920_v50  ;;  %v931_v7 = vmul.f32 %v918_v34, %v3229_v27  ;;  %v3739_v50 = vld [vmem:[#allocation9_spill] sm:$0xff]  ;;  %vm3747_vm12 = vmmov %vm3743_vm8 }
 0xab8   :  { %v902_v2 = vmul.f32 0.5, %v901_v45  ;;  %v3740_v45 = vld [vmem:[#allocation10_spill] sm:$0xff]  ;;  %vm3749_vm14 = vmmov %vm3745_vm10 }
 0xab9   :  { %v922_v8 = vmul.f32 0.5, %v921_v55  ;;  %v936_v47 = vmul.f32 %v2722_v15, %v931_v7  ;;  %v1093_v55 = vpack.c.bf16 %v3269_v48, %v3263_v0 }
 0xaba   :  { %v903_v13 = vsub.f32 1.5, %v902_v2  ;;  %v3741_v2 = vld [vmem:[#allocation11_spill] sm:$0xff] }
 0xabb   :  { %v923_v39 = vsub.f32 1.5, %v922_v8  ;;  %v941_v32 = vadd.f32 %v2723_v14, %v936_v47 }
 0xabc   :  { %v904_v56 = vmul.f32 %v2746_v33, %v903_v13 }
 0xabd   :  { %v924_v61 = vmul.f32 %v2748_v19, %v923_v39 }
 0xabe   :  { %v908_v63 = vsel %vm907_vm15, %v2746_v33, %v904_v56  ;;  %v48_v33 = vld [vmem:[#allocation2 + $0x70] sm:$0xff]  ;;  %v3277_v12 = vpop.f32.mrf.mxu2  ;;  %vm3750_vm15 = vcmask 123904  }
 0xabf   :  { %v930_v54 = vmul.f32 %v908_v63, %v3238_v44  ;;  %v928_v29 = vsel %vm927_vm3, %v2748_v19, %v924_v61  ;;  %v47_v44 = vld [vmem:[#allocation2 + $0x68] sm:$0xff]  ;;  %v49_v19 = vld [vmem:[#allocation2 + $0x78] sm:$0xff]  ;;  %v2724_v61 = vld [vmem:[#allocation2 + $0x260] ss:$0 sm:$0xff] }
 0xac0   :  { %v932_v41 = vmul.f32 %v928_v29, %v3236_v43  ;;  %v3254_v43 = vpack.c.bf16 %v47_v44, %v46_v37  ;;  %v3261_v3 = vpack.c.bf16 %v49_v19, %v48_v33  ;;  %vm3752_vm3 = vmmov %vm3750_vm15 }
 0xac1   :  { %v935_v27 = vmul.f32 %v2722_v15, %v930_v54 }
 0xac2   :  { %v937_v4 = vmul.f32 %v2722_v15, %v932_v41 }
 0xac3   :  { %v940_v25 = vadd.f32 %v2723_v14, %v935_v27 }
 0xac4   :  { %v942_v1 = vadd.f32 %v2723_v14, %v937_v4 }
 0xac5   :  { %v943_v60 = vpack.c.bf16 %v940_v25, %v939_v40 }
 0xac6   :  { %v944_v24 = vpack.c.bf16 %v942_v1, %v941_v32  ;;  %v3279_v34 = vpop.f32.mrf.mxu2 }
 0xac7   :  { %v1094_v8 = vpack.c.bf16 %v3279_v34, %v3277_v12 }
 0xac8   :  { %957 = vmatpush.bf16.msra.mxu0 %v944_v24 }
 0xacc   :  { %958 = vmatpush.bf16.msra.mxu0 %v943_v60 }
 0xacf   :  { %2512 = vmatmul.msk.bf16.vlgmr.msra.gmra.mxu0 %vm114_vm0, %v3254_v43 }
 0xad0   :  { %1110 = vmatpush.bf16.msrb.mxu0 %v1096_v57 }
 0xad4   :  { %1111 = vmatpush.bf16.msrb.mxu0 %v1095_v58 }
 0xad8   :  { %1302 = vmatpush.bf16.msra.mxu0 %v3002_v6 }
 0xadc   :  { %1303 = vmatpush.bf16.msra.mxu0 %v3007_v21 }
 0xadf   :  { %2513 = vmatmul.msk.bf16.gmra.mxu0 %vm114_vm0, %v3261_v3 }
 0xae0   :  { %1304 = vmatpush.bf16.msra.mxu0 %v3013_v28 }
 0xae4   :  { %1305 = vmatpush.bf16.msra.mxu0 %v3019_v35 }
 0xae8   :  { %1306 = vmatpush.bf16.msra.mxu0 %v3025_v42 }
 0xaec   :  { %1307 = vmatpush.bf16.msra.mxu0 %v3739_v50 }
 0xaef   :  { %2520 = vmatmul.msk.bf16.vlgmr.msrb.gmra.mxu0 %vm114_vm0, %v1093_v55 }
 0xaf0   :  { %1308 = vmatpush.bf16.msra.mxu0 %v3740_v45 }
 0xaf4   :  { %1309 = vmatpush.bf16.msra.mxu0 %v3741_v2 }
 0xaff   :  { %2521 = vmatmul.msk.bf16.gmra.mxu0 %vm114_vm0, %v1094_v8 }
 0xb4c   :  { %v3284_v13 = vpop.f32.mrf.mxu0 }
 0xb54   :  { %v3286_v39 = vpop.f32.mrf.mxu0 }
 0xb5c   :  { %v3288_v7 = vpop.f32.mrf.mxu0 }
 0xb64   :  { %v3290_v56 = vpop.f32.mrf.mxu0 }
 0xb6c   :  { %v1113_v31 = vpop.f32.mrf.mxu0 }
 0xb6d   :  { %v1114_v63 = vadd.f32 %v2724_v61, %v1113_v31 }
 0xb6f   :  { %v1123_v54 = vpack.c.bf16 %v1114_v63, %v1114_v63 }
 0xb71   :  { %v1129_v41 = vunpack.c.l.b16 %v1123_v54 }
 0xb74   :  { %v1115_v15 = vpop.f32.mrf.mxu0 }
 0xb75   :  { %v1116_v29 = vadd.f32 %v2724_v61, %v1115_v15 }
 0xb77   :  { %v1124_v46 = vpack.c.bf16 %v1116_v29, %v1116_v29 }
 0xb79   :  { %v1130_v47 = vunpack.c.l.b16 %v1124_v46 }
 0xb7b   :  { %v3292_v4 = vpack.c.b16 %v1130_v47, %v1129_v41 }
 0xb7c   :  { %v1118_v14 = vpop.f32.mrf.mxu0 }
 0xb7d   :  { %1132 = vrot.lane.b32.xlu1 %v3292_v4, %s2799_s23  ;;  %v1119_v27 = vadd.f32 %v2724_v61, %v1118_v14 }
 0xb7f   :  { %v1125_v1 = vpack.c.bf16 %v1119_v27, %v1119_v27 }
 0xb81   :  { %v1156_v25 = vunpack.c.l.b16 %v1125_v1 }
 0xb84   :  { %v1120_v32 = vpop.f32.mrf.mxu0 }
 0xb85   :  { %v1121_v62 = vadd.f32 %v2724_v61, %v1120_v32 }
 0xb87   :  { %v1126_v24 = vpack.c.bf16 %v1121_v62, %v1121_v62 }
 0xb89   :  { %v1157_v49 = vunpack.c.l.b16 %v1126_v24 }
 0xb8b   :  { %v3296_v36 = vpack.c.b16 %v1157_v49, %v1156_v25 }
 0xb8d   :  { %1159 = vrot.lane.b32.xlu2 %v3296_v36, %s2799_s23 }
 0xbe7   :  { %v1160_v40 = vpop.permute.xlu2 %1159 }
 0xbe8   :  { %v1165_v37 = vsel %vm114_vm0, %v1160_v40, 0 }
 0xbe9   :  { %1174 = vmatpush.bf16.xpose.msrb.mxu3 %v1165_v37 }
 0xbef   :  { %v1133_v44 = vpop.permute.xlu1 %1132 }
 0xbf0   :  { %v1138_v57 = vsel %vm114_vm0, %v1133_v44, 0  ;;  %2523 = vmatmul.msk.bf16.vlgmr.msrb.gmra.mxu3 %vm114_vm0, %v3296_v36 }
 0xbf1   :  { %1147 = vmatpush.bf16.xpose.msra.mxu1 %v1138_v57 }
 0xbf8   :  { %2522 = vmatmul.msk.bf16.vlgmr.msra.gmra.mxu1 %vm114_vm0, %v3292_v4 }
 0xc73   :  { %v1176_v60 = vpop.f32.mrf.mxu3 }
 0xc74   :  { %v1183_v51 = vrot.slane %v1176_v60, 7  ;;  %v1204_v61 = vrot.slane %v1176_v60, 3  ;;  %v1192_v15 = vrot.slane %v1176_v60, 1 }
 0xc75   :  { %v1149_v9 = vpop.f32.mrf.mxu1 }
 0xc76   :  { %v3307_v58 = vsel %vm372_vm5, %v1183_v51, %v1149_v9  ;;  %v1203_v19 = vrot.slane %v1149_v9, 4  ;;  %v1191_v55 = vrot.slane %v1149_v9, 2  ;;  %v1186_v8 = vrot.slane %v1149_v9, 1 }
 0xc77   :  { %v1209_v44 = vrot.slane %v1149_v9, 5  ;;  %v1197_v51 = vrot.slane %v1149_v9, 3 }
 0xc78   :  { %v1205_v47 = vsel %vm372_vm5, %v1204_v61, %v1203_v19  ;;  %v1193_v14 = vsel %vm372_vm5, %v1192_v15, %v1191_v55  ;;  %v1187_v1 = vsel %vm372_vm5, %v1176_v60, %v1186_v8  ;;  %v1221_v55 = vrot.slane %v1149_v9, 7 }
 0xc79   :  { %v1210_v8 = vrot.slane %v1176_v60, 4 }
 0xc7b   :  { %v3309_v33 = vpop.f32.mrf.mxu3 }
 0xc7c   :  { %v1250_v63 = vrot.slane %v3309_v33, 3  ;;  %v1238_v46 = vrot.slane %v3309_v33, 1  ;;  %v1256_v57 = vrot.slane %v3309_v33, 4  ;;  %v1244_v19 = vrot.slane %v3309_v33, 2 }
 0xc7d   :  { %v3311_v31 = vpop.f32.mrf.mxu1 }
 0xc7e   :  { %v1249_v54 = vrot.slane %v3311_v31, 4  ;;  %v1237_v29 = vrot.slane %v3311_v31, 2  ;;  %v1232_v41 = vrot.slane %v3311_v31, 1  ;;  %v1255_v40 = vrot.slane %v3311_v31, 5 }
 0xc7f   :  { %v1243_v37 = vrot.slane %v3311_v31, 3 }
 0xc80   :  { %v1251_v27 = vsel %vm372_vm5, %v1250_v63, %v1249_v54  ;;  %v1239_v32 = vsel %vm372_vm5, %v1238_v46, %v1237_v29  ;;  %v1233_v62 = vsel %vm372_vm5, %v3309_v33, %v1232_v41  ;;  %v1257_v61 = vsel %vm372_vm5, %v1256_v57, %v1255_v40  ;;  %v1545_v57 = vld [vmem:[#allocation2 + $0x2b8] sm:$0xff] }
 0xc81   :  { %v2665_v24 = vpack.i.bf16 %v1251_v27, %v1205_v47  ;;  %v2655_v25 = vpack.i.bf16 %v1239_v32, %v1193_v14  ;;  %v2650_v49 = vpack.i.bf16 %v1233_v62, %v1187_v1  ;;  %v1198_v63 = vrot.slane %v1176_v60, 2 }
 0xc82   :  { %v1245_v15 = vsel %vm372_vm5, %v1244_v19, %v1243_v37  ;;  %v1222_v54 = vrot.slane %v1176_v60, 6  ;;  %v1211_v29 = vsel %vm372_vm5, %v1210_v8, %v1209_v44  ;;  %v1261_v27 = vrot.slane %v3311_v31, 6  ;;  %v1548_v44 = vld [vmem:[#allocation2 + $0x2d0] sm:$0xff] }
 0xc83   :  { %2666 = vrot.lane.b32.xlu1 %v2665_v24, %s2803_s27  ;;  %2656 = vrot.lane.b32.xlu2 %v2655_v25, %s2802_s26  ;;  %v2670_v46 = vpack.i.bf16 %v1257_v61, %v1211_v29  ;;  %v1199_v41 = vsel %vm372_vm5, %v1198_v63, %v1197_v51  ;;  %v1215_v32 = vrot.slane %v1149_v9, 6  ;;  %v1262_v1 = vrot.slane %v3309_v33, 5  ;;  %v1547_v9 = vld [vmem:[#allocation2 + $0x2c8] sm:$0xff]  ;;  %v1546_v51 = vld [vmem:[#allocation2 + $0x2c0] sm:$0xff] }
 0xc84   :  { %2651 = vrot.lane.b32.xlu0 %v2650_v49, %s2800_s24  ;;  %v1223_v47 = vsel %vm372_vm5, %v1222_v54, %v1221_v55  ;;  %v2660_v14 = vpack.i.bf16 %v1245_v15, %v1199_v41  ;;  %v1216_v62 = vrot.slane %v1176_v60, 5  ;;  %v1267_v49 = vrot.slane %v3311_v31, 7 }
 0xc85   :  { %v1263_v24 = vsel %vm372_vm5, %v1262_v1, %v1261_v27  ;;  %v1268_v40 = vrot.slane %v3309_v33, 6  ;;  %v1588_v60 = vpack.c.bf16 %v1548_v44, %v1547_v9  ;;  %v1587_v19 = vpack.c.bf16 %v1546_v51, %v1545_v57 }
 0xc86   :  { %v1217_v25 = vsel %vm372_vm5, %v1216_v62, %v1215_v32  ;;  %v1229_v63 = vrot.slane %v3309_v33, 7 }
 0xc87   :  { %v1269_v37 = vsel %vm372_vm5, %v1268_v40, %v1267_v49  ;;  %1602 = vmatpush.bf16.msrb.mxu0 %v1588_v60 }
 0xc8b   :  { %1224 = vrot.lane.b32.xlu1 %v1223_v47, %s2805_s29  ;;  %2671 = vrot.lane.b32.xlu2 %v2670_v46, %s2804_s28 }
 0xc8c   :  { %2661 = vrot.lane.b32.xlu0 %v2660_v14, %s2801_s25  ;;  %1603 = vmatpush.bf16.msrb.mxu0 %v1587_v19  ;;  %v1230_v14 = vsel %vm372_vm5, %v1229_v63, %v3311_v31 }
 0xc93   :  { %1264 = vrot.lane.b32.xlu2 %v1263_v24, %s2799_s23 }
 0xc94   :  { %1218 = vrot.lane.b32.xlu0 %v1217_v25, %s2799_s23 }
 0xc9c   :  { %1270 = vrot.lane.b32.xlu0 %v1269_v37, %s2805_s29 }
 0xcdd   :  { %v2657_v8 = vpop.permute.xlu2 %2656 }
 0xcde   :  { %v2658_v46 = vunpack.i.l.bf16 %v2657_v8  ;;  %v2659_v25 = vunpack.i.h.bf16 %v2657_v8 }
 0xce5   :  { %v2672_v32 = vpop.permute.xlu2 %2671 }
 0xce6   :  { %v2673_v40 = vunpack.i.l.bf16 %v2672_v32 }
 0xced   :  { %v1265_v63 = vpop.permute.xlu2 %1264 }
 0xcf5   :  { %v2667_v15 = vpop.permute.xlu1 %2666 }
 0xcf6   :  { %v2652_v55 = vpop.permute.xlu0 %2651  ;;  %v2668_v1 = vunpack.i.l.bf16 %v2667_v15  ;;  %v2669_v9 = vunpack.i.h.bf16 %v2667_v15 }
 0xcf7   :  { %v2653_v61 = vunpack.i.l.bf16 %v2652_v55  ;;  %v2654_v54 = vunpack.i.h.bf16 %v2652_v55  ;;  %v2674_v55 = vunpack.i.h.bf16 %v2672_v32 }
 0xcf9   :  { %v1273_v29 = vsel %vm462_vm6, %v3307_v58, %v2653_v61  ;;  %v1280_v62 = vsel %vm462_vm6, %v1230_v14, %v2654_v54 }
 0xcfa   :  { %v1274_v27 = vsel %vm114_vm0, %v1273_v29, %v2658_v46  ;;  %v1281_v58 = vsel %vm114_vm0, %v1280_v62, %v2659_v25 }
 0xcfd   :  { %v1225_v57 = vpop.permute.xlu1 %1224 }
 0xcfe   :  { %v2662_v41 = vpop.permute.xlu0 %2661 }
 0xcff   :  { %v2663_v47 = vunpack.i.l.bf16 %v2662_v41  ;;  %v2664_v24 = vunpack.i.h.bf16 %v2662_v41  ;;  %v1585_v41 = vpack.c.bf16 %v3286_v39, %v3284_v13 }
 0xd01   :  { %v1275_v33 = vsel %vm465_vm7, %v1274_v27, %v2663_v47  ;;  %v1282_v37 = vsel %vm465_vm7, %v1281_v58, %v2664_v24 }
 0xd02   :  { %v1276_v49 = vsel %vm3742_vm4, %v1275_v33, %v2668_v1  ;;  %v1283_v19 = vsel %vm3746_vm11, %v1282_v37, %v2669_v9  ;;  %v3755_v9 = vld [vmem:[#allocation13_spill] sm:$0xff] }
 0xd03   :  { %v1277_v31 = vsel %vm3743_vm8, %v1276_v49, %v2673_v40  ;;  %v1284_v61 = vsel %vm3747_vm12, %v1283_v19, %v2674_v55  ;;  %vm3753_vm8 = vmmov %vm3752_vm3  ;;  %v3757_v19 = vld [vmem:[#allocation15_spill] sm:$0xff]  ;;  %v3758_v55 = vmov 0.0  }
 0xd04   :  { %v1285_v29 = vsel %vm3748_vm13, %v1284_v61, %v1265_v63 }
 0xd06   :  { %v1219_v44 = vpop.permute.xlu0 %1218 }
 0xd07   :  { %v1278_v60 = vsel %vm3744_vm9, %v1277_v31, %v1219_v44 }
 0xd08   :  { %v1279_v51 = vsel %vm3745_vm10, %v1278_v60, %v1225_v57  ;;  %vm3754_vm10 = vmmov %vm3752_vm3 }
 0xd09   :  { %v1287_v8 = vpack.c.bf16 %v1279_v51, %v1279_v51 }
 0xd0b   :  { %1297 = vmatmul.bf16.vlgmr.msra.gmra.mxu2 %v1287_v8 }
 0xd0e   :  { %v1271_v54 = vpop.permute.xlu0 %1270 }
 0xd0f   :  { %v1286_v15 = vsel %vm3749_vm14, %v1285_v29, %v1271_v54 }
 0xd10   :  { %v1288_v46 = vpack.c.bf16 %v1286_v15, %v1286_v15 }
 0xd12   :  { %1310 = vmatmul.bf16.vlgmr.msra.gmra.mxu0 %v1288_v46 }
 0xd13   :  { %1804 = vmatpush.bf16.msra.mxu0 %v3002_v6  ;;  %v1586_v6 = vpack.c.bf16 %v3290_v56, %v3288_v7 }
 0xd17   :  { %1805 = vmatpush.bf16.msra.mxu0 %v3007_v21 }
 0xd1b   :  { %1806 = vmatpush.bf16.msra.mxu0 %v3013_v28 }
 0xd1f   :  { %1807 = vmatpush.bf16.msra.mxu0 %v3019_v35 }
 0xd22   :  { %2532 = vmatmul.msk.bf16.vlgmr.msrb.gmra.mxu0 %vm114_vm0, %v1585_v41 }
 0xd23   :  { %1808 = vmatpush.bf16.msra.mxu0 %v3025_v42 }
 0xd27   :  { %1809 = vmatpush.bf16.msra.mxu0 %v3739_v50  ;;  %v3751_v50 = vld [vmem:[#allocation12_spill] sm:$0xff] }
 0xd2b   :  { %1810 = vmatpush.bf16.msra.mxu0 %v3740_v45 }
 0xd2f   :  { %1811 = vmatpush.bf16.msra.mxu0 %v3741_v2 }
 0xd32   :  { %2533 = vmatmul.msk.bf16.gmra.mxu0 %vm114_vm0, %v1586_v6 }
 0xd8e   :  { %v1298_v21 = vpop.f32.mrf.mxu2 }
 0xd8f   :  { %v1311_v28 = vpop.f32.mrf.mxu0 }
 0xd90   :  { %v1312_v35 = vadd.f32 %v1311_v28, %v1298_v21 }
 0xd92   :  { %v1315_v13 = vsel %vm3750_vm15, %v1312_v35, -inf }
 0xd93   :  { %1316 = vmax.xlane.f32.xlu1 %v1315_v13 }
 0xd96   :  { %v1300_v39 = vpop.f32.mrf.mxu2 }
 0xd97   :  { %v1313_v47 = vpop.f32.mrf.mxu0 }
 0xe06   :  { %v1317_v42 = vpop.xlane.xlu1 %1316 }
 0xe07   :  { %vm1318_vm1 = vcmp.ge.f32.partialorder %v1312_v35, %v1317_v42  ;;  %v1333_v32 = vsub.f32 %v1317_v42, %v1317_v42 }
 0xe08   :  { %v1319_v14 = vsel %vm1318_vm1, %v3751_v50, 16.0 }
 0xe09   :  { %v1320_v45 = vsel %vm3752_vm3, %v1319_v14, inf  ;;  %v1334_v1 = vmul.f32 1.442695, %v1333_v32  ;;  %v1091_v32 = vld [vmem:[#allocation2 + $0x280] sm:$0xff] }
 0xe0a   :  { %1321 = vmin.xlane.f32.xlu2 %v1320_v45 }
 0xe0b   :  { %2749 = vpow2.f32 %v1334_v1 }
 0xe11   :  { %v2750_v58 = vpop.eup %2749 }
 0xe22   :  { %1436 = vrot.lane.b32.xlu2 %v3292_v4, %s2803_s27 }
 0xe7d   :  { %v1322_v2 = vpop.xlane.xlu2 %1321 }
 0xe7e   :  { %vm1323_vm4 = vcmp.eq.f32.partialorder %v3751_v50, %v1322_v2  ;;  %v1342_v49 = vperm.slane %v1322_v2, 0  ;;  %v1343_v40 = vperm.slane %v1322_v2, 1 }
 0xe7f   :  { %v1324_v7 = vsel %vm1323_vm4, -1e+30, %v1312_v35 }
 0xe80   :  { %v1325_v56 = vsel %vm3753_vm8, %v1324_v7, -inf  ;;  %v1346_v44 = vadd.f32 %v1342_v49, %v3755_v9  ;;  %v1348_v60 = vadd.f32 %v1343_v40, %v3755_v9 }
 0xe81   :  { %1326 = vmax.xlane.f32.xlu0 %v1325_v56 }
 0xe82   :  { %vm1350_vm11 = vcmp.eq.f32.partialorder %v1346_v44, %v3751_v50  ;;  %vm1358_vm13 = vcmp.eq.f32.partialorder %v1346_v44, %v3757_v19  ;;  %vm1352_vm15 = vcmp.eq.f32.partialorder %v1348_v60, %v3751_v50  ;;  %vm1360_vm3 = vcmp.eq.f32.partialorder %v1348_v60, %v3757_v19 }
 0xe83   :  { %v1354_v8 = vsel %vm1350_vm11, 1.0, %v3758_v55  ;;  %v1362_v63 = vsel %vm1358_vm13, 1.0, %v3758_v55  ;;  %v1356_v46 = vsel %vm1352_vm15, 1.0, %v3758_v55  ;;  %v1364_v6 = vsel %vm1360_vm3, 1.0, %v3758_v55 }
 0xe84   :  { %v1366_v35 = vadd.f32 %v1362_v63, %v1354_v8  ;;  %v1368_v39 = vadd.f32 %v1364_v6, %v1356_v46  ;;  %vm3760_vm3 = vcmask 654336  }
 0xe85   :  { %v1437_v27 = vpop.permute.xlu2 %1436 }
 0xe86   :  { %1449 = vmatpush.bf16.msrb.mxu1 %v1437_v27  ;;  %v1090_v27 = vld [vmem:[#allocation2 + $0x278] sm:$0xff] }
 0xe87   :  { %v1484_v1 = vpack.c.bf16 %v1091_v32, %v1090_v27 }
 0xe8a   :  { %1498 = vmatpush.bf16.msra.mxu1 %v1484_v1 }
 0xe95   :  { %1461 = vrot.lane.b32.xlu0 %v3296_v36, %s2803_s27  ;;  %v3756_v36 = vld [vmem:[#allocation14_spill] sm:$0xff] }
 0xe96   :  { %v1347_v31 = vadd.f32 %v1342_v49, %v3756_v36  ;;  %v1349_v51 = vadd.f32 %v1343_v40, %v3756_v36  ;;  %v3413_v49 = vld [vmem:[#allocation2 + $0x2d8] ss:$0 sm:$0xff] }
 0xe98   :  { %vm1351_vm12 = vcmp.eq.f32.partialorder %v1347_v31, %v3751_v50  ;;  %vm1359_vm14 = vcmp.eq.f32.partialorder %v1347_v31, %v3757_v19  ;;  %vm1353_vm1 = vcmp.eq.f32.partialorder %v1349_v51, %v3751_v50  ;;  %vm1361_vm4 = vcmp.eq.f32.partialorder %v1349_v51, %v3757_v19 }
 0xe99   :  { %v1355_v61 = vsel %vm1351_vm12, 1.0, %v3758_v55  ;;  %v1363_v54 = vsel %vm1359_vm14, 1.0, %v3758_v55  ;;  %v1357_v41 = vsel %vm1353_vm1, 1.0, %v3758_v55  ;;  %v1365_v21 = vsel %vm1361_vm4, 1.0, %v3758_v55 }
 0xe9a   :  { %v1367_v13 = vadd.f32 %v1363_v54, %v1355_v61  ;;  %v1369_v47 = vadd.f32 %v1365_v21, %v1357_v41  ;;  %vm3759_vm1 = vcmask 523264  }
 0xe9b   :  { %vm3761_vm4 = vmmov %vm3759_vm1 }
 0xef4   :  { %v1327_v62 = vpop.xlane.xlu0 %1326 }
 0xef5   :  { %vm1328_vm9 = vcmp.ge.f32.partialorder %v1324_v7, %v1327_v62  ;;  %v1336_v24 = vsub.f32 %v1327_v62, %v1317_v42  ;;  %v1088_v62 = vld [vmem:[#allocation2 + $0x268] sm:$0xff] }
 0xef6   :  { %v1329_v33 = vsel %vm1328_vm9, %v3751_v50, 16.0 }
 0xef7   :  { %v1337_v4 = vmul.f32 1.442695, %v1336_v24  ;;  %v1330_v25 = vsel %vm3754_vm10, %v1329_v33, inf  ;;  %v1089_v24 = vld [vmem:[#allocation2 + $0x270] sm:$0xff] }
 0xef8   :  { %1331 = vmin.xlane.f32.xlu1 %v1330_v25  ;;  %v1483_v33 = vpack.c.bf16 %v1089_v24, %v1088_v62 }
 0xef9   :  { %2751 = vpow2.f32 %v1337_v4  ;;  %v1605_v4 = vpop.f32.mrf.mxu0 }
 0xefa   :  { %1499 = vmatpush.bf16.msra.mxu1 %v1483_v33  ;;  %v1606_v63 = vadd.f32 %v3413_v49, %v1605_v4 }
 0xefc   :  { %v1619_v27 = vpack.c.bf16 %v1606_v63, %v1606_v63 }
 0xeff   :  { %v2752_v37 = vpop.eup %2751 }
 0xf00   :  { %v1339_v57 = vadd.f32 %v2752_v37, %v2750_v58 }
 0xf01   :  { %v1607_v25 = vpop.f32.mrf.mxu0 }
 0xf02   :  { %2753 = vrcp.f32 %v1339_v57  ;;  %v1608_v40 = vadd.f32 %v3413_v49, %v1607_v25 }
 0xf04   :  { %v1620_v54 = vpack.c.bf16 %v1608_v40, %v1608_v40 }
 0xf06   :  { %v1631_v33 = vunpack.c.l.b16 %v1620_v54 }
 0xf07   :  { %v1462_v29 = vpop.permute.xlu0 %1461 }
 0xf08   :  { %v2754_v15 = vpop.eup %2753  ;;  %1474 = vmatpush.bf16.msra.mxu3 %v1462_v29 }
 0xf09   :  { %v1370_v28 = vmul.f32 %v2754_v15, %v2750_v58  ;;  %v1413_v58 = vmul.f32 %v2754_v15, %v2752_v37 }
 0xf0b   :  { %v1372_v42 = vperm.slane %v1370_v28, 0  ;;  %v1373_v14 = vperm.slane %v1370_v28, 1  ;;  %v1415_v29 = vperm.slane %v1413_v58, 0  ;;  %v1416_v46 = vperm.slane %v1413_v58, 1 }
 0xf0d   :  { %v1376_v45 = vmul.f32 %v1372_v42, %v1366_v35  ;;  %v1377_v2 = vmul.f32 %v1372_v42, %v1367_v13  ;;  %v1378_v7 = vmul.f32 %v1373_v14, %v1368_v39  ;;  %v1379_v56 = vmul.f32 %v1373_v14, %v1369_v47 }
 0xf6b   :  { %v1332_v44 = vpop.xlane.xlu1 %1331 }
 0xf6c   :  { %v1385_v31 = vperm.slane %v1332_v44, 0  ;;  %v1386_v57 = vperm.slane %v1332_v44, 1  ;;  %v1630_v44 = vunpack.c.l.b16 %v1619_v27 }
 0xf6e   :  { %v1389_v60 = vadd.f32 %v1385_v31, %v3755_v9  ;;  %v1390_v51 = vadd.f32 %v1385_v31, %v3756_v36  ;;  %v1391_v8 = vadd.f32 %v1386_v57, %v3755_v9  ;;  %v1392_v61 = vadd.f32 %v1386_v57, %v3756_v36 }
 0xf70   :  { %vm1393_vm8 = vcmp.eq.f32.partialorder %v1389_v60, %v3751_v50  ;;  %vm1394_vm9 = vcmp.eq.f32.partialorder %v1390_v51, %v3751_v50  ;;  %vm1395_vm10 = vcmp.eq.f32.partialorder %v1391_v8, %v3751_v50  ;;  %vm1396_vm11 = vcmp.eq.f32.partialorder %v1392_v61, %v3751_v50 }
 0xf71   :  { %v1397_v37 = vsel %vm1393_vm8, 1.0, %v3758_v55  ;;  %v1398_v15 = vsel %vm1394_vm9, 1.0, %v3758_v55  ;;  %v1399_v41 = vsel %vm1395_vm10, 1.0, %v3758_v55  ;;  %v1400_v6 = vsel %vm1396_vm11, 1.0, %v3758_v55  ;;  %vm3764_vm10 = vmmov %vm3760_vm3 }
 0xf72   :  { %vm1401_vm12 = vcmp.eq.f32.partialorder %v1389_v60, %v3757_v19  ;;  %vm1402_vm13 = vcmp.eq.f32.partialorder %v1390_v51, %v3757_v19  ;;  %vm1403_vm14 = vcmp.eq.f32.partialorder %v1391_v8, %v3757_v19  ;;  %vm1404_vm15 = vcmp.eq.f32.partialorder %v1392_v61, %v3757_v19 }
 0xf73   :  { %v1405_v21 = vsel %vm1401_vm12, 1.0, %v3758_v55  ;;  %v1406_v28 = vsel %vm1402_vm13, 1.0, %v3758_v55  ;;  %v1407_v35 = vsel %vm1403_vm14, 1.0, %v3758_v55  ;;  %v1408_v13 = vsel %vm1404_vm15, 1.0, %v3758_v55 }
 0xf74   :  { %v1409_v39 = vadd.f32 %v1405_v21, %v1397_v37  ;;  %v1410_v47 = vadd.f32 %v1406_v28, %v1398_v15  ;;  %v1411_v42 = vadd.f32 %v1407_v35, %v1399_v41  ;;  %v1412_v14 = vadd.f32 %v1408_v13, %v1400_v6  ;;  %v1610_v28 = vpop.f32.mrf.mxu0 }
 0xf75   :  { %v3437_v8 = vpack.c.b16 %v1631_v33, %v1630_v44  ;;  %vm3762_vm8 = vcmask 785408   ;;  %vm3763_vm9 = vcmask 916480  }
 0xf76   :  { %v1419_v32 = vmul.f32 %v1415_v29, %v1409_v39  ;;  %v1420_v1 = vmul.f32 %v1415_v29, %v1410_v47  ;;  %v1421_v62 = vmul.f32 %v1416_v46, %v1411_v42  ;;  %v1422_v24 = vmul.f32 %v1416_v46, %v1412_v14  ;;  %v2726_v14 = vld [vmem:[#allocation2 + $0x288] ss:$0 sm:$0xff]  ;;  %vm3765_vm11 = vmmov %vm3762_vm8 }
 0xf77   :  { %v1611_v42 = vadd.f32 %v3413_v49, %v1610_v28  ;;  %vm3766_vm12 = vmmov %vm3763_vm9 }
 0xf78   :  { %v1423_v4 = vadd.f32 %v1419_v32, %v1376_v45  ;;  %v1424_v25 = vadd.f32 %v1420_v1, %v1377_v2  ;;  %v1425_v40 = vadd.f32 %v1421_v62, %v1378_v7  ;;  %v1426_v58 = vadd.f32 %v1422_v24, %v1379_v56 }
 0xf79   :  { %v1637_v45 = vsel %vm114_vm0, %v3437_v8, 0  ;;  %v1621_v62 = vpack.c.bf16 %v1611_v42, %v1611_v42 }
 0xf7a   :  { %v1427_v31 = vpack.c.bf16 %v1423_v4, %v1423_v4  ;;  %v1428_v57 = vpack.c.bf16 %v1424_v25, %v1424_v25  ;;  %v1429_v60 = vpack.c.bf16 %v1425_v40, %v1425_v40  ;;  %v1430_v51 = vpack.c.bf16 %v1426_v58, %v1426_v58 }
 0xf7b   :  { %v1660_v44 = vunpack.c.l.b16 %v1621_v62 }
 0xf7c   :  { %v1433_v61 = vunpack.c.l.b16 %v1427_v31  ;;  %v1434_v37 = vunpack.c.l.b16 %v1428_v57  ;;  %v1458_v15 = vunpack.c.l.b16 %v1429_v60  ;;  %v1459_v63 = vunpack.c.l.b16 %v1430_v51  ;;  %v1612_v13 = vpop.f32.mrf.mxu0 }
 0xf7d   :  { %v1613_v47 = vadd.f32 %v3413_v49, %v1612_v13 }
 0xf7e   :  { %v1435_v41 = vpack.c.b16 %v1434_v37, %v1433_v61  ;;  %v1460_v29 = vpack.c.b16 %v1459_v63, %v1458_v15  ;;  %v1540_v37 = vld [vmem:[#allocation2 + $0x290] sm:$0xff]  ;;  %v1541_v15 = vld [vmem:[#allocation2 + $0x298] sm:$0xff] }
 0xf7f   :  { %v1622_v27 = vpack.c.bf16 %v1613_v47, %v1613_v47 }
 0xf80   :  { %2524 = vmatmul.msk.bf16.vlgmr.msrb.gmra.mxu1 %vm462_vm6, %v1435_v41  ;;  %2525 = vmatmul.msk.bf16.vlgmr.msra.gmra.mxu3 %vm462_vm6, %v1460_v29 }
 0xf81   :  { %1646 = vmatpush.bf16.xpose.msrb.mxu1 %v1637_v45  ;;  %v1661_v4 = vunpack.c.l.b16 %v1622_v27  ;;  %v2727_v45 = vld [vmem:[#allocation2 + $0x2b0] ss:$0 sm:$0xff] }
 0xf83   :  { %v3450_v60 = vpack.c.b16 %v1661_v4, %v1660_v44 }
 0xf85   :  { %v1667_v61 = vsel %vm114_vm0, %v3450_v60, 0 }
 0xffd   :  { %v1451_v2 = vpop.f32.mrf.mxu1 }
0x1003   :  { %v1476_v54 = vpop.f32.mrf.mxu3 }
0x1005   :  { %v1453_v7 = vpop.f32.mrf.mxu1 }
0x1006   :  { %v1481_v56 = vpack.c.bf16 %v1453_v7, %v1451_v2 }
0x1008   :  { %2526 = vmatmul.msk.bf16.vlgmr.msra.gmra.mxu1 %vm114_vm0, %v1481_v56 }
0x100b   :  { %v1478_v46 = vpop.f32.mrf.mxu3 }
0x100c   :  { %v1482_v6 = vpack.c.bf16 %v1478_v46, %v1476_v54 }
0x1018   :  { %2527 = vmatmul.msk.bf16.gmra.mxu1 %vm114_vm0, %v1482_v6 }
0x1085   :  { %v1501_v21 = vpop.f32.mrf.mxu1 }
0x1086   :  { %v1502_v25 = vadd.f32 %v2726_v14, %v1501_v21 }
0x1088   :  { %v1511_v49 = vadd.f32 %v1502_v25, %v3263_v0  ;;  %v1557_v0 = vpack.c.bf16 %v1541_v15, %v1540_v37 }
0x108d   :  { %v1503_v35 = vpop.f32.mrf.mxu1 }
0x108e   :  { %v1504_v24 = vadd.f32 %v2726_v14, %v1503_v35 }
0x1090   :  { %v1512_v31 = vadd.f32 %v1504_v24, %v3269_v48  ;;  %v1543_v48 = vld [vmem:[#allocation2 + $0x2a8] sm:$0xff] }
0x1092   :  { %v1515_v51 = vpack.c.bf16 %v1512_v31, %v1511_v49 }
0x1095   :  { %v1506_v39 = vpop.f32.mrf.mxu1 }
0x1096   :  { %v1507_v32 = vadd.f32 %v2726_v14, %v1506_v39 }
0x1098   :  { %v1513_v40 = vadd.f32 %v1507_v32, %v3277_v12  ;;  %v1542_v12 = vld [vmem:[#allocation2 + $0x2a0] sm:$0xff] }
0x109d   :  { %v1508_v1 = vpop.f32.mrf.mxu1 }
0x109e   :  { %v1509_v33 = vadd.f32 %v2726_v14, %v1508_v1 }
0x10a0   :  { %v1514_v58 = vadd.f32 %v1509_v33, %v3279_v34  ;;  %v1558_v34 = vpack.c.bf16 %v1543_v48, %v1542_v12 }
0x10a2   :  { %v1516_v57 = vpack.c.bf16 %v1514_v58, %v1513_v40  ;;  %1572 = vmatpush.bf16.msrb.mxu3 %v1558_v34 }
0x10a4   :  { %1523 = vmatpush.bf16.msrb.mxu2 %v1516_v57 }
0x10a6   :  { %1573 = vmatpush.bf16.msrb.mxu3 %v1557_v0 }
0x10a8   :  { %1524 = vmatpush.bf16.msrb.mxu2 %v1515_v51 }
0x10aa   :  { %1791 = vmatpush.bf16.msra.mxu3 %v3004_v18 }
0x10ab   :  { %2528 = vmatmul.msk.bf16.vlgmr.msrb.gmra.mxu2 %vm114_vm0, %v2908_v22 }
0x10ac   :  { %1676 = vmatpush.bf16.xpose.msra.mxu2 %v1667_v61 }
0x10ae   :  { %1792 = vmatpush.bf16.msra.mxu3 %v3010_v23 }
0x10b2   :  { %1793 = vmatpush.bf16.msra.mxu3 %v3016_v30 }
0x10b6   :  { %1794 = vmatpush.bf16.msra.mxu3 %v3023_v38 }
0x10ba   :  { %1795 = vmatpush.bf16.msra.mxu3 %v3029_v53 }
0x10bb   :  { %2529 = vmatmul.msk.bf16.gmra.mxu2 %vm114_vm0, %v2853_v11 }
0x10be   :  { %1796 = vmatpush.bf16.msra.mxu3 %v3035_v59 }
0x10c2   :  { %1797 = vmatpush.bf16.msra.mxu3 %v3041_v52 }
0x10c6   :  { %1798 = vmatpush.bf16.msra.mxu3 %v3050_v26 }
0x112e   :  { %v3464_v63 = vpop.f32.mrf.mxu2 }
0x112f   :  { %v3472_v18 = vsub.f32 %v1511_v49, %v3464_v63 }
0x1136   :  { %v3468_v41 = vpop.f32.mrf.mxu2 }
0x1137   :  { %v3475_v23 = vsub.f32 %v1512_v31, %v3468_v41 }
0x1139   :  { %v1555_v30 = vpack.c.bf16 %v3475_v23, %v3472_v18 }
0x113b   :  { %2530 = vmatmul.msk.bf16.vlgmr.msrb.gmra.mxu3 %vm114_vm0, %v1555_v30 }
0x113e   :  { %v3480_v38 = vpop.f32.mrf.mxu2 }
0x113f   :  { %v3485_v59 = vsub.f32 %v1513_v40, %v3480_v38 }
0x1146   :  { %v3482_v53 = vpop.f32.mrf.mxu2 }
0x1147   :  { %v3488_v52 = vsub.f32 %v1514_v58, %v3482_v53 }
0x1149   :  { %v1556_v26 = vpack.c.bf16 %v3488_v52, %v3485_v59 }
0x114b   :  { %2531 = vmatmul.msk.bf16.gmra.mxu3 %vm114_vm0, %v1556_v26 }
0x11be   :  { %v1575_v29 = vpop.f32.mrf.mxu3 }
0x11bf   :  { %v1576_v2 = vadd.f32 %v2727_v45, %v1575_v29 }
0x11c1   :  { %v1615_v56 = vpack.c.bf16 %v1576_v2, %v1576_v2 }
0x11c3   :  { %v1625_v6 = vunpack.c.l.b16 %v1615_v56 }
0x11c6   :  { %v1577_v7 = vpop.f32.mrf.mxu3 }
0x11c7   :  { %v1578_v54 = vadd.f32 %v2727_v45, %v1577_v7 }
0x11c9   :  { %v1616_v46 = vpack.c.bf16 %v1578_v54, %v1578_v54 }
0x11cb   :  { %v1626_v21 = vunpack.c.l.b16 %v1616_v46 }
0x11cd   :  { %v1627_v28 = vpack.c.b16 %v1626_v21, %v1625_v6 }
0x11ce   :  { %v1580_v35 = vpop.f32.mrf.mxu3 }
0x11cf   :  { %2534 = vmatmul.msk.bf16.vlgmr.msrb.gmra.mxu1 %vm114_vm0, %v1627_v28  ;;  %v1581_v13 = vadd.f32 %v2727_v45, %v1580_v35 }
0x11d1   :  { %v1617_v47 = vpack.c.bf16 %v1581_v13, %v1581_v13 }
0x11d3   :  { %v1655_v27 = vunpack.c.l.b16 %v1617_v47 }
0x11d6   :  { %v1582_v39 = vpop.f32.mrf.mxu3 }
0x11d7   :  { %v1583_v42 = vadd.f32 %v2727_v45, %v1582_v39 }
0x11d9   :  { %v1618_v14 = vpack.c.bf16 %v1583_v42, %v1583_v42 }
0x11db   :  { %v1656_v32 = vunpack.c.l.b16 %v1618_v14 }
0x11dd   :  { %v1657_v1 = vpack.c.b16 %v1656_v32, %v1655_v27 }
0x11df   :  { %2535 = vmatmul.msk.bf16.vlgmr.msra.gmra.mxu2 %vm114_vm0, %v1657_v1 }
0x124c   :  { %v1648_v62 = vpop.f32.mrf.mxu1 }
0x124d   :  { %v1688_v58 = vrot.slane %v1648_v62, 1  ;;  %v1699_v49 = vrot.slane %v1648_v62, 3  ;;  %v1693_v61 = vrot.slane %v1648_v62, 2  ;;  %v1705_v21 = vrot.slane %v1648_v62, 4 }
0x124e   :  { %v1711_v42 = vrot.slane %v1648_v62, 5  ;;  %v1717_v32 = vrot.slane %v1648_v62, 6 }
0x1254   :  { %v3495_v4 = vpop.f32.mrf.mxu1 }
0x1255   :  { %v1734_v44 = vrot.slane %v3495_v4, 1  ;;  %v1745_v51 = vrot.slane %v3495_v4, 3  ;;  %v1739_v12 = vrot.slane %v3495_v4, 2  ;;  %v1751_v46 = vrot.slane %v3495_v4, 4 }
0x1256   :  { %v1757_v13 = vrot.slane %v3495_v4, 5 }
0x1262   :  { %v1678_v24 = vpop.f32.mrf.mxu2 }
0x1263   :  { %v1685_v33 = vrot.slane %v1678_v24, 7  ;;  %v1700_v40 = vrot.slane %v1678_v24, 2  ;;  %v1694_v31 = vrot.slane %v1678_v24, 1  ;;  %v1689_v48 = vsel %vm372_vm5, %v1678_v24, %v1688_v58 }
0x1264   :  { %v1706_v54 = vrot.slane %v1678_v24, 3  ;;  %v1712_v35 = vrot.slane %v1678_v24, 4  ;;  %v1718_v47 = vrot.slane %v1678_v24, 5  ;;  %v1724_v58 = vrot.slane %v1678_v24, 6 }
0x1265   :  { %v3498_v25 = vsel %vm372_vm5, %v1685_v33, %v1648_v62  ;;  %v1701_v30 = vsel %vm372_vm5, %v1700_v40, %v1699_v49  ;;  %v1695_v29 = vsel %vm372_vm5, %v1694_v31, %v1693_v61  ;;  %v1769_v61 = vrot.slane %v3495_v4, 7 }
0x1266   :  { %v1707_v39 = vsel %vm372_vm5, %v1706_v54, %v1705_v21  ;;  %v1713_v1 = vsel %vm372_vm5, %v1712_v35, %v1711_v42  ;;  %v1719_v40 = vsel %vm372_vm5, %v1718_v47, %v1717_v32 }
0x126a   :  { %v1680_v57 = vpop.f32.mrf.mxu2 }
0x126b   :  { %v1735_v34 = vsel %vm372_vm5, %v1680_v57, %v1734_v44  ;;  %v1746_v37 = vrot.slane %v1680_v57, 2  ;;  %v1740_v15 = vrot.slane %v1680_v57, 1  ;;  %v1752_v2 = vrot.slane %v1680_v57, 3 }
0x126c   :  { %v2675_v0 = vpack.i.bf16 %v1735_v34, %v1689_v48  ;;  %v1758_v6 = vrot.slane %v1680_v57, 4  ;;  %v1723_v44 = vrot.slane %v1648_v62, 7  ;;  %v1770_v31 = vrot.slane %v1680_v57, 6 }
0x126d   :  { %v1747_v26 = vsel %vm372_vm5, %v1746_v37, %v1745_v51  ;;  %v1741_v45 = vsel %vm372_vm5, %v1740_v15, %v1739_v12  ;;  %v1753_v28 = vsel %vm372_vm5, %v1752_v2, %v1751_v46  ;;  %v1764_v49 = vrot.slane %v1680_v57, 5 }
0x126e   :  { %2676 = vrot.lane.b32.xlu1 %v2675_v0, %s2800_s24  ;;  %v2685_v7 = vpack.i.bf16 %v1747_v26, %v1701_v30  ;;  %v2680_v56 = vpack.i.bf16 %v1741_v45, %v1695_v29  ;;  %v1759_v14 = vsel %vm372_vm5, %v1758_v6, %v1757_v13  ;;  %v2690_v27 = vpack.i.bf16 %v1753_v28, %v1707_v39 }
0x126f   :  { %v2695_v33 = vpack.i.bf16 %v1759_v14, %v1713_v1  ;;  %v1725_v51 = vsel %vm372_vm5, %v1724_v58, %v1723_v44  ;;  %v1763_v12 = vrot.slane %v3495_v4, 6  ;;  %v1771_v48 = vsel %vm372_vm5, %v1770_v31, %v1769_v61 }
0x1270   :  { %2686 = vrot.lane.b32.xlu2 %v2685_v7, %s2801_s25  ;;  %2681 = vrot.lane.b32.xlu0 %v2680_v56, %s2802_s26  ;;  %v1731_v0 = vrot.slane %v1680_v57, 7 }
0x1271   :  { %v1765_v34 = vsel %vm372_vm5, %v1764_v49, %v1763_v12 }
0x1272   :  { %v1732_v45 = vsel %vm372_vm5, %v1731_v0, %v3495_v4 }
0x1276   :  { %2691 = vrot.lane.b32.xlu1 %v2690_v27, %s2803_s27 }
0x1278   :  { %1720 = vrot.lane.b32.xlu2 %v1719_v40, %s2799_s23  ;;  %2696 = vrot.lane.b32.xlu0 %v2695_v33, %s2804_s28 }
0x127e   :  { %1726 = vrot.lane.b32.xlu1 %v1725_v51, %s2805_s29 }
0x1280   :  { %1772 = vrot.lane.b32.xlu2 %v1771_v48, %s2805_s29  ;;  %1766 = vrot.lane.b32.xlu0 %v1765_v34, %s2799_s23 }
0x12ca   :  { %v2687_v24 = vpop.permute.xlu2 %2686 }
0x12cb   :  { %v2688_v56 = vunpack.i.l.bf16 %v2687_v24  ;;  %v2689_v47 = vunpack.i.h.bf16 %v2687_v24 }
0x12d2   :  { %v1721_v6 = vpop.permute.xlu2 %1720 }
0x12da   :  { %v1773_v31 = vpop.permute.xlu2 %1772 }
0x12e0   :  { %v2677_v62 = vpop.permute.xlu1 %2676 }
0x12e1   :  { %v2678_v37 = vunpack.i.l.bf16 %v2677_v62  ;;  %v2679_v26 = vunpack.i.h.bf16 %v2677_v62 }
0x12e2   :  { %v2682_v15 = vpop.permute.xlu0 %2681 }
0x12e3   :  { %v2683_v30 = vunpack.i.l.bf16 %v2682_v15  ;;  %v1775_v29 = vsel %vm462_vm6, %v3498_v25, %v2678_v37  ;;  %v2684_v2 = vunpack.i.h.bf16 %v2682_v15  ;;  %v1782_v54 = vsel %vm462_vm6, %v1732_v45, %v2679_v26 }
0x12e5   :  { %v1776_v7 = vsel %vm114_vm0, %v1775_v29, %v2683_v30  ;;  %v1783_v35 = vsel %vm114_vm0, %v1782_v54, %v2684_v2 }
0x12e6   :  { %v1777_v28 = vsel %vm465_vm7, %v1776_v7, %v2688_v56  ;;  %v1784_v14 = vsel %vm465_vm7, %v1783_v35, %v2689_v47  ;;  %vm3767_vm7 = vcmask 123904  }
0x12e7   :  { %vm3768_vm14 = vmmov %vm3767_vm7 }
0x12e8   :  { %v2692_v46 = vpop.permute.xlu1 %2691 }
0x12e9   :  { %v2693_v21 = vunpack.i.l.bf16 %v2692_v46  ;;  %v2694_v13 = vunpack.i.h.bf16 %v2692_v46 }
0x12ea   :  { %v2697_v57 = vpop.permute.xlu0 %2696 }
0x12eb   :  { %v1778_v25 = vsel %vm3759_vm1, %v1777_v28, %v2693_v21  ;;  %v2698_v39 = vunpack.i.l.bf16 %v2697_v57  ;;  %v2699_v42 = vunpack.i.h.bf16 %v2697_v57  ;;  %v1785_v27 = vsel %vm3761_vm4, %v1784_v14, %v2694_v13  ;;  %vm3769_vm1 = vmmov %vm3767_vm7 }
0x12ec   :  { %vm3770_vm4 = vmmov %vm3769_vm1 }
0x12ed   :  { %v1779_v4 = vsel %vm3760_vm3, %v1778_v25, %v2698_v39  ;;  %v1786_v44 = vsel %vm3764_vm10, %v1785_v27, %v2699_v42 }
0x12ee   :  { %v1780_v1 = vsel %vm3762_vm8, %v1779_v4, %v1721_v6 }
0x12f0   :  { %v1727_v32 = vpop.permute.xlu1 %1726 }
0x12f1   :  { %v1781_v33 = vsel %vm3763_vm9, %v1780_v1, %v1727_v32 }
0x12f2   :  { %v1789_v40 = vpack.c.bf16 %v1781_v33, %v1781_v33  ;;  %v1767_v58 = vpop.permute.xlu0 %1766 }
0x12f3   :  { %v1787_v49 = vsel %vm3765_vm11, %v1786_v44, %v1767_v58 }
0x12f4   :  { %v1788_v51 = vsel %vm3766_vm12, %v1787_v49, %v1773_v31  ;;  %1799 = vmatmul.bf16.vlgmr.msra.gmra.mxu3 %v1789_v40 }
0x12f5   :  { %v1790_v61 = vpack.c.bf16 %v1788_v51, %v1788_v51 }
0x12f7   :  { %1812 = vmatmul.bf16.vlgmr.msra.gmra.mxu0 %v1790_v61 }
0x1374   :  { %v1813_v12 = vpop.f32.mrf.mxu0 }
0x1377   :  { %v1800_v48 = vpop.f32.mrf.mxu3 }
0x1378   :  { %v1814_v34 = vadd.f32 %v1813_v12, %v1800_v48 }
0x137a   :  { %v1817_v24 = vsel %vm3767_vm7, %v1814_v34, -inf }
0x137b   :  { %1818 = vmax.xlane.f32.xlu1 %v1817_v24 }
0x137c   :  { %v1815_v62 = vpop.f32.mrf.mxu0 }
0x137f   :  { %v1802_v37 = vpop.f32.mrf.mxu3 }
0x13ee   :  { %v1819_v15 = vpop.xlane.xlu1 %1818 }
0x13ef   :  { %vm1820_vm13 = vcmp.ge.f32.partialorder %v1814_v34, %v1819_v15  ;;  %v1835_v7 = vsub.f32 %v1819_v15, %v1819_v15 }
0x13f0   :  { %v1821_v0 = vsel %vm1820_vm13, %v3751_v50, 16.0 }
0x13f1   :  { %v1822_v30 = vsel %vm3768_vm14, %v1821_v0, inf  ;;  %v1836_v56 = vmul.f32 1.442695, %v1835_v7 }
0x13f2   :  { %1823 = vmin.xlane.f32.xlu0 %v1822_v30 }
0x13f3   :  { %2755 = vpow2.f32 %v1836_v56 }
0x13f9   :  { %v2756_v13 = vpop.eup %2755 }
0x1406   :  { %1938 = vrot.lane.b32.xlu0 %v3437_v8, %s2799_s23 }
0x1465   :  { %v1824_v26 = vpop.xlane.xlu0 %1823 }
0x1466   :  { %vm1825_vm15 = vcmp.eq.f32.partialorder %v3751_v50, %v1824_v26  ;;  %v1844_v28 = vperm.slane %v1824_v26, 0  ;;  %v1845_v35 = vperm.slane %v1824_v26, 1 }
0x1467   :  { %v1826_v29 = vsel %vm1825_vm15, -1e+30, %v1814_v34 }
0x1468   :  { %v1827_v45 = vsel %vm3769_vm1, %v1826_v29, -inf  ;;  %v1849_v39 = vadd.f32 %v1844_v28, %v3756_v36  ;;  %v1850_v4 = vadd.f32 %v1845_v35, %v3755_v9  ;;  %v1851_v42 = vadd.f32 %v1845_v35, %v3756_v36 }
0x1469   :  { %1828 = vmax.xlane.f32.xlu2 %v1827_v45 }
0x146a   :  { %vm1853_vm9 = vcmp.eq.f32.partialorder %v1849_v39, %v3751_v50  ;;  %vm1861_vm11 = vcmp.eq.f32.partialorder %v1849_v39, %v3757_v19  ;;  %vm1854_vm12 = vcmp.eq.f32.partialorder %v1850_v4, %v3751_v50  ;;  %vm1855_vm7 = vcmp.eq.f32.partialorder %v1851_v42, %v3751_v50 }
0x146b   :  { %vm1862_vm13 = vcmp.eq.f32.partialorder %v1850_v4, %v3757_v19  ;;  %vm1863_vm14 = vcmp.eq.f32.partialorder %v1851_v42, %v3757_v19  ;;  %v1857_v27 = vsel %vm1853_vm9, 1.0, %v3758_v55  ;;  %v1865_v1 = vsel %vm1861_vm11, 1.0, %v3758_v55 }
0x146c   :  { %v1858_v40 = vsel %vm1854_vm12, 1.0, %v3758_v55  ;;  %v1859_v58 = vsel %vm1855_vm7, 1.0, %v3758_v55  ;;  %v1866_v44 = vsel %vm1862_vm13, 1.0, %v3758_v55  ;;  %v1867_v31 = vsel %vm1863_vm14, 1.0, %v3758_v55 }
0x146d   :  { %v1869_v61 = vadd.f32 %v1865_v1, %v1857_v27  ;;  %v1870_v12 = vadd.f32 %v1866_v44, %v1858_v40  ;;  %v1871_v48 = vadd.f32 %v1867_v31, %v1859_v58 }
0x1478   :  { %v1939_v2 = vpop.permute.xlu0 %1938 }
0x1479   :  { %1951 = vmatpush.bf16.msra.mxu1 %v1939_v2 }
0x1481   :  { %1963 = vrot.lane.b32.xlu2 %v3450_v60, %s2799_s23  ;;  %v1848_v60 = vadd.f32 %v1844_v28, %v3755_v9 }
0x1483   :  { %vm1852_vm8 = vcmp.eq.f32.partialorder %v1848_v60, %v3751_v50  ;;  %vm1860_vm10 = vcmp.eq.f32.partialorder %v1848_v60, %v3757_v19 }
0x1484   :  { %v1856_v14 = vsel %vm1852_vm8, 1.0, %v3758_v55  ;;  %v1864_v32 = vsel %vm1860_vm10, 1.0, %v3758_v55 }
0x1485   :  { %v1868_v51 = vadd.f32 %v1864_v32, %v1856_v14 }
0x14dc   :  { %v1829_v54 = vpop.xlane.xlu2 %1828 }
0x14dd   :  { %vm1830_vm3 = vcmp.ge.f32.partialorder %v1826_v29, %v1829_v54  ;;  %v1838_v46 = vsub.f32 %v1829_v54, %v1819_v15 }
0x14de   :  { %v1831_v6 = vsel %vm1830_vm3, %v3751_v50, 16.0 }
0x14df   :  { %v1839_v8 = vmul.f32 1.442695, %v1838_v46  ;;  %v1832_v21 = vsel %vm3770_vm4, %v1831_v6, inf }
0x14e0   :  { %1833 = vmin.xlane.f32.xlu1 %v1832_v21 }
0x14e1   :  { %2757 = vpow2.f32 %v1839_v8 }
0x14e4   :  { %v1964_v57 = vpop.permute.xlu2 %1963 }
0x14e5   :  { %1976 = vmatpush.bf16.msrb.mxu2 %v1964_v57 }
0x14e7   :  { %v2758_v25 = vpop.eup %2757 }
0x14e8   :  { %v1841_v47 = vadd.f32 %v2758_v25, %v2756_v13 }
0x14ea   :  { %2759 = vrcp.f32 %v1841_v47 }
0x14f0   :  { %v2760_v33 = vpop.eup %2759 }
0x14f1   :  { %v1872_v49 = vmul.f32 %v2760_v33, %v2756_v13  ;;  %v1915_v30 = vmul.f32 %v2760_v33, %v2758_v25 }
0x14f3   :  { %v1874_v34 = vperm.slane %v1872_v49, 0  ;;  %v1875_v24 = vperm.slane %v1872_v49, 1  ;;  %v1917_v46 = vperm.slane %v1915_v30, 0  ;;  %v1918_v6 = vperm.slane %v1915_v30, 1 }
0x14f5   :  { %v1878_v62 = vmul.f32 %v1874_v34, %v1868_v51  ;;  %v1879_v37 = vmul.f32 %v1874_v34, %v1869_v61  ;;  %v1880_v15 = vmul.f32 %v1875_v24, %v1870_v12  ;;  %v1881_v0 = vmul.f32 %v1875_v24, %v1871_v48  ;;  %v1552_v48 = vld [vmem:[#allocation2 + $0x2f0] sm:$0xff]  ;;  %v1553_v34 = vld [vmem:[#allocation2 + $0x2f8] sm:$0xff] }
0x14f6   :  { %v1986_v24 = vpack.c.bf16 %v1553_v34, %v1552_v48 }
0x14f8   :  { %2000 = vmatpush.bf16.msrb.mxu3 %v1986_v24 }
0x1553   :  { %v1834_v26 = vpop.xlane.xlu1 %1833 }
0x1554   :  { %v1887_v29 = vperm.slane %v1834_v26, 0  ;;  %v1888_v45 = vperm.slane %v1834_v26, 1 }
0x1556   :  { %v1891_v2 = vadd.f32 %v1887_v29, %v3755_v9  ;;  %v1892_v7 = vadd.f32 %v1887_v29, %v3756_v36  ;;  %v1893_v56 = vadd.f32 %v1888_v45, %v3755_v9  ;;  %v1894_v54 = vadd.f32 %v1888_v45, %v3756_v36 }
0x1558   :  { %vm1895_vm15 = vcmp.eq.f32.partialorder %v1891_v2, %v3751_v50  ;;  %vm1896_vm1 = vcmp.eq.f32.partialorder %v1892_v7, %v3751_v50  ;;  %vm1897_vm3 = vcmp.eq.f32.partialorder %v1893_v56, %v3751_v50  ;;  %vm1898_vm4 = vcmp.eq.f32.partialorder %v1894_v54, %v3751_v50 }
0x1559   :  { %v1899_v8 = vsel %vm1895_vm15, 1.0, %v3758_v55  ;;  %v1900_v21 = vsel %vm1896_vm1, 1.0, %v3758_v55  ;;  %v1901_v28 = vsel %vm1897_vm3, 1.0, %v3758_v55  ;;  %v1902_v9 = vsel %vm1898_vm4, 1.0, %v3758_v55 }
0x155a   :  { %vm1903_vm8 = vcmp.eq.f32.partialorder %v1891_v2, %v3757_v19  ;;  %vm1904_vm9 = vcmp.eq.f32.partialorder %v1892_v7, %v3757_v19  ;;  %vm1905_vm10 = vcmp.eq.f32.partialorder %v1893_v56, %v3757_v19  ;;  %vm1906_vm11 = vcmp.eq.f32.partialorder %v1894_v54, %v3757_v19 }
0x155b   :  { %v1907_v36 = vsel %vm1903_vm8, 1.0, %v3758_v55  ;;  %v1908_v50 = vsel %vm1904_vm9, 1.0, %v3758_v55  ;;  %v1909_v57 = vsel %vm1905_vm10, 1.0, %v3758_v55  ;;  %v1910_v35 = vsel %vm1906_vm11, 1.0, %v3758_v55 }
0x155c   :  { %v1911_v13 = vadd.f32 %v1907_v36, %v1899_v8  ;;  %v1912_v25 = vadd.f32 %v1908_v50, %v1900_v21  ;;  %v1913_v60 = vadd.f32 %v1909_v57, %v1901_v28  ;;  %v1914_v39 = vadd.f32 %v1910_v35, %v1902_v9 }
0x155d   :  { %vm3771_vm11 = vcmask 523264  }
0x155e   :  { %v1921_v47 = vmul.f32 %v1917_v46, %v1911_v13  ;;  %v1922_v4 = vmul.f32 %v1917_v46, %v1912_v25  ;;  %v1923_v42 = vmul.f32 %v1918_v6, %v1913_v60  ;;  %v1924_v14 = vmul.f32 %v1918_v6, %v1914_v39  ;;  %v2728_v46 = vld [vmem:[#allocation2 + $0x300] ss:$0 sm:$0xff]  ;;  %v2044_v60 = vld [vmem:[#allocation2 + $0x318] sm:$0xff] }
0x155f   :  { %v2045_v39 = vld [vmem:[#allocation2 + $0x320] sm:$0xff] }
0x1560   :  { %v1925_v27 = vadd.f32 %v1921_v47, %v1878_v62  ;;  %v1926_v32 = vadd.f32 %v1922_v4, %v1879_v37  ;;  %v1927_v1 = vadd.f32 %v1923_v42, %v1880_v15  ;;  %v1928_v19 = vadd.f32 %v1924_v14, %v1881_v0  ;;  %v1550_v62 = vld [vmem:[#allocation2 + $0x2e0] sm:$0xff]  ;;  %v1551_v37 = vld [vmem:[#allocation2 + $0x2e8] sm:$0xff] }
0x1561   :  { %v1985_v15 = vpack.c.bf16 %v1551_v37, %v1550_v62  ;;  %v2049_v47 = vpack.c.bf16 %v2045_v39, %v2044_v60 }
0x1562   :  { %v1929_v33 = vpack.c.bf16 %v1925_v27, %v1925_v27  ;;  %v1930_v40 = vpack.c.bf16 %v1926_v32, %v1926_v32  ;;  %v1931_v58 = vpack.c.bf16 %v1927_v1, %v1927_v1  ;;  %v1932_v44 = vpack.c.bf16 %v1928_v19, %v1928_v19 }
0x1563   :  { %2001 = vmatpush.bf16.msrb.mxu3 %v1985_v15  ;;  %2062 = vmatpush.bf16.msrb.mxu1 %v2049_v47 }
0x1564   :  { %v1935_v31 = vunpack.c.l.b16 %v1929_v33  ;;  %v1936_v49 = vunpack.c.l.b16 %v1930_v40  ;;  %v1960_v51 = vunpack.c.l.b16 %v1931_v58  ;;  %v1961_v55 = vunpack.c.l.b16 %v1932_v44  ;;  %v2081_v58 = vld [vmem:[#allocation2 + $0x338] sm:$0xff]  ;;  %v2082_v44 = vld [vmem:[#allocation2 + $0x340] sm:$0xff] }
0x1566   :  { %v1937_v61 = vpack.c.b16 %v1936_v49, %v1935_v31  ;;  %v1962_v12 = vpack.c.b16 %v1961_v55, %v1960_v51  ;;  %v2086_v31 = vpack.c.bf16 %v2082_v44, %v2081_v58  ;;  %v2079_v49 = vld [vmem:[#allocation2 + $0x328] sm:$0xff]  ;;  %v2080_v51 = vld [vmem:[#allocation2 + $0x330] sm:$0xff] }
0x1567   :  { %v2085_v55 = vpack.c.bf16 %v2080_v51, %v2079_v49 }
0x1568   :  { %2536 = vmatmul.msk.bf16.vlgmr.msra.gmra.mxu1 %vm462_vm6, %v1937_v61  ;;  %2537 = vmatmul.msk.bf16.vlgmr.msrb.gmra.mxu2 %vm462_vm6, %v1962_v12 }
0x1569   :  { %2099 = vmatpush.bf16.msra.mxu2 %v2086_v31 }
0x156d   :  { %2100 = vmatpush.bf16.msra.mxu2 %v2085_v55 }
0x15e5   :  { %v1953_v0 = vpop.f32.mrf.mxu1 }
0x15eb   :  { %v1978_v29 = vpop.f32.mrf.mxu2 }
0x15ed   :  { %v1955_v30 = vpop.f32.mrf.mxu1 }
0x15ee   :  { %v1983_v26 = vpack.c.bf16 %v1955_v30, %v1953_v0 }
0x15f0   :  { %2538 = vmatmul.msk.bf16.vlgmr.msrb.gmra.mxu3 %vm114_vm0, %v1983_v26 }
0x15f3   :  { %v1980_v45 = vpop.f32.mrf.mxu2 }
0x15f4   :  { %v1984_v2 = vpack.c.bf16 %v1980_v45, %v1978_v29 }
0x1600   :  { %2539 = vmatmul.msk.bf16.gmra.mxu3 %vm114_vm0, %v1984_v2 }
0x1673   :  { %v2003_v7 = vpop.f32.mrf.mxu3 }
0x1674   :  { %v2004_v9 = vadd.f32 %v2728_v46, %v2003_v7 }
0x1676   :  { %v2013_v13 = vadd.f32 %v2004_v9, %v3472_v18 }
0x167b   :  { %v2005_v56 = vpop.f32.mrf.mxu3 }
0x167c   :  { %v2006_v21 = vadd.f32 %v2728_v46, %v2005_v56 }
0x167e   :  { %v2014_v57 = vadd.f32 %v2006_v21, %v3475_v23 }
0x1680   :  { %v2017_v25 = vpack.c.bf16 %v2014_v57, %v2013_v13 }
0x1683   :  { %v2008_v54 = vpop.f32.mrf.mxu3 }
0x1684   :  { %v2009_v6 = vadd.f32 %v2728_v46, %v2008_v54 }
0x1686   :  { %v2015_v36 = vadd.f32 %v2009_v6, %v3485_v59  ;;  %v2042_v59 = vld [vmem:[#allocation2 + $0x308] sm:$0xff] }
0x168b   :  { %v2010_v8 = vpop.f32.mrf.mxu3 }
0x168c   :  { %v2011_v28 = vadd.f32 %v2728_v46, %v2010_v8 }
0x168e   :  { %v2016_v50 = vadd.f32 %v2011_v28, %v3488_v52  ;;  %v2043_v52 = vld [vmem:[#allocation2 + $0x310] sm:$0xff] }
0x168f   :  { %v2048_v4 = vpack.c.bf16 %v2043_v52, %v2042_v59 }
0x1690   :  { %v2018_v35 = vpack.c.bf16 %v2016_v50, %v2015_v36 }
0x1691   :  { %2063 = vmatpush.bf16.msrb.mxu1 %v2048_v4 }
0x1692   :  { %2025 = vmatpush.bf16.msrb.mxu0 %v2018_v35 }
0x1696   :  { %2026 = vmatpush.bf16.msrb.mxu0 %v2017_v25 }
0x1699   :  { %2540 = vmatmul.msk.bf16.vlgmr.msrb.gmra.mxu0 %vm114_vm0, %v2908_v22 }
0x16a9   :  { %2541 = vmatmul.msk.bf16.gmra.mxu0 %vm114_vm0, %v2853_v11 }
0x1716   :  { %v2028_v23 = vpop.f32.mrf.mxu0 }
0x1717   :  { %v2038_v18 = vsub.f32 %v2013_v13, %v2028_v23 }
0x171e   :  { %v2030_v42 = vpop.f32.mrf.mxu0 }
0x171f   :  { %v2039_v14 = vsub.f32 %v2014_v57, %v2030_v42 }
0x1721   :  { %v2046_v27 = vpack.c.bf16 %v2039_v14, %v2038_v18 }
0x1723   :  { %2542 = vmatmul.msk.bf16.vlgmr.msrb.gmra.mxu1 %vm114_vm0, %v2046_v27 }
0x1726   :  { %v2033_v32 = vpop.f32.mrf.mxu0 }
0x1727   :  { %v2040_v19 = vsub.f32 %v2015_v36, %v2033_v32  ;;  %v2141_v36 = vadd.f32 %v2028_v23, %v3464_v63 }
0x172e   :  { %v2035_v1 = vpop.f32.mrf.mxu0 }
0x172f   :  { %v2041_v33 = vsub.f32 %v2016_v50, %v2035_v1  ;;  %v2142_v50 = vadd.f32 %v2030_v42, %v3468_v41  ;;  %v2144_v59 = vadd.f32 %v2035_v1, %v3482_v53 }
0x1731   :  { %v2047_v40 = vpack.c.bf16 %v2041_v33, %v2040_v19 }
0x1733   :  { %2543 = vmatmul.msk.bf16.gmra.mxu1 %vm114_vm0, %v2047_v40 }
0x17a0   :  { %v2065_v61 = vpop.f32.mrf.mxu1 }
0x17a1   :  { %v2075_v48 = vmax.f32 %v2065_v61, 0.0 }
0x17a8   :  { %v2067_v12 = vpop.f32.mrf.mxu1 }
0x17a9   :  { %v2076_v34 = vmax.f32 %v2067_v12, 0.0 }
0x17ab   :  { %v2083_v24 = vpack.c.bf16 %v2076_v34, %v2075_v48 }
0x17ad   :  { %2544 = vmatmul.msk.bf16.vlgmr.msra.gmra.mxu2 %vm114_vm0, %v2083_v24 }
0x17b0   :  { %v2070_v62 = vpop.f32.mrf.mxu1 }
0x17b1   :  { %v2077_v15 = vmax.f32 %v2070_v62, 0.0 }
0x17b8   :  { %v2072_v37 = vpop.f32.mrf.mxu1 }
0x17b9   :  { %v2078_v0 = vmax.f32 %v2072_v37, 0.0 }
0x17bb   :  { %v2084_v30 = vpack.c.bf16 %v2078_v0, %v2077_v15 }
0x17bd   :  { %2545 = vmatmul.msk.bf16.gmra.mxu2 %vm114_vm0, %v2084_v30  ;;  %v2159_v30 = vld [vmem:[#allocation2 + $0x398] sm:$0xff] }
0x1830   :  { %v2102_v26 = vpop.f32.mrf.mxu2 }
0x1831   :  { %v2112_v6 = vadd.f32 %v2102_v26, %v2038_v18  ;;  %v2160_v26 = vld [vmem:[#allocation2 + $0x3a0] sm:$0xff] }
0x1838   :  { %v2104_v29 = vpop.f32.mrf.mxu2 }
0x1839   :  { %v2113_v54 = vadd.f32 %v2104_v29, %v2039_v14  ;;  %v2248_v29 = vpack.c.bf16 %v2160_v26, %v2159_v30 }
0x183b   :  { %v2116_v8 = vpack.c.bf16 %v2113_v54, %v2112_v6  ;;  %2257 = vmatpush.bf16.msrb.mxu2 %v2248_v29 }
0x1840   :  { %v2107_v45 = vpop.f32.mrf.mxu2 }
0x1841   :  { %v2114_v7 = vadd.f32 %v2107_v45, %v2040_v19 }
0x1848   :  { %v2109_v2 = vpop.f32.mrf.mxu2 }
0x1849   :  { %v2115_v56 = vadd.f32 %v2109_v2, %v2041_v33  ;;  %v2157_v2 = vld [vmem:[#allocation2 + $0x388] sm:$0xff] }
0x184b   :  { %v2117_v46 = vpack.c.bf16 %v2115_v56, %v2114_v7 }
0x184d   :  { %2124 = vmatpush.bf16.msra.mxu3 %v2117_v46  ;;  %v2155_v46 = vld [vmem:[#allocation2 + $0x378] sm:$0xff] }
0x1851   :  { %2125 = vmatpush.bf16.msra.mxu3 %v2116_v8 }
0x1854   :  { %2546 = vmatmul.msk.bf16.vlgmr.msra.gmra.mxu3 %vm114_vm0, %v2908_v22 }
0x1864   :  { %2547 = vmatmul.msk.bf16.gmra.mxu3 %vm114_vm0, %v2853_v11  ;;  %v2143_v11 = vadd.f32 %v2033_v32, %v3480_v38 }
0x18d7   :  { %v2127_v21 = vpop.f32.mrf.mxu3 }
0x18d8   :  { %v2137_v28 = vsub.f32 %v2112_v6, %v2127_v21  ;;  %v2145_v35 = vadd.f32 %v2141_v36, %v2127_v21  ;;  %v2156_v6 = vld [vmem:[#allocation2 + $0x380] sm:$0xff]  ;;  %v2153_v36 = vld [vmem:[#allocation2 + $0x368] sm:$0xff] }
0x18d9   :  { %v2246_v8 = vpack.c.bf16 %v2156_v6, %v2155_v46 }
0x18da   :  { %v2280_v9 = vsel %vm114_vm0, %v2137_v28, 0.0 }
0x18db   :  { %2281 = vadd.xlane.f32.xlu0 %v2280_v9 }
0x18df   :  { %v2129_v57 = vpop.f32.mrf.mxu3 }
0x18e0   :  { %v2146_v13 = vadd.f32 %v2142_v50, %v2129_v57  ;;  %v2138_v14 = vsub.f32 %v2113_v54, %v2129_v57  ;;  %v2154_v50 = vld [vmem:[#allocation2 + $0x370] sm:$0xff] }
0x18e1   :  { %v2245_v57 = vpack.c.bf16 %v2154_v50, %v2153_v36 }
0x18e2   :  { %v2700_v25 = vpack.i.bf16 %v2146_v13, %v2145_v35  ;;  %v2161_v60 = vpack.c.bf16 %v2146_v13, %v2145_v35  ;;  %v2283_v27 = vsel %vm114_vm0, %v2138_v14, 0.0  ;;  %v2151_v13 = vld [vmem:[#allocation2 + $0x358] sm:$0xff] }
0x18e7   :  { %v2132_v39 = vpop.f32.mrf.mxu3 }
0x18e8   :  { %v2139_v47 = vsub.f32 %v2114_v7, %v2132_v39  ;;  %v2147_v4 = vadd.f32 %v2143_v11, %v2132_v39  ;;  %v2158_v7 = vld [vmem:[#allocation2 + $0x390] sm:$0xff]  ;;  %v2149_v11 = vld [vmem:[#allocation2 + $0x348] sm:$0xff] }
0x18ea   :  { %v2286_v22 = vsel %vm114_vm0, %v2139_v47, 0.0 }
0x18eb   :  { %2287 = vadd.xlane.f32.xlu1 %v2286_v22 }
0x18ef   :  { %v2134_v52 = vpop.f32.mrf.mxu3 }
0x18f0   :  { %v2148_v18 = vadd.f32 %v2144_v59, %v2134_v52  ;;  %v2140_v63 = vsub.f32 %v2115_v56, %v2134_v52  ;;  %v2247_v56 = vpack.c.bf16 %v2158_v7, %v2157_v2  ;;  %v2150_v59 = vld [vmem:[#allocation2 + $0x350] sm:$0xff] }
0x18f1   :  { %v2243_v52 = vpack.c.bf16 %v2150_v59, %v2149_v11 }
0x18f2   :  { %v2710_v23 = vpack.i.bf16 %v2148_v18, %v2147_v4  ;;  %v2162_v41 = vpack.c.bf16 %v2148_v18, %v2147_v4  ;;  %v2289_v42 = vsel %vm114_vm0, %v2140_v63, 0.0  ;;  %2258 = vmatpush.bf16.msrb.mxu2 %v2247_v56 }
0x18f3   :  { %2290 = vadd.xlane.f32.xlu1 %v2289_v42 }
0x18f4   :  { %2169 = vmatpush.bf16.msra.mxu0 %v2162_v41  ;;  %2188 = vmatpush.bf16.msra.mxu1 %v2162_v41 }
0x18f6   :  { %2259 = vmatpush.bf16.msrb.mxu2 %v2246_v8 }
0x18f8   :  { %2170 = vmatpush.bf16.msra.mxu0 %v2161_v60  ;;  %2189 = vmatpush.bf16.msra.mxu1 %v2161_v60 }
0x18fa   :  { %2260 = vmatpush.bf16.msrb.mxu2 %v2245_v57 }
0x18fb   :  { %2284 = vadd.xlane.f32.xlu1 %v2283_v27  ;;  %2550 = vmatmul.msk.bf16.vlgmr.msra.gmra.mxu1 %vm114_vm0, %v2851_v10 }
0x18fc   :  { %2548 = vmatmul.msk.bf16.vlgmr.msra.gmra.mxu0 %vm114_vm0, %v2861_v17 }
0x190b   :  { %2551 = vmatmul.msk.bf16.gmra.mxu1 %vm114_vm0, %v2859_v16 }
0x190c   :  { %2549 = vmatmul.msk.bf16.gmra.mxu0 %vm114_vm0, %v2867_v20 }
0x194e   :  { %v2282_v38 = vpop.xlane.xlu0 %2281 }
0x194f   :  { %v2292_v53 = vmul.f32 %v2282_v38, %v3220_v5 }
0x1951   :  { %v3635_v32 = vsub.f32 %v2137_v28, %v2292_v53 }
0x1953   :  { %v2300_v1 = vmul.f32 %v3635_v32, %v3635_v32 }
0x1955   :  { %v2304_v19 = vsel %vm114_vm0, %v2300_v1, 0.0 }
0x1956   :  { %2305 = vadd.xlane.f32.xlu1 %v2304_v19 }
0x195e   :  { %v2288_v10 = vpop.xlane.xlu1 %2287 }
0x195f   :  { %v2294_v17 = vmul.f32 %v2288_v10, %v3220_v5 }
0x1961   :  { %v3641_v33 = vsub.f32 %v2139_v47, %v2294_v17 }
0x1963   :  { %v2302_v16 = vmul.f32 %v3641_v33, %v3641_v33 }
0x1965   :  { %v2310_v20 = vsel %vm114_vm0, %v2302_v16, 0.0 }
0x1966   :  { %2311 = vadd.xlane.f32.xlu2 %v2310_v20  ;;  %v2291_v40 = vpop.xlane.xlu1 %2290 }
0x1967   :  { %v2295_v58 = vmul.f32 %v2291_v40, %v3220_v5 }
0x1969   :  { %v3647_v44 = vsub.f32 %v2140_v63, %v2295_v58 }
0x196b   :  { %v2303_v31 = vmul.f32 %v3647_v44, %v3647_v44 }
0x196d   :  { %v2313_v49 = vsel %vm114_vm0, %v2303_v31, 0.0 }
0x196e   :  { %2314 = vadd.xlane.f32.xlu1 %v2313_v49  ;;  %v2285_v51 = vpop.xlane.xlu1 %2284 }
0x196f   :  { %v2293_v55 = vmul.f32 %v2285_v51, %v3220_v5 }
0x1971   :  { %v3653_v61 = vsub.f32 %v2138_v14, %v2293_v55 }
0x1973   :  { %v2301_v12 = vmul.f32 %v3653_v61, %v3653_v61 }
0x1975   :  { %v2307_v48 = vsel %vm114_vm0, %v2301_v12, 0.0 }
0x1976   :  { %2308 = vadd.xlane.f32.xlu1 %v2307_v48 }
0x1978   :  { %v2191_v34 = vpop.f32.mrf.mxu1 }
0x1979   :  { %v2172_v58 = vpop.f32.mrf.mxu0 }
0x197e   :  { %2711 = vrot.lane.b32.xlu2 %v2710_v23, %s2802_s26 }
0x1980   :  { %v2193_v24 = vpop.f32.mrf.mxu1 }
0x1981   :  { %v2705_v62 = vpack.i.bf16 %v2193_v24, %v2191_v34  ;;  %v2729_v24 = vld [vmem:[#allocation2 + $0x3a8] ss:$0 sm:$0xff]  ;;  %v2174_v2 = vpop.f32.mrf.mxu0 }
0x1983   :  { %2706 = vrot.lane.b32.xlu0 %v2705_v62, %s2803_s27 }
0x1988   :  { %v2196_v37 = vpop.f32.mrf.mxu1 }
0x198f   :  { %2701 = vrot.lane.b32.xlu1 %v2700_v25, %s2802_s26  ;;  %v2152_v25 = vld [vmem:[#allocation2 + $0x360] sm:$0xff] }
0x1990   :  { %v2198_v15 = vpop.f32.mrf.mxu1  ;;  %v2244_v60 = vpack.c.bf16 %v2152_v25, %v2151_v13 }
0x1991   :  { %v2715_v0 = vpack.i.bf16 %v2198_v15, %v2196_v37 }
0x1992   :  { %2261 = vmatpush.bf16.msrb.mxu2 %v2244_v60 }
0x1996   :  { %2262 = vmatpush.bf16.msrb.mxu2 %v2243_v52 }
0x1997   :  { %2716 = vrot.lane.b32.xlu1 %v2715_v0, %s2803_s27 }
0x19c9   :  { %v2306_v45 = vpop.xlane.xlu1 %2305 }
0x19ca   :  { %v2316_v54 = vmul.f32 %v2306_v45, %v3220_v5  ;;  %v2730_v45 = vld [vmem:[#allocation2 + $0x3b0] ss:$0 sm:$0xff] }
0x19cc   :  { %v2320_v21 = vadd.f32 1e-05, %v2316_v54 }
0x19ce   :  { %2761 = vrsqrt.f32 %v2320_v21  ;;  %vm2330_vm3 = vweird.f32 %v2320_v21 }
0x19d4   :  { %v2762_v47 = vpop.eup %2761 }
0x19d5   :  { %v2325_v63 = vmul.f32 %v2762_v47, %v2320_v21  ;;  %vm2331_vm14 = vweird.f32 %v2762_v47 }
0x19d6   :  { %vm2332_vm4 = vmor %vm2330_vm3, %vm2331_vm14 }
0x19d7   :  { %v2326_v42 = vmul.f32 %v2762_v47, %v2325_v63 }
0x19d9   :  { %v2312_v28 = vpop.xlane.xlu2 %2311  ;;  %v2327_v10 = vmul.f32 0.5, %v2326_v42 }
0x19da   :  { %v2318_v9 = vmul.f32 %v2312_v28, %v3220_v5 }
0x19db   :  { %v2328_v40 = vsub.f32 1.5, %v2327_v10 }
0x19dc   :  { %v2322_v35 = vadd.f32 1e-05, %v2318_v9 }
0x19dd   :  { %v2329_v12 = vmul.f32 %v2762_v47, %v2328_v40 }
0x19de   :  { %2763 = vrsqrt.f32 %v2322_v35  ;;  %vm2350_vm12 = vweird.f32 %v2322_v35 }
0x19df   :  { %v2333_v30 = vsel %vm2332_vm4, %v2762_v47, %v2329_v12  ;;  %v2177_v47 = vpop.f32.mrf.mxu0 }
0x19e1   :  { %v2315_v39 = vpop.xlane.xlu1 %2314  ;;  %v2712_v52 = vpop.permute.xlu2 %2711 }
0x19e2   :  { %v2319_v22 = vmul.f32 %v2315_v39, %v3220_v5  ;;  %v2713_v63 = vunpack.i.l.bf16 %v2712_v52 }
0x19e4   :  { %v2764_v4 = vpop.eup %2763  ;;  %v2323_v18 = vadd.f32 1e-05, %v2319_v22 }
0x19e5   :  { %v2345_v23 = vmul.f32 %v2764_v4, %v2322_v35  ;;  %vm2351_vm6 = vweird.f32 %v2764_v4 }
0x19e6   :  { %2765 = vrsqrt.f32 %v2323_v18  ;;  %vm2352_vm7 = vmor %vm2350_vm12, %vm2351_vm6  ;;  %vm2360_vm15 = vweird.f32 %v2323_v18  ;;  %vm3773_vm12 = vcmask 785408  }
0x19e7   :  { %v2346_v41 = vmul.f32 %v2764_v4, %v2345_v23  ;;  %vm3772_vm6 = vmmov %vm3771_vm11  ;;  %v2179_v23 = vpop.f32.mrf.mxu0 }
0x19e8   :  { %vm3776_vm14 = vmmov %vm3773_vm12 }
0x19e9   :  { %v2347_v14 = vmul.f32 0.5, %v2346_v41  ;;  %v2309_v27 = vpop.xlane.xlu1 %2308 }
0x19ea   :  { %v2317_v38 = vmul.f32 %v2309_v27, %v3220_v5 }
0x19eb   :  { %v2348_v53 = vsub.f32 1.5, %v2347_v14  ;;  %v2235_v14 = vsel %vm114_vm0, %v2177_v47, %v2713_v63 }
0x19ec   :  { %v2766_v1 = vpop.eup %2765  ;;  %v2321_v19 = vadd.f32 1e-05, %v2317_v38 }
0x19ed   :  { %v2349_v17 = vmul.f32 %v2764_v4, %v2348_v53  ;;  %v2355_v16 = vmul.f32 %v2766_v1, %v2323_v18  ;;  %vm2361_vm13 = vweird.f32 %v2766_v1  ;;  %v2714_v18 = vunpack.i.h.bf16 %v2712_v52 }
0x19ee   :  { %2767 = vrsqrt.f32 %v2321_v19  ;;  %vm2362_vm1 = vmor %vm2360_vm15, %vm2361_vm13  ;;  %vm2340_vm9 = vweird.f32 %v2321_v19 }
0x19ef   :  { %v2356_v20 = vmul.f32 %v2766_v1, %v2355_v16  ;;  %v2353_v31 = vsel %vm2352_vm7, %v2764_v4, %v2349_v17  ;;  %v2236_v27 = vsel %vm114_vm0, %v2179_v23, %v2714_v18  ;;  %vm3774_vm7 = vmmov %vm3772_vm6  ;;  %v2399_v17 = vld [vmem:[#allocation2 + $0x3b8] sm:$0xff]  ;;  %v2400_v16 = vld [vmem:[#allocation2 + $0x3c0] sm:$0xff] }
0x19f0   :  { %v2366_v5 = vmul.f32 %v2353_v31, %v3641_v33  ;;  %v2364_v33 = vmul.f32 %v2333_v30, %v3635_v32  ;;  %vm3775_vm13 = vmmov %vm3772_vm6 }
0x19f1   :  { %v2357_v49 = vmul.f32 0.5, %v2356_v20  ;;  %v2405_v20 = vpack.c.bf16 %v2400_v16, %v2399_v17 }
0x19f2   :  { %v2371_v0 = vmul.f32 %v2729_v24, %v2366_v5  ;;  %v2369_v28 = vmul.f32 %v2729_v24, %v2364_v33 }
0x19f3   :  { %v2358_v51 = vsub.f32 1.5, %v2357_v49 }
0x19f4   :  { %v2768_v55 = vpop.eup %2767  ;;  %v2376_v56 = vadd.f32 %v2730_v45, %v2371_v0  ;;  %v2374_v60 = vadd.f32 %v2730_v45, %v2369_v28 }
0x19f5   :  { %v2359_v48 = vmul.f32 %v2766_v1, %v2358_v51  ;;  %v2335_v34 = vmul.f32 %v2768_v55, %v2321_v19  ;;  %vm2341_vm8 = vweird.f32 %v2768_v55  ;;  %v2707_v8 = vpop.permute.xlu0 %2706  ;;  %v2402_v19 = vld [vmem:[#allocation2 + $0x3d0] sm:$0xff] }
0x19f6   :  { %vm2342_vm10 = vmor %vm2340_vm9, %vm2341_vm8  ;;  %v2709_v36 = vunpack.i.h.bf16 %v2707_v8  ;;  %v2708_v50 = vunpack.i.l.bf16 %v2707_v8 }
0x19f7   :  { %v2363_v62 = vsel %vm2362_vm1, %v2766_v1, %v2359_v48  ;;  %v2336_v37 = vmul.f32 %v2768_v55, %v2335_v34  ;;  %v3777_v48 = vld [vmem:[#allocation7_spill] sm:$0xff] }
0x19f8   :  { %v2367_v15 = vmul.f32 %v2363_v62, %v3647_v44 }
0x19f9   :  { %v2337_v26 = vmul.f32 0.5, %v2336_v37  ;;  %v2438_v37 = vld [vmem:[#allocation2 + $0x3e0] sm:$0xff] }
0x19fa   :  { %v2372_v29 = vmul.f32 %v2729_v24, %v2367_v15 }
0x19fb   :  { %v2338_v7 = vsub.f32 1.5, %v2337_v26 }
0x19fc   :  { %v2377_v54 = vadd.f32 %v2730_v45, %v2372_v29 }
0x19fd   :  { %v2339_v46 = vmul.f32 %v2768_v55, %v2338_v7 }
0x19fe   :  { %v2379_v6 = vpack.c.bf16 %v2377_v54, %v2376_v56  ;;  %v2440_v56 = vld [vmem:[#allocation2 + $0x3f0] sm:$0xff] }
0x19ff   :  { %v2343_v21 = vsel %vm2342_vm10, %v2768_v55, %v2339_v46 }
0x1a00   :  { %v2365_v44 = vmul.f32 %v2343_v21, %v3653_v61  ;;  %2386 = vmatpush.bf16.msrb.mxu3 %v2379_v6  ;;  %v3779_v6 = vld [vmem:[#allocation8_spill] sm:$0xff] }
0x1a01   :  { %v2702_v9 = vpop.permute.xlu1 %2701 }
0x1a02   :  { %v2704_v57 = vunpack.i.h.bf16 %v2702_v9  ;;  %v2703_v35 = vunpack.i.l.bf16 %v2702_v9  ;;  %v2370_v13 = vmul.f32 %v2729_v24, %v2365_v44 }
0x1a04   :  { %v2234_v32 = vsel %vm114_vm0, %v2174_v2, %v2704_v57  ;;  %v2233_v25 = vsel %vm114_vm0, %v2172_v58, %v2703_v35  ;;  %v2375_v39 = vadd.f32 %v2730_v45, %v2370_v13  ;;  %v3778_v2 = vld [vmem:[#allocation5_spill] sm:$0xff]  ;;  %v3780_v57 = vld [vmem:[#allocation6_spill] sm:$0xff] }
0x1a05   :  { %v2237_v22 = vsel %vm3771_vm11, %v2233_v25, %v2708_v50  ;;  %v2238_v11 = vsel %vm3772_vm6, %v2234_v32, %v2709_v36  ;;  %v2439_v50 = vld [vmem:[#allocation2 + $0x3e8] sm:$0xff]  ;;  %v2441_v32 = vld [vmem:[#allocation2 + $0x3f8] sm:$0xff] }
0x1a06   :  { %v2241_v61 = vpack.c.bf16 %v2238_v11, %v2237_v22  ;;  %v2378_v59 = vpack.c.bf16 %v2375_v39, %v2374_v60 }
0x1a08   :  { %2552 = vmatmul.msk.bf16.vlgmr.msrb.gmra.mxu2 %vm3773_vm12, %v2241_v61  ;;  %2387 = vmatpush.bf16.msrb.mxu3 %v2378_v59 }
0x1a09   :  { %v2717_v4 = vpop.permute.xlu1 %2716 }
0x1a0a   :  { %v2719_v41 = vunpack.i.h.bf16 %v2717_v4  ;;  %v2718_v42 = vunpack.i.l.bf16 %v2717_v4 }
0x1a0b   :  { %2554 = vmatmul.msk.bf16.vlgmr.msrb.gmra.mxu3 %vm114_vm0, %v3254_v43  ;;  %v2401_v43 = vld [vmem:[#allocation2 + $0x3c8] sm:$0xff] }
0x1a0c   :  { %v2240_v38 = vsel %vm3774_vm7, %v2236_v27, %v2719_v41  ;;  %v2239_v53 = vsel %vm3775_vm13, %v2235_v14, %v2718_v42  ;;  %v2406_v10 = vpack.c.bf16 %v2402_v19, %v2401_v43 }
0x1a0d   :  { %v2242_v1 = vpack.c.bf16 %v2240_v38, %v2239_v53 }
0x1a0e   :  { %2421 = vmatpush.bf16.msrb.mxu0 %v2406_v10 }
0x1a12   :  { %2422 = vmatpush.bf16.msrb.mxu0 %v2405_v20 }
0x1a18   :  { %2553 = vmatmul.msk.bf16.gmra.mxu2 %vm3776_vm14, %v2242_v1  ;;  %v2732_v1 = vld [vmem:[#allocation2 + $0x400] ss:$0 sm:$0xff] }
0x1a1b   :  { %2555 = vmatmul.msk.bf16.gmra.mxu3 %vm114_vm0, %v3261_v3  ;;  %v2731_v3 = vld [vmem:[#allocation2 + $0x3d8] ss:$0 sm:$0xff] }
0x1a8b   :  { %v2264_v5 = vpop.f32.mrf.mxu2 }
0x1a8c   :  { %v2274_v34 = vadd.f32 %v2264_v5, %v3777_v48 }
0x1a8e   :  { %v2389_v40 = vpop.f32.mrf.mxu3 }
0x1a93   :  { %v2266_v62 = vpop.f32.mrf.mxu2 }
0x1a94   :  { %v2275_v8 = vadd.f32 %v2266_v62, %v3779_v6 }
0x1a96   :  { %v2391_v58 = vpop.f32.mrf.mxu3 }
0x1a97   :  { %v2403_v31 = vpack.c.bf16 %v2391_v58, %v2389_v40 }
0x1a99   :  { %2556 = vmatmul.msk.bf16.vlgmr.msrb.gmra.mxu0 %vm114_vm0, %v2403_v31 }
0x1a9b   :  { %v2269_v29 = vpop.f32.mrf.mxu2 }
0x1a9c   :  { %v2276_v7 = vadd.f32 %v2269_v29, %v3778_v2 }
0x1a9e   :  { %v2394_v49 = vpop.f32.mrf.mxu3 }
0x1aa3   :  { %v2271_v44 = vpop.f32.mrf.mxu2 }
0x1aa4   :  { %v2277_v35 = vadd.f32 %v2271_v44, %v3780_v57 }
0x1aa6   :  { %v2396_v51 = vpop.f32.mrf.mxu3 }
0x1aa7   :  { %v2404_v55 = vpack.c.bf16 %v2396_v51, %v2394_v49 }
0x1aa9   :  { %2557 = vmatmul.msk.bf16.gmra.mxu0 %vm114_vm0, %v2404_v55  ;;  %vm2481_vm0 = vcmask 1024  }
0x1b16   :  { %v2424_v12 = vpop.f32.mrf.mxu0 }
0x1b17   :  { %v2425_v24 = vadd.f32 %v2731_v3, %v2424_v12 }
0x1b19   :  { %v2434_v15 = vadd.f32 %v2425_v24, %v2274_v34 }
0x1b1b   :  { %v2442_v0 = vmul.f32 %v2438_v37, %v2434_v15 }
0x1b1d   :  { %v2446_v30 = vsel %vm228_vm2, %v2442_v0, 0.0 }
0x1b1e   :  { %v2426_v26 = vpop.f32.mrf.mxu0  ;;  %2447 = vadd.xlane.f32.xlu2 %v2446_v30 }
0x1b1f   :  { %v2427_v54 = vadd.f32 %v2731_v3, %v2426_v26 }
0x1b21   :  { %v2435_v28 = vadd.f32 %v2427_v54, %v2275_v8 }
0x1b23   :  { %v2443_v60 = vmul.f32 %v2439_v50, %v2435_v28 }
0x1b25   :  { %v2449_v47 = vsel %vm228_vm2, %v2443_v60, 0.0 }
0x1b26   :  { %v2429_v45 = vpop.f32.mrf.mxu0 }
0x1b27   :  { %v2430_v33 = vadd.f32 %v2731_v3, %v2429_v45 }
0x1b29   :  { %v2436_v46 = vadd.f32 %v2430_v33, %v2276_v7 }
0x1b2b   :  { %v2444_v21 = vmul.f32 %v2440_v56, %v2436_v46 }
0x1b2d   :  { %v2452_v9 = vsel %vm228_vm2, %v2444_v21, 0.0 }
0x1b2e   :  { %v2431_v36 = vpop.f32.mrf.mxu0  ;;  %2453 = vadd.xlane.f32.xlu0 %v2452_v9 }
0x1b2f   :  { %v2432_v13 = vadd.f32 %v2731_v3, %v2431_v36 }
0x1b31   :  { %v2437_v25 = vadd.f32 %v2432_v13, %v2277_v35 }
0x1b33   :  { %v2445_v39 = vmul.f32 %v2441_v32, %v2437_v25 }
0x1b35   :  { %v2455_v22 = vsel %vm228_vm2, %v2445_v39, 0.0 }
0x1b36   :  { %2450 = vadd.xlane.f32.xlu0 %v2449_v47  ;;  %2456 = vadd.xlane.f32.xlu1 %v2455_v22 }
0x1b91   :  { %v2448_v61 = vpop.xlane.xlu2 %2447 }
0x1ba1   :  { %v2454_v11 = vpop.xlane.xlu0 %2453 }
0x1ba9   :  { %v2451_v59 = vpop.xlane.xlu0 %2450  ;;  %v2457_v52 = vpop.xlane.xlu1 %2456 }
0x1baa   :  { %v2458_v4 = vadd.f32 %v2451_v59, %v2448_v61  ;;  %v2465_v18 = vadd.f32 %v2457_v52, %v2454_v11 }
0x1bac   :  { %v2459_v63 = vrot.slane %v2458_v4, 4  ;;  %v2466_v23 = vrot.slane %v2465_v18, 4 }
0x1bae   :  { %v2460_v41 = vadd.f32 %v2459_v63, %v2458_v4  ;;  %v2467_v42 = vadd.f32 %v2466_v23, %v2465_v18 }
0x1bb0   :  { %v2461_v14 = vrot.slane %v2460_v41, 2  ;;  %v2468_v27 = vrot.slane %v2467_v42, 2 }
0x1bb2   :  { %v2462_v38 = vadd.f32 %v2461_v14, %v2460_v41  ;;  %v2469_v53 = vadd.f32 %v2468_v27, %v2467_v42 }
0x1bb4   :  { %v2463_v43 = vrot.slane %v2462_v38, 1  ;;  %v2470_v19 = vrot.slane %v2469_v53, 1 }
0x1bb6   :  { %v2464_v10 = vadd.f32 %v2463_v43, %v2462_v38  ;;  %v2471_v17 = vadd.f32 %v2470_v19, %v2469_v53 }
0x1bb8   :  { %v2475_v16 = vadd.f32 %v2732_v1, %v2471_v17  ;;  %v2474_v20 = vadd.f32 %v2732_v1, %v2464_v10 }
0x1bba   :  { %v2478_v40 = vrot.slane %v2475_v16, 7 }
0x1bbc   :  { %v2479_v58 = vsel %vm372_vm5, %v2478_v40, %v2474_v20 }
0x1bbd   :  { %2482 = vst.msk [vmem:[%s3700_s2] sm:$0x3] %vm2481_vm0, %v2479_v58 }
0x1bbe   :  { %2487 = vsyncpa [#allocation3], 1 }

</bundles_post_ra>
